<compile_context>
chip_gen: v7x
topology: tpu7x:2x2x1
jax: 0.10.0
libtpu: 0.0.40
codegen_flags: <defaults>
</compile_context>

<pallas_src>
import jax
import jax.numpy as jnp
from jax.experimental import pallas as pl
from jax.experimental.pallas import tpu as pltpu

BN_EPS = 1e-5
LANE = 128
COMPUTE_DT = jnp.bfloat16          # MXU operand / activation dtype (f32 accum)


# --------------------------- sizing helpers ---------------------------------
def _vmem_capacity_bytes():
    try:
        cap = int(pltpu.get_tpu_info().vmem_capacity_bytes)
        if cap > 0:
            return cap
    except Exception:
        pass
    return 64 * 2 ** 20            # conservative default (v7x per-TensorCore)


def _footprint_bytes(nb, H, W, Cin, Cmid_p, Cout_p, stride):
    """Conservative per-grid-step VMEM footprint for a batch tile of nb images."""
    Ho, Wo = H // stride, W // stride
    mi = nb * H * W                # rows seen by conv1
    mo = nb * Ho * Wo              # rows seen by conv3 / residual / output
    C, F = 2, 4                    # bf16 / f32 bytes
    f = 0
    f += 2 * mi * Cin * C                               # x block (double buffered)
    if stride == 2:
        f += 2 * mo * Cin * C                           # decimated residual block
    f += 2 * mo * Cout_p * C                            # bf16 output block (dbl buf)
    f += 2 * (Cin * Cmid_p + 9 * Cmid_p * Cmid_p        # weights (dbl-buf worst case)
              + Cmid_p * Cout_p + Cin * Cout_p) * C
    f += 2 * (2 * Cmid_p + 2 * Cout_p) * F              # biases
    f += nb * (H + 2) * (W + 2) * Cmid_p * C            # halo-padded conv2 scratch
    f += mi * Cmid_p * (F + C)                          # h1 f32 + bf16 copy
    f += mo * Cmid_p * (F + 2 * C)                      # conv2 acc f32 + tap + h2 bf16
    f += mo * Cout_p * (3 * F + C)                      # h3/res/out f32 + out bf16
    return f


def _pick_batch_tile(N, H, W, Cin, Cmid_p, Cout_p, stride, budget):
    """Images folded into one grid step.

    Larger tiles feed the MXU M dimension and amortize the ~0.35us/step grid
    overhead; when N >= 2 the tile is capped so there are >= 2 parallel grid
    steps for megacore (v7x) sharding.  Non-divisor tiles are fine because the
    wrapper zero-pads N up to a multiple of the tile."""
    fits = [nb for nb in range(1, N + 1)
            if _footprint_bytes(nb, H, W, Cin, Cmid_p, Cout_p, stride) <= budget]
    if not fits:
        return 1                                        # smallest possible tile
    if N >= 2:
        cap = -(-N // 2)                                # ceil(N/2) -> >= 2 steps
        multi = [nb for nb in fits if nb <= cap]
        if multi:
            return max(multi)
    return max(fits)


# ------------------------------- kernel -------------------------------------
def _make_kernel(NB, H, W, Cout, Cmid_p, Cout_p, stride, channels):
    Ho, Wo = H // stride, W // stride
    Mo = NB * Ho * Wo              # rows fed to conv3 / residual / output

    def kernel(*refs):
        i = 0
        x_ref = refs[i]; i += 1                        # (NB*H*W, Cin) bf16
        if stride == 2:
            xres_ref = refs[i]; i += 1                 # (Mo, Cin) bf16
        w1, b1, w2, b2, w3, b3 = refs[i:i + 6]; i += 6
        if channels:
            wr, br = refs[i:i + 2]; i += 2
        out_ref = refs[i]; i += 1                      # (Mo, Cout_p) bf16
        pbuf = refs[i]                                 # (NB, H+2, W+2, Cmid_p)

        # ---- zero only the 1-pixel halo of the padded scratch ----------------
        # (kept per step rather than under pl.when(step==0): scratch is
        #  per-TensorCore under megacore partitioning, so step 0 may never run
        #  on the second core)
        zrow = jnp.zeros((NB, 1, W + 2, Cmid_p), COMPUTE_DT)
        zcol = jnp.zeros((NB, H + 2, 1, Cmid_p), COMPUTE_DT)
        pbuf[:, 0:1, :, :] = zrow
        pbuf[:, H + 1:H + 2, :, :] = zrow
        pbuf[:, :, 0:1, :] = zcol
        pbuf[:, :, W + 1:W + 2, :] = zcol

        xv = x_ref[...]                                # (NB*H*W, Cin) bf16

        # ---- conv1 (1x1) + folded BN1 + ReLU ---------------------------------
        h1 = jnp.dot(xv, w1[...], preferred_element_type=jnp.float32) + b1[...]
        h1 = jnp.maximum(h1, 0.0)
        pbuf[:, 1:H + 1, 1:W + 1, :] = (
            h1.reshape(NB, H, W, Cmid_p).astype(COMPUTE_DT))

        # ---- conv2 (3x3, pad=1) + folded BN2 + ReLU --------------------------
        # Nine accumulating K=Cmid_p matmuls on lane-dense taps; no (M, 9*Cmid)
        # im2col buffer is ever materialized.  conv3's stride is applied here
        # (strided tap reads) so only the kept output positions are computed.
        acc = jnp.zeros((Mo, Cmid_p), jnp.float32)
        for t in range(9):
            dy, dx = t // 3, t % 3
            if stride == 1:
                tap = pbuf[:, dy:dy + H, dx:dx + W, :]
            else:
                tap = pbuf[:, pl.ds(dy, Ho, 2), pl.ds(dx, Wo, 2), :]
            acc = acc + jnp.dot(tap.reshape(Mo, Cmid_p), w2[t],
                                preferred_element_type=jnp.float32)
        h2 = jnp.maximum(acc + b2[...], 0.0).astype(COMPUTE_DT)   # (Mo, Cmid_p)

        # ---- conv3 (1x1, stride already applied) + folded BN3 ----------------
        h3 = jnp.dot(h2, w3[...], preferred_element_type=jnp.float32) + b3[...]

        # ---- residual path + add + ReLU --------------------------------------
        xr = xres_ref[...] if stride == 2 else xv      # (Mo, Cin) bf16
        if channels:
            res = jnp.dot(xr, wr[...], preferred_element_type=jnp.float32) + br[...]
        else:
            res = xr.astype(jnp.float32)               # identity: Cin == Cout
            if Cout_p > Cout:                          # toy shapes only; real ResNet
                res = jnp.concatenate(                 # Cout is a multiple of 128
                    [res, jnp.zeros((Mo, Cout_p - Cout), jnp.float32)], axis=-1)

        out_ref[...] = jnp.maximum(h3 + res, 0.0).astype(out_ref.dtype)

    return kernel


# ------------------------------- wrappers ------------------------------------
def residual_block_forward_nhwc(x_nhwc, params, *, down=False, channels=False):
    """Fused ResidualBlock forward on NHWC input; returns NHWC bf16."""
    stride = 2 if down else 1
    N, H, W, Cin = x_nhwc.shape
    Cmid = params["w1"].shape[0]
    Cout = params["w3"].shape[0]
    Ho, Wo = H // stride, W // stride
    Cmid_p = -(-Cmid // LANE) * LANE               # lane-dense mid channels
    Cout_p = -(-Cout // LANE) * LANE               # lane-dense output channels

    if down:
        assert channels, "stride-2 identity shortcut is not part of the module"
        assert H % 2 == 0 and W % 2 == 0, (H, W)
    if not channels:
        assert Cin == Cout, (Cin, Cout)

    # ---- fold inference-mode BatchNorm into conv weights / biases ------------
    def fold(w_oihw, b, g, be, m, v):
        s = g * jax.lax.rsqrt(v + BN_EPS)                     # (O,)
        w = jnp.transpose(w_oihw, (2, 3, 1, 0)) * s           # (kh, kw, I, O)
        return w, (b - m) * s + be

    pad_mid, pad_out = Cmid_p - Cmid, Cout_p - Cout

    w1, b1 = fold(params["w1"], params["b1"], params["g1"], params["be1"],
                  params["m1"], params["v1"])
    w1 = jnp.pad(w1.reshape(Cin, Cmid), ((0, 0), (0, pad_mid)))
    b1 = jnp.pad(b1, (0, pad_mid)).reshape(1, Cmid_p)

    w2, b2 = fold(params["w2"], params["b2"], params["g2"], params["be2"],
                  params["m2"], params["v2"])
    w2 = jnp.pad(w2.reshape(9, Cmid, Cmid), ((0, 0), (0, pad_mid), (0, pad_mid)))
    b2 = jnp.pad(b2, (0, pad_mid)).reshape(1, Cmid_p)

    w3, b3 = fold(params["w3"], params["b3"], params["g3"], params["be3"],
                  params["m3"], params["v3"])
    w3 = jnp.pad(w3.reshape(Cmid, Cout), ((0, pad_mid), (0, pad_out)))
    b3 = jnp.pad(b3, (0, pad_out)).reshape(1, Cout_p)

    const_args = [w1.astype(COMPUTE_DT), b1.astype(jnp.float32),
                  w2.astype(COMPUTE_DT), b2.astype(jnp.float32),
                  w3.astype(COMPUTE_DT), b3.astype(jnp.float32)]
    if channels:
        wr = jnp.transpose(params["wr"], (2, 3, 1, 0)).reshape(Cin, Cout)
        wr = jnp.pad(wr, ((0, 0), (0, pad_out)))
        br = jnp.pad(params["br"], (0, pad_out)).reshape(1, Cout_p)
        const_args += [wr.astype(COMPUTE_DT), br.astype(jnp.float32)]

    # ---- generation-aware batch tile & zero-padded batch ---------------------
    vmem_cap = _vmem_capacity_bytes()
    NB = _pick_batch_tile(N, H, W, Cin, Cmid_p, Cout_p, stride, vmem_cap // 2)
    steps = -(-N // NB)
    Npad = steps * NB

    x = x_nhwc.astype(COMPUTE_DT)
    if Npad != N:
        x = jnp.pad(x, ((0, Npad - N), (0, 0), (0, 0), (0, 0)))

    # flattened (rows, channels) layout: no in-kernel reshapes of lane-sparse data
    data_args = [x.reshape(Npad * H * W, Cin)]
    if stride == 2:
        data_args.append(x[:, ::2, ::2, :].reshape(Npad * Ho * Wo, Cin))

    in_specs = [pl.BlockSpec((NB * H * W, Cin), lambda n: (n, 0))]
    if stride == 2:
        in_specs.append(pl.BlockSpec((NB * Ho * Wo, Cin), lambda n: (n, 0)))
    for a in const_args:
        in_specs.append(pl.BlockSpec(a.shape, lambda n, r=a.ndim: (0,) * r))

    out = pl.pallas_call(
        _make_kernel(NB, H, W, Cout, Cmid_p, Cout_p, stride, channels),
        out_shape=jax.ShapeDtypeStruct((Npad * Ho * Wo, Cout_p), COMPUTE_DT),
        grid=(steps,),
        in_specs=in_specs,
        out_specs=pl.BlockSpec((NB * Ho * Wo, Cout_p), lambda n: (n, 0)),
        scratch_shapes=[pltpu.VMEM((NB, H + 2, W + 2, Cmid_p), COMPUTE_DT)],
        compiler_params=pltpu.CompilerParams(
            dimension_semantics=("parallel",),
            vmem_limit_bytes=min((3 * vmem_cap) // 4, 112 * 2 ** 20)),
    )(*(data_args + const_args))

    out = out.reshape(Npad, Ho, Wo, Cout_p)
    if Npad != N or Cout_p != Cout:
        out = out[:N, :, :, :Cout]                 # drop batch / lane padding
    return out


def residual_block_forward(x_nchw, params, *, down=False, channels=False):
    """NCHW (PyTorch convention) wrapper; transposes only at the model boundary."""
    x = jnp.transpose(x_nchw, (0, 2, 3, 1))
    y = residual_block_forward_nhwc(x, params, down=down, channels=channels)
    return jnp.transpose(y, (0, 3, 1, 2)).astype(x_nchw.dtype)


# ---------------------------- pure-JAX reference ----------------------------
def ref_forward(x, p, *, down=False, channels=False):
    stride = 2 if down else 1

    def conv(x, w, b, s, pad):
        y = jax.lax.conv_general_dilated(
            x, w, window_strides=(s, s), padding=pad,
            dimension_numbers=("NCHW", "OIHW", "NCHW"))
        return y + b[None, :, None, None]

    def bn(x, g, b, m, v):
        s = (g / jnp.sqrt(v + BN_EPS))[None, :, None, None]
        return (x - m[None, :, None, None]) * s + b[None, :, None, None]

    h = jax.nn.relu(bn(conv(x, p["w1"], p["b1"], 1, "VALID"),
                       p["g1"], p["be1"], p["m1"], p["v1"]))
    h = jax.nn.relu(bn(conv(h, p["w2"], p["b2"], 1, ((1, 1), (1, 1))),
                       p["g2"], p["be2"], p["m2"], p["v2"]))
    h = bn(conv(h, p["w3"], p["b3"], stride, "VALID"),
           p["g3"], p["be3"], p["m3"], p["v3"])
    r = conv(x, p["wr"], p["br"], stride, "VALID") if channels else x
    return jax.nn.relu(h + r)


def init_params(key, Cin, Cmid, Cout, channels):
    ks = iter(jax.random.split(key, 24))

    def cw(o, i, kh, kw):
        return jax.random.normal(next(ks), (o, i, kh, kw), jnp.float32) * 0.1

    def vec(c, lo=None, hi=None):
        if lo is None:
            return jax.random.normal(next(ks), (c,), jnp.float32) * 0.1
        return jax.random.uniform(next(ks), (c,), jnp.float32, lo, hi)

    p = {
        "w1": cw(Cmid, Cin, 1, 1), "b1": vec(Cmid),
        "g1": vec(Cmid, 0.5, 1.5), "be1": vec(Cmid), "m1": vec(Cmid), "v1": vec(Cmid, 0.5, 1.5),
        "w2": cw(Cmid, Cmid, 3, 3), "b2": vec(Cmid),
        "g2": vec(Cmid, 0.5, 1.5), "be2": vec(Cmid), "m2": vec(Cmid), "v2": vec(Cmid, 0.5, 1.5),
        "w3": cw(Cout, Cmid, 1, 1), "b3": vec(Cout),
        "g3": vec(Cout, 0.5, 1.5), "be3": vec(Cout), "m3": vec(Cout), "v3": vec(Cout, 0.5, 1.5),
    }
    if channels:
        p["wr"] = cw(Cout, Cin, 1, 1)
        p["br"] = vec(Cout)
    return p


if __name__ == "__main__":
    key = jax.random.PRNGKey(0)

    configs = [
        # projection shortcut (channels=True), stride 1
        dict(N=2, Cin=4, H=16, W=16, Cmid=8, Cout=16, channels=True, down=False),
        # identity shortcut (channels=False) requires Cin == Cout
        dict(N=2, Cin=16, H=16, W=16, Cmid=8, Cout=16, channels=False, down=False),
        # non-divisor batch (exercises zero-padded batch tiling)
        dict(N=3, Cin=4, H=16, W=16, Cmid=8, Cout=16, channels=True, down=False),
    ]

    for i, cfg in enumerate(configs):
        kx, kp = jax.random.split(jax.random.fold_in(key, i))
        x = jax.random.normal(
            kx, (cfg["N"], cfg["Cin"], cfg["H"], cfg["W"]), jnp.float32)  # NCHW
        params = init_params(kp, cfg["Cin"], cfg["Cmid"], cfg["Cout"], cfg["channels"])

        y = residual_block_forward(x, params, down=cfg["down"], channels=cfg["channels"])
        y = jax.block_until_ready(y)

        y_ref = ref_forward(x, params, down=cfg["down"], channels=cfg["channels"])
        assert y.shape == y_ref.shape, (y.shape, y_ref.shape)
        max_err = float(jnp.max(jnp.abs(y - y_ref)))
        assert jnp.allclose(y, y_ref, atol=2e-2, rtol=2e-2), (i, max_err)

    print("KERNEL_OK")
</pallas_src>

<mosaic_0001>
module attributes {stable_mosaic.version = 11 : i64} {
  func.func @kernel(%arg0: i32, %arg1: memref<256x4xbf16, #tpu.memory_space<vmem>>, %arg2: memref<4x128xbf16, #tpu.memory_space<vmem>>, %arg3: memref<1x128xf32, #tpu.memory_space<vmem>>, %arg4: memref<9x128x128xbf16, #tpu.memory_space<vmem>>, %arg5: memref<1x128xf32, #tpu.memory_space<vmem>>, %arg6: memref<128x128xbf16, #tpu.memory_space<vmem>>, %arg7: memref<1x128xf32, #tpu.memory_space<vmem>>, %arg8: memref<4x128xbf16, #tpu.memory_space<vmem>>, %arg9: memref<1x128xf32, #tpu.memory_space<vmem>>, %arg10: memref<256x128xbf16, #tpu.memory_space<vmem>>, %arg11: memref<1x18x18x128xbf16, #tpu.memory_space<vmem>>) attributes {dimension_semantics = [#tpu.dimension_semantics<parallel>], iteration_bounds = array<i64: 2>, scalar_prefetch = 0 : i64, scratch_operands = 1 : i64, tpu.core_type = #tpu.core_type<tc>, window_params = [{transform_indices = @transform_0, window_bounds = array<i64: 256, 4>}, {pipeline_mode = #tpu.pipeline_mode<synchronous>, transform_indices = @transform_1, window_bounds = array<i64: 4, 128>}, {pipeline_mode = #tpu.pipeline_mode<synchronous>, transform_indices = @transform_2, window_bounds = array<i64: 1, 128>}, {pipeline_mode = #tpu.pipeline_mode<synchronous>, transform_indices = @transform_3, window_bounds = array<i64: 9, 128, 128>}, {pipeline_mode = #tpu.pipeline_mode<synchronous>, transform_indices = @transform_4, window_bounds = array<i64: 1, 128>}, {pipeline_mode = #tpu.pipeline_mode<synchronous>, transform_indices = @transform_5, window_bounds = array<i64: 128, 128>}, {pipeline_mode = #tpu.pipeline_mode<synchronous>, transform_indices = @transform_6, window_bounds = array<i64: 1, 128>}, {pipeline_mode = #tpu.pipeline_mode<synchronous>, transform_indices = @transform_7, window_bounds = array<i64: 4, 128>}, {pipeline_mode = #tpu.pipeline_mode<synchronous>, transform_indices = @transform_8, window_bounds = array<i64: 1, 128>}, {transform_indices = @transform_9, window_bounds = array<i64: 256, 128>}]} {
    %cst = arith.constant 0.000000e+00 : bf16
    %0 = vector.broadcast %cst : bf16 to vector<1x1x18x128xbf16>
    %cst_0 = arith.constant 0.000000e+00 : bf16
    %1 = vector.broadcast %cst_0 : bf16 to vector<1x18x1x128xbf16>
    %c0 = arith.constant 0 : index
    %c0_1 = arith.constant 0 : index
    %c0_2 = arith.constant 0 : index
    %c0_3 = arith.constant 0 : index
    %2 = vector.load %arg11[%c0, %c0_1, %c0_2, %c0_3] : memref<1x18x18x128xbf16, #tpu.memory_space<vmem>>, vector<1x1x18x128xbf16>
    tpu.vector_store %arg11[%c0, %c0_1, %c0_2, %c0_3], %0 {strides = array<i32>} : memref<1x18x18x128xbf16, #tpu.memory_space<vmem>>, vector<1x1x18x128xbf16>,
    %c0_4 = arith.constant 0 : index
    %c17 = arith.constant 17 : index
    %c0_5 = arith.constant 0 : index
    %c0_6 = arith.constant 0 : index
    %3 = vector.load %arg11[%c0_4, %c17, %c0_5, %c0_6] : memref<1x18x18x128xbf16, #tpu.memory_space<vmem>>, vector<1x1x18x128xbf16>
    tpu.vector_store %arg11[%c0_4, %c17, %c0_5, %c0_6], %0 {strides = array<i32>} : memref<1x18x18x128xbf16, #tpu.memory_space<vmem>>, vector<1x1x18x128xbf16>,
    %c0_7 = arith.constant 0 : index
    %c0_8 = arith.constant 0 : index
    %c0_9 = arith.constant 0 : index
    %c0_10 = arith.constant 0 : index
    %4 = vector.load %arg11[%c0_7, %c0_8, %c0_9, %c0_10] : memref<1x18x18x128xbf16, #tpu.memory_space<vmem>>, vector<1x18x1x128xbf16>
    tpu.vector_store %arg11[%c0_7, %c0_8, %c0_9, %c0_10], %1 {strides = array<i32>} : memref<1x18x18x128xbf16, #tpu.memory_space<vmem>>, vector<1x18x1x128xbf16>,
    %c0_11 = arith.constant 0 : index
    %c0_12 = arith.constant 0 : index
    %c17_13 = arith.constant 17 : index
    %c0_14 = arith.constant 0 : index
    %5 = vector.load %arg11[%c0_11, %c0_12, %c17_13, %c0_14] : memref<1x18x18x128xbf16, #tpu.memory_space<vmem>>, vector<1x18x1x128xbf16>
    tpu.vector_store %arg11[%c0_11, %c0_12, %c17_13, %c0_14], %1 {strides = array<i32>} : memref<1x18x18x128xbf16, #tpu.memory_space<vmem>>, vector<1x18x1x128xbf16>,
    %c0_15 = arith.constant 0 : index
    %c0_16 = arith.constant 0 : index
    %6 = vector.load %arg1[%c0_15, %c0_16] : memref<256x4xbf16, #tpu.memory_space<vmem>>, vector<256x4xbf16>
    %c0_17 = arith.constant 0 : index
    %c0_18 = arith.constant 0 : index
    %7 = vector.load %arg2[%c0_17, %c0_18] : memref<4x128xbf16, #tpu.memory_space<vmem>>, vector<4x128xbf16>
    %cst_19 = arith.constant dense<0.000000e+00> : vector<256x128xf32>
    %8 = tpu.matmul %6, %7, %cst_19 {dimension_numbers = #tpu.dot_dimension_numbers<[1], [0], [0], [1], [0, 0, 1, 1], [], []>} : vector<256x4xbf16>, vector<4x128xbf16>, vector<256x128xf32> -> vector<256x128xf32>
    %c0_20 = arith.constant 0 : index
    %c0_21 = arith.constant 0 : index
    %9 = vector.load %arg3[%c0_20, %c0_21] : memref<1x128xf32, #tpu.memory_space<vmem>>, vector<1x128xf32>
    %10 = vector.broadcast %9 : vector<1x128xf32> to vector<256x128xf32>
    %11 = arith.addf %8, %10 : vector<256x128xf32>
    %cst_22 = arith.constant 0.000000e+00 : f32
    %12 = vector.broadcast %cst_22 : f32 to vector<256x128xf32>
    %13 = arith.maximumf %11, %12 : vector<256x128xf32>
    %14 = vector.shape_cast %13 : vector<256x128xf32> to vector<1x16x16x128xf32>
    %15 = arith.truncf %14 : vector<1x16x16x128xf32> to vector<1x16x16x128xbf16>
    %c0_23 = arith.constant 0 : index
    %c1 = arith.constant 1 : index
    %c1_24 = arith.constant 1 : index
    %c0_25 = arith.constant 0 : index
    %16 = vector.load %arg11[%c0_23, %c1, %c1_24, %c0_25] : memref<1x18x18x128xbf16, #tpu.memory_space<vmem>>, vector<1x16x16x128xbf16>
    tpu.vector_store %arg11[%c0_23, %c1, %c1_24, %c0_25], %15 {strides = array<i32>} : memref<1x18x18x128xbf16, #tpu.memory_space<vmem>>, vector<1x16x16x128xbf16>,
    %cst_26 = arith.constant 0.000000e+00 : f32
    %17 = vector.broadcast %cst_26 : f32 to vector<256x128xf32>
    %c0_27 = arith.constant 0 : index
    %c0_28 = arith.constant 0 : index
    %c0_29 = arith.constant 0 : index
    %c0_30 = arith.constant 0 : index
    %18 = vector.load %arg11[%c0_27, %c0_28, %c0_29, %c0_30] : memref<1x18x18x128xbf16, #tpu.memory_space<vmem>>, vector<1x16x16x128xbf16>
    %19 = vector.shape_cast %18 : vector<1x16x16x128xbf16> to vector<256x128xbf16>
    %c0_31 = arith.constant 0 : index
    %c0_32 = arith.constant 0 : index
    %c0_33 = arith.constant 0 : index
    %20 = vector.load %arg4[%c0_31, %c0_32, %c0_33] : memref<9x128x128xbf16, #tpu.memory_space<vmem>>, vector<1x128x128xbf16>
    %21 = vector.shape_cast %20 : vector<1x128x128xbf16> to vector<128x128xbf16>
    %cst_34 = arith.constant dense<0.000000e+00> : vector<256x128xf32>
    %22 = tpu.matmul %19, %21, %cst_34 {dimension_numbers = #tpu.dot_dimension_numbers<[1], [0], [0], [1], [0, 0, 1, 1], [], []>} : vector<256x128xbf16>, vector<128x128xbf16>, vector<256x128xf32> -> vector<256x128xf32>
    %23 = arith.addf %17, %22 : vector<256x128xf32>
    %c0_35 = arith.constant 0 : index
    %c0_36 = arith.constant 0 : index
    %c1_37 = arith.constant 1 : index
    %c0_38 = arith.constant 0 : index
    %24 = vector.load %arg11[%c0_35, %c0_36, %c1_37, %c0_38] : memref<1x18x18x128xbf16, #tpu.memory_space<vmem>>, vector<1x16x16x128xbf16>
    %25 = vector.shape_cast %24 : vector<1x16x16x128xbf16> to vector<256x128xbf16>
    %c1_39 = arith.constant 1 : index
    %c0_40 = arith.constant 0 : index
    %c0_41 = arith.constant 0 : index
    %26 = vector.load %arg4[%c1_39, %c0_40, %c0_41] : memref<9x128x128xbf16, #tpu.memory_space<vmem>>, vector<1x128x128xbf16>
    %27 = vector.shape_cast %26 : vector<1x128x128xbf16> to vector<128x128xbf16>
    %cst_42 = arith.constant dense<0.000000e+00> : vector<256x128xf32>
    %28 = tpu.matmul %25, %27, %cst_42 {dimension_numbers = #tpu.dot_dimension_numbers<[1], [0], [0], [1], [0, 0, 1, 1], [], []>} : vector<256x128xbf16>, vector<128x128xbf16>, vector<256x128xf32> -> vector<256x128xf32>
    %29 = arith.addf %23, %28 : vector<256x128xf32>
    %c0_43 = arith.constant 0 : index
    %c0_44 = arith.constant 0 : index
    %c2 = arith.constant 2 : index
    %c0_45 = arith.constant 0 : index
    %30 = vector.load %arg11[%c0_43, %c0_44, %c2, %c0_45] : memref<1x18x18x128xbf16, #tpu.memory_space<vmem>>, vector<1x16x16x128xbf16>
    %31 = vector.shape_cast %30 : vector<1x16x16x128xbf16> to vector<256x128xbf16>
    %c2_46 = arith.constant 2 : index
    %c0_47 = arith.constant 0 : index
    %c0_48 = arith.constant 0 : index
    %32 = vector.load %arg4[%c2_46, %c0_47, %c0_48] : memref<9x128x128xbf16, #tpu.memory_space<vmem>>, vector<1x128x128xbf16>
    %33 = vector.shape_cast %32 : vector<1x128x128xbf16> to vector<128x128xbf16>
    %cst_49 = arith.constant dense<0.000000e+00> : vector<256x128xf32>
    %34 = tpu.matmul %31, %33, %cst_49 {dimension_numbers = #tpu.dot_dimension_numbers<[1], [0], [0], [1], [0, 0, 1, 1], [], []>} : vector<256x128xbf16>, vector<128x128xbf16>, vector<256x128xf32> -> vector<256x128xf32>
    %35 = arith.addf %29, %34 : vector<256x128xf32>
    %c0_50 = arith.constant 0 : index
    %c1_51 = arith.constant 1 : index
    %c0_52 = arith.constant 0 : index
    %c0_53 = arith.constant 0 : index
    %36 = vector.load %arg11[%c0_50, %c1_51, %c0_52, %c0_53] : memref<1x18x18x128xbf16, #tpu.memory_space<vmem>>, vector<1x16x16x128xbf16>
    %37 = vector.shape_cast %36 : vector<1x16x16x128xbf16> to vector<256x128xbf16>
    %c3 = arith.constant 3 : index
    %c0_54 = arith.constant 0 : index
    %c0_55 = arith.constant 0 : index
    %38 = vector.load %arg4[%c3, %c0_54, %c0_55] : memref<9x128x128xbf16, #tpu.memory_space<vmem>>, vector<1x128x128xbf16>
    %39 = vector.shape_cast %38 : vector<1x128x128xbf16> to vector<128x128xbf16>
    %cst_56 = arith.constant dense<0.000000e+00> : vector<256x128xf32>
    %40 = tpu.matmul %37, %39, %cst_56 {dimension_numbers = #tpu.dot_dimension_numbers<[1], [0], [0], [1], [0, 0, 1, 1], [], []>} : vector<256x128xbf16>, vector<128x128xbf16>, vector<256x128xf32> -> vector<256x128xf32>
    %41 = arith.addf %35, %40 : vector<256x128xf32>
    %c0_57 = arith.constant 0 : index
    %c1_58 = arith.constant 1 : index
    %c1_59 = arith.constant 1 : index
    %c0_60 = arith.constant 0 : index
    %42 = vector.load %arg11[%c0_57, %c1_58, %c1_59, %c0_60] : memref<1x18x18x128xbf16, #tpu.memory_space<vmem>>, vector<1x16x16x128xbf16>
    %43 = vector.shape_cast %42 : vector<1x16x16x128xbf16> to vector<256x128xbf16>
    %c4 = arith.constant 4 : index
    %c0_61 = arith.constant 0 : index
    %c0_62 = arith.constant 0 : index
    %44 = vector.load %arg4[%c4, %c0_61, %c0_62] : memref<9x128x128xbf16, #tpu.memory_space<vmem>>, vector<1x128x128xbf16>
    %45 = vector.shape_cast %44 : vector<1x128x128xbf16> to vector<128x128xbf16>
    %cst_63 = arith.constant dense<0.000000e+00> : vector<256x128xf32>
    %46 = tpu.matmul %43, %45, %cst_63 {dimension_numbers = #tpu.dot_dimension_numbers<[1], [0], [0], [1], [0, 0, 1, 1], [], []>} : vector<256x128xbf16>, vector<128x128xbf16>, vector<256x128xf32> -> vector<256x128xf32>
    %47 = arith.addf %41, %46 : vector<256x128xf32>
    %c0_64 = arith.constant 0 : index
    %c1_65 = arith.constant 1 : index
    %c2_66 = arith.constant 2 : index
    %c0_67 = arith.constant 0 : index
    %48 = vector.load %arg11[%c0_64, %c1_65, %c2_66, %c0_67] : memref<1x18x18x128xbf16, #tpu.memory_space<vmem>>, vector<1x16x16x128xbf16>
    %49 = vector.shape_cast %48 : vector<1x16x16x128xbf16> to vector<256x128xbf16>
    %c5 = arith.constant 5 : index
    %c0_68 = arith.constant 0 : index
    %c0_69 = arith.constant 0 : index
    %50 = vector.load %arg4[%c5, %c0_68, %c0_69] : memref<9x128x128xbf16, #tpu.memory_space<vmem>>, vector<1x128x128xbf16>
    %51 = vector.shape_cast %50 : vector<1x128x128xbf16> to vector<128x128xbf16>
    %cst_70 = arith.constant dense<0.000000e+00> : vector<256x128xf32>
    %52 = tpu.matmul %49, %51, %cst_70 {dimension_numbers = #tpu.dot_dimension_numbers<[1], [0], [0], [1], [0, 0, 1, 1], [], []>} : vector<256x128xbf16>, vector<128x128xbf16>, vector<256x128xf32> -> vector<256x128xf32>
    %53 = arith.addf %47, %52 : vector<256x128xf32>
    %c0_71 = arith.constant 0 : index
    %c2_72 = arith.constant 2 : index
    %c0_73 = arith.constant 0 : index
    %c0_74 = arith.constant 0 : index
    %54 = vector.load %arg11[%c0_71, %c2_72, %c0_73, %c0_74] : memref<1x18x18x128xbf16, #tpu.memory_space<vmem>>, vector<1x16x16x128xbf16>
    %55 = vector.shape_cast %54 : vector<1x16x16x128xbf16> to vector<256x128xbf16>
    %c6 = arith.constant 6 : index
    %c0_75 = arith.constant 0 : index
    %c0_76 = arith.constant 0 : index
    %56 = vector.load %arg4[%c6, %c0_75, %c0_76] : memref<9x128x128xbf16, #tpu.memory_space<vmem>>, vector<1x128x128xbf16>
    %57 = vector.shape_cast %56 : vector<1x128x128xbf16> to vector<128x128xbf16>
    %cst_77 = arith.constant dense<0.000000e+00> : vector<256x128xf32>
    %58 = tpu.matmul %55, %57, %cst_77 {dimension_numbers = #tpu.dot_dimension_numbers<[1], [0], [0], [1], [0, 0, 1, 1], [], []>} : vector<256x128xbf16>, vector<128x128xbf16>, vector<256x128xf32> -> vector<256x128xf32>
    %59 = arith.addf %53, %58 : vector<256x128xf32>
    %c0_78 = arith.constant 0 : index
    %c2_79 = arith.constant 2 : index
    %c1_80 = arith.constant 1 : index
    %c0_81 = arith.constant 0 : index
    %60 = vector.load %arg11[%c0_78, %c2_79, %c1_80, %c0_81] : memref<1x18x18x128xbf16, #tpu.memory_space<vmem>>, vector<1x16x16x128xbf16>
    %61 = vector.shape_cast %60 : vector<1x16x16x128xbf16> to vector<256x128xbf16>
    %c7 = arith.constant 7 : index
    %c0_82 = arith.constant 0 : index
    %c0_83 = arith.constant 0 : index
    %62 = vector.load %arg4[%c7, %c0_82, %c0_83] : memref<9x128x128xbf16, #tpu.memory_space<vmem>>, vector<1x128x128xbf16>
    %63 = vector.shape_cast %62 : vector<1x128x128xbf16> to vector<128x128xbf16>
    %cst_84 = arith.constant dense<0.000000e+00> : vector<256x128xf32>
    %64 = tpu.matmul %61, %63, %cst_84 {dimension_numbers = #tpu.dot_dimension_numbers<[1], [0], [0], [1], [0, 0, 1, 1], [], []>} : vector<256x128xbf16>, vector<128x128xbf16>, vector<256x128xf32> -> vector<256x128xf32>
    %65 = arith.addf %59, %64 : vector<256x128xf32>
    %c0_85 = arith.constant 0 : index
    %c2_86 = arith.constant 2 : index
    %c2_87 = arith.constant 2 : index
    %c0_88 = arith.constant 0 : index
    %66 = vector.load %arg11[%c0_85, %c2_86, %c2_87, %c0_88] : memref<1x18x18x128xbf16, #tpu.memory_space<vmem>>, vector<1x16x16x128xbf16>
    %67 = vector.shape_cast %66 : vector<1x16x16x128xbf16> to vector<256x128xbf16>
    %c8 = arith.constant 8 : index
    %c0_89 = arith.constant 0 : index
    %c0_90 = arith.constant 0 : index
    %68 = vector.load %arg4[%c8, %c0_89, %c0_90] : memref<9x128x128xbf16, #tpu.memory_space<vmem>>, vector<1x128x128xbf16>
    %69 = vector.shape_cast %68 : vector<1x128x128xbf16> to vector<128x128xbf16>
    %cst_91 = arith.constant dense<0.000000e+00> : vector<256x128xf32>
    %70 = tpu.matmul %67, %69, %cst_91 {dimension_numbers = #tpu.dot_dimension_numbers<[1], [0], [0], [1], [0, 0, 1, 1], [], []>} : vector<256x128xbf16>, vector<128x128xbf16>, vector<256x128xf32> -> vector<256x128xf32>
    %71 = arith.addf %65, %70 : vector<256x128xf32>
    %c0_92 = arith.constant 0 : index
    %c0_93 = arith.constant 0 : index
    %72 = vector.load %arg5[%c0_92, %c0_93] : memref<1x128xf32, #tpu.memory_space<vmem>>, vector<1x128xf32>
    %73 = vector.broadcast %72 : vector<1x128xf32> to vector<256x128xf32>
    %74 = arith.addf %71, %73 : vector<256x128xf32>
    %cst_94 = arith.constant 0.000000e+00 : f32
    %75 = vector.broadcast %cst_94 : f32 to vector<256x128xf32>
    %76 = arith.maximumf %74, %75 : vector<256x128xf32>
    %77 = arith.truncf %76 : vector<256x128xf32> to vector<256x128xbf16>
    %c0_95 = arith.constant 0 : index
    %c0_96 = arith.constant 0 : index
    %78 = vector.load %arg6[%c0_95, %c0_96] : memref<128x128xbf16, #tpu.memory_space<vmem>>, vector<128x128xbf16>
    %cst_97 = arith.constant dense<0.000000e+00> : vector<256x128xf32>
    %79 = tpu.matmul %77, %78, %cst_97 {dimension_numbers = #tpu.dot_dimension_numbers<[1], [0], [0], [1], [0, 0, 1, 1], [], []>} : vector<256x128xbf16>, vector<128x128xbf16>, vector<256x128xf32> -> vector<256x128xf32>
    %c0_98 = arith.constant 0 : index
    %c0_99 = arith.constant 0 : index
    %80 = vector.load %arg7[%c0_98, %c0_99] : memref<1x128xf32, #tpu.memory_space<vmem>>, vector<1x128xf32>
    %81 = vector.broadcast %80 : vector<1x128xf32> to vector<256x128xf32>
    %82 = arith.addf %79, %81 : vector<256x128xf32>
    %c0_100 = arith.constant 0 : index
    %c0_101 = arith.constant 0 : index
    %83 = vector.load %arg8[%c0_100, %c0_101] : memref<4x128xbf16, #tpu.memory_space<vmem>>, vector<4x128xbf16>
    %cst_102 = arith.constant dense<0.000000e+00> : vector<256x128xf32>
    %84 = tpu.matmul %6, %83, %cst_102 {dimension_numbers = #tpu.dot_dimension_numbers<[1], [0], [0], [1], [0, 0, 1, 1], [], []>} : vector<256x4xbf16>, vector<4x128xbf16>, vector<256x128xf32> -> vector<256x128xf32>
    %c0_103 = arith.constant 0 : index
    %c0_104 = arith.constant 0 : index
    %85 = vector.load %arg9[%c0_103, %c0_104] : memref<1x128xf32, #tpu.memory_space<vmem>>, vector<1x128xf32>
    %86 = vector.broadcast %85 : vector<1x128xf32> to vector<256x128xf32>
    %87 = arith.addf %84, %86 : vector<256x128xf32>
    %88 = arith.addf %82, %87 : vector<256x128xf32>
    %cst_105 = arith.constant 0.000000e+00 : f32
    %89 = vector.broadcast %cst_105 : f32 to vector<256x128xf32>
    %90 = arith.maximumf %88, %89 : vector<256x128xf32>
    %91 = arith.truncf %90 : vector<256x128xf32> to vector<256x128xbf16>
    %c0_106 = arith.constant 0 : index
    %c0_107 = arith.constant 0 : index
    %92 = vector.load %arg10[%c0_106, %c0_107] : memref<256x128xbf16, #tpu.memory_space<vmem>>, vector<256x128xbf16>
    tpu.vector_store %arg10[%c0_106, %c0_107], %91 {strides = array<i32>} : memref<256x128xbf16, #tpu.memory_space<vmem>>, vector<256x128xbf16>,
    return
  }
  func.func @transform_0(%arg0: i32) -> (i32, i32) {
    %c0_i32 = arith.constant 0 : i32
    %c0_i32_0 = arith.constant 0 : i32
    return %arg0, %c0_i32 : i32, i32
  }
  func.func @transform_1(%arg0: i32) -> (i32, i32) {
    %c0_i32 = arith.constant 0 : i32
    %c0_i32_0 = arith.constant 0 : i32
    %c0_i32_1 = arith.constant 0 : i32
    return %c0_i32, %c0_i32_0 : i32, i32
  }
  func.func @transform_2(%arg0: i32) -> (i32, i32) {
    %c0_i32 = arith.constant 0 : i32
    %c0_i32_0 = arith.constant 0 : i32
    %c0_i32_1 = arith.constant 0 : i32
    return %c0_i32, %c0_i32_0 : i32, i32
  }
  func.func @transform_3(%arg0: i32) -> (i32, i32, i32) {
    %c0_i32 = arith.constant 0 : i32
    %c0_i32_0 = arith.constant 0 : i32
    %c0_i32_1 = arith.constant 0 : i32
    %c0_i32_2 = arith.constant 0 : i32
    return %c0_i32, %c0_i32_0, %c0_i32_1 : i32, i32, i32
  }
  func.func @transform_4(%arg0: i32) -> (i32, i32) {
    %c0_i32 = arith.constant 0 : i32
    %c0_i32_0 = arith.constant 0 : i32
    %c0_i32_1 = arith.constant 0 : i32
    return %c0_i32, %c0_i32_0 : i32, i32
  }
  func.func @transform_5(%arg0: i32) -> (i32, i32) {
    %c0_i32 = arith.constant 0 : i32
    %c0_i32_0 = arith.constant 0 : i32
    %c0_i32_1 = arith.constant 0 : i32
    return %c0_i32, %c0_i32_0 : i32, i32
  }
  func.func @transform_6(%arg0: i32) -> (i32, i32) {
    %c0_i32 = arith.constant 0 : i32
    %c0_i32_0 = arith.constant 0 : i32
    %c0_i32_1 = arith.constant 0 : i32
    return %c0_i32, %c0_i32_0 : i32, i32
  }
  func.func @transform_7(%arg0: i32) -> (i32, i32) {
    %c0_i32 = arith.constant 0 : i32
    %c0_i32_0 = arith.constant 0 : i32
    %c0_i32_1 = arith.constant 0 : i32
    return %c0_i32, %c0_i32_0 : i32, i32
  }
  func.func @transform_8(%arg0: i32) -> (i32, i32) {
    %c0_i32 = arith.constant 0 : i32
    %c0_i32_0 = arith.constant 0 : i32
    %c0_i32_1 = arith.constant 0 : i32
    return %c0_i32, %c0_i32_0 : i32, i32
  }
  func.func @transform_9(%arg0: i32) -> (i32, i32) {
    %c0_i32 = arith.constant 0 : i32
    %c0_i32_0 = arith.constant 0 : i32
    return %arg0, %c0_i32 : i32, i32
  }
}

</mosaic_0001>

<bundles_post_ra>
// kernel: tpu_custom_call.1
= control target key start
LH: loop header
LB: loop body
LE: loop exit
PB: predicated region body
PF: predicated region fallthrough
CT: control target
= control target key end

     0   :  { %14 = vsyncpa [#allocation4], 0  ;;  %s10928_s0 = inlined_call_operand.vmem [shape: bf16[512,4], index: 0, kind: input, shape index: {}]   ;;  %s10929_s1 = inlined_call_operand.vmem [shape: bf16[4,128], index: 1, kind: input, shape index: {}]   ;;  %s10930_s2 = inlined_call_operand.vmem [shape: f32[1,128], index: 2, kind: input, shape index: {}]   ;;  %s10931_s3 = inlined_call_operand.hbm [shape: bf16[9,128,128], index: 3, kind: input, shape index: {}]   ;;  %s10932_s4 = inlined_call_operand.vmem [shape: f32[1,128], index: 4, kind: input, shape index: {}]   ;;  %s10933_s5 = inlined_call_operand.vmem [shape: bf16[128,128], index: 5, kind: input, shape index: {}]   ;;  %s10934_s6 = inlined_call_operand.vmem [shape: f32[1,128], index: 6, kind: input, shape index: {}]   ;;  %s10935_s7 = inlined_call_operand.vmem [shape: bf16[4,128], index: 7, kind: input, shape index: {}]   ;;  %s10936_s8 = inlined_call_operand.vmem [shape: f32[1,128], index: 8, kind: input, shape index: {}]   ;;  %s10937_s9 = inlined_call_operand.hbm [shape: bf16[512,128], index: 9, kind: output, shape index: {}]  }
   0x1   :  { %15 = vsyncpa [#allocation5], 0 }
   0x2   :  { %17 = vsyncpa [#allocation5 + $0x1], 0  ;;  %s9131_s30 = smov 0   ;;  %s9133_s10 = smov 0  }
   0x3   :  { %s9135_s11 = smov 0   ;;  %s9137_s12 = smov 0  }
   0x4 LB: > { %s9152_s13 = sadd.s32 4294967295, %s9072_s12   ;;  %s6980_s14 = sadd.s32 4294967294, %s9072_s12   ;;  %s9072_s12 = sphi %s9137_s12, %s11056_s12   ;;  %s9068_s11 = sphi %s9135_s11, %s11055_s11   ;;  %s9064_s10 = sphi %s9133_s10, %s11054_s10   ;;  %s9060_s30 = sphi %s9131_s30, %s11053_s30  }
   0x5   : > { %s9156_s15 = sadd.s32 1, %s9072_s12   ;;  %s224_s16 = sadd.s32 1, %s9068_s11 }
   0x6   : > { %s221_s17 = ssub.s32 %s9072_s12, %s9156_s15  ;;  %p234_p0 = scmp.ne.s32.totalorder %s9068_s11, %s9064_s10 }
   0x7   : > { %p222_p1 = scmp.eq.s32.totalorder %s221_s17, 0  ;;  %p235_p2 = scmp.eq.s32.totalorder %s9152_s13, 1 }
   0x8   : > { %p240_p3 = scmp.ne.s32.totalorder %s9064_s10, %s9060_s30  ;;  %p241_p4 = scmp.eq.s32.totalorder %s6980_s14, 1 }
   0x9   : > { %s9167_s18 = scalar_select %p222_p1, %s9068_s11, %s224_s16  }
   0xa   : > { %p9169_p5 = por %p235_p2, %p234_p0  ;;  %p9173_p6 = por %p241_p4, %p240_p3 }
   0xb   : > { %p6981_p7 = scmp.ge.s32.totalorder %s9072_s12, 1  ;;  %p248_p8 = scmp.lt.s32.totalorder %s9072_s12, 3 }
   0xc   : > { %s10963_s19 = scalar_select %p9169_p5, 1, 0 }
   0xd   : > { %s10964_s20 = scalar_select %p9173_p6, 1, 0 }
   0xe   : > { %p10938_p9 = scmp.eq.s32.totalorder %s9152_s13, 0  ;;  %p9180_p10 = pnand %p6981_p7, %p248_p8 }
   0xf   : > { %s9074_s22 = smov [#allocation3]   ;;  %s8978_s27 = scalar_lea.hbm %s10931_s3, 9216 }
  0x10   : > { %s10965_s21 = scalar_select %p9180_p10, 1, 0 }
  0x11   : > { %s266_s23 = sshll.u32 %s9074_s22, 4  ;;  %p8724_p11 = pneg %p9180_p10  ;;  %s267_s23 = int_to_ptr.vmem [resolvable:$true] %s266_s23 }
  0x12   : > { %p8979_p13 = scmp.ne.s32.totalorder %s10931_s3, %s8978_s27  ;;  %p8985_p3 = scmp.lt.u32.totalorder %s8978_s27, %s10931_s3 }
  0x13   : > { %p9188_p12 = pnand %p10938_p9, %p8724_p11 }
  0x15   : > { %p8980_p0 = pneg %p9188_p12 }
  0x17   : > { %p8981_p1 = pnand %p8980_p0, %p8979_p13 }
  0x19   : > { %p8982_p2 = pneg %p8981_p1 }
  0x1b   : > { %p8987_p4 = pnand %p8985_p3, %p8982_p2 }
  0x1d   : > { %8990 = shalt.err (!%p8987_p4)
}
  0x1e   : > { %s8991_s17 = scalar_lea.vmem %s267_s23, 9216  ;;  %p8999_p9 = scmp.lt.s32.totalorder %s267_s23, %s267_s23 }
  0x1f   : > { %p8992_p7 = scmp.ne.s32.totalorder %s267_s23, %s8991_s17  ;;  %p9000_p6 = scmp.lt.s32.totalorder %s8991_s17, %s8991_s17 }
  0x21   : > { %p8994_p8 = pnand %p8992_p7, %p8980_p0  ;;  %p9001_p5 = por %p9000_p6, %p8999_p9 }
  0x23   : > { %p8995_p11 = pneg %p8994_p8 }
  0x25   : > { %p9002_p10 = pnand %p9001_p5, %p8995_p11 }
  0x27   : > { %9005 = shalt.err (!%p9002_p10)
}
  0x28   : > { %s9075_s22 = smov 64   ;;  %s9076_s25 = smov 4  }
  0x29   : > { %8727 = dma.hbm_to_vmem [thread:$0]  (!%p9188_p12), %s10931_s3, 9216, %s267_s23, [#allocation4], %s9075_s22, %s9075_s22, %s9076_s25  }
  0x2a   : > { %p10967_p13 = scmp.ne.s32.totalorder %s10965_s21, 0 }
  0x2c   : > { %306 = sbr.rel (%p10967_p13) target bundleno = 1277 (0x4fd), region = 56 }
  0x33   : > { %p10968_p1 = scmp.eq.s32.totalorder %s9152_s13, 0 }
  0x35   : > { %9051 = dma.done.wait (%p10968_p1), [#allocation4], 9216   ;;  %p10969_p0 = pmov %p10968_p1 }
  0x36   : > { %s6987_s27 = sshll.u32 %s9152_s13, 5  ;;  %vm639_vm0 = vcmask 1041408   ;;  %vm590_vm1 = vcmask 31744   ;;  %v502_v0 = vld [vmem:[%s10929_s1] sm:$0x3]  ;;  %vm357_vm2 = vcmask 1040384  }
  0x37   : > { %9053 = vsyncadd (%p10969_p0), [#allocation4], 4294958080  ;;  %p343_p5 = scmp.lt.s32.totalorder %s6987_s27, 63  ;;  %8716 = vmatprep.subr.msk.bf16.mxu0 %vm639_vm0, %v502_v0  ;;  %v641_v1 = vsel %vm639_vm0, %v502_v0, 0  ;;  %vm358_vm3 = vsmask.f32 256 }
  0x38   : > { %7817 = vmatpush3.bf16.msra.mxu0 %v641_v1  ;;  %vm9237_vm4 = vmand %vm357_vm2, %vm358_vm3  ;;  %v10970_v7 = vmov 0  ;;  %v8789_v10 = vld [vmem:[#allocation3 + $0xc0] sm:$0xff]   ;;  %v8790_v11 = vld [vmem:[#allocation3 + $0xc8] sm:$0xff]   ;;  %vm414_vm5 = vsmask.f32 7938  ;;  %v10973_v25 = vmov 0 }
  0x39   : > { %s11058_s27 = smov (!%p343_p5, %s6987_s27), 63  ;;  %v10971_v7 = vsel %vm9237_vm4, 4294967295, %v10970_v7  ;;  %v366_v12 = vld [vmem:[#allocation2 + $0x18] sm:$0x1]  ;;  %7994 = vmatprep.subr.bf16.mxu1 %v8789_v10  ;;  %v8791_v23 = vld [vmem:[#allocation3 + $0xd0] sm:$0xff]   ;;  %vm9267_vm6 = vmand %vm357_vm2, %vm414_vm5  ;;  %v9077_v42 = vmov 0  }
  0x3a   : > { %s6988_s29 = sshll.u32 %s11058_s27, 2  ;;  %10972 = vst [vmem:[#allocation9_spill] sm:$0xff] %v10971_v7  ;;  %v367_v13 = vsel %vm9237_vm4, 0, %v366_v12  ;;  %7995 = vmatpush3.bf16.msra.mxu1 %v8789_v10  ;;  %v8792_v24 = vld [vmem:[#allocation3 + $0x40] sm:$0xff]   ;;  %v10974_v25 = vsel %vm9267_vm6, 4294967295, %v10973_v25  ;;  %v8793_v29 = vld [vmem:[#allocation3 + $0xd8] sm:$0xff]  }
  0x3b   : > { %s9218_s16 = scalar_lea.vmem %s10928_s0, %s6988_s29  ;;  %368 = vst [vmem:[#allocation2 + $0x18] sm:$0x1] %v367_v13  ;;  %7996 = vmatprep.subr.bf16.mxu1 %v8790_v11  ;;  %10975 = vst [vmem:[#allocation10_spill] sm:$0xff] %v10974_v25  ;;  %v363_v26 = vld [vmem:[#allocation2 + $0xc] sm:$0x1]  ;;  %7850 = vmatprep.subr.bf16.mxu0 %v8792_v24  ;;  %v8794_v32 = vld [vmem:[#allocation3 + $0x48] sm:$0xff]  }
  0x3c   : > { %v8773_v2 = vld [vmem:[%s9218_s16] sm:$0xff]   ;;  %v8774_v3 = vld [vmem:[%s9218_s16 + $0x8] sm:$0xff]   ;;  %v8775_v4 = vld [vmem:[%s9218_s16 + $0x10] sm:$0xff]   ;;  %v364_v27 = vsel %vm9237_vm4, 0, %v363_v26  ;;  %350 = vst [vmem:[#allocation2] sm:$0xf] %v9077_v42 }
  0x3d   : > { %7818 = vmatprep.mubr.msk.bf16.mxu0 %vm590_vm1, %v8773_v2  ;;  %v8776_v5 = vld [vmem:[%s9218_s16 + $0x18] sm:$0xff]   ;;  %v8777_v6 = vld [vmem:[%s9218_s16 + $0x20] sm:$0xff]   ;;  %v8778_v8 = vld [vmem:[%s9218_s16 + $0x28] sm:$0xff]   ;;  %365 = vst [vmem:[#allocation2 + $0xc] sm:$0x1] %v364_v27  ;;  %vm1255_vm10 = vcmask 1043456  }
  0x3e   : > { %7819 = vmatmul.mubr.msk.bf16.vlgmr.msra.gmra.mrb[0].mxu0 %vm590_vm1, %v8774_v3  ;;  %v8779_v9 = vld [vmem:[%s9218_s16 + $0x30] sm:$0xff]   ;;  %v8780_v14 = vld [vmem:[%s9218_s16 + $0x38] sm:$0xff]   ;;  %v8781_v15 = vld [vmem:[%s9218_s16 + $0x40] sm:$0xff]   ;;  %7997 = vmatpush3.bf16.msra.mxu1 %v8790_v11  ;;  %351 = vst [vmem:[#allocation2 + $0x4] sm:$0xf] %v9077_v42  ;;  %vm2463_vm14 = vcmask 1042432  }
  0x3f   : > { %7822 = vmatprep.mubr.msk.bf16.mxu0 %vm590_vm1, %v8775_v4  ;;  %v8782_v16 = vld [vmem:[%s9218_s16 + $0x48] sm:$0xff]   ;;  %v8783_v17 = vld [vmem:[%s9218_s16 + $0x50] sm:$0xff]   ;;  %v8784_v18 = vld [vmem:[%s9218_s16 + $0x58] sm:$0xff]   ;;  %7998 = vmatprep.subr.bf16.mxu1 %v8791_v23  ;;  %352 = vst [vmem:[#allocation2 + $0x8] sm:$0x1] %v9077_v42  ;;  %vm2464_vm15 = vcmask 1046532  }
  0x40   : > { %v8785_v19 = vld [vmem:[%s9218_s16 + $0x60] sm:$0xff]   ;;  %v8786_v20 = vld [vmem:[%s9218_s16 + $0x68] sm:$0xff]   ;;  %v8787_v21 = vld [vmem:[%s9218_s16 + $0x70] sm:$0xff]   ;;  %7851 = vmatpush3.bf16.msra.mxu0 %v8792_v24  ;;  %354 = vst [vmem:[#allocation2 + $0xcc] sm:$0xf] %v9077_v42  ;;  %s339_s29 = sand.u32 1, %s9064_s10  }
  0x41   : > { %v8788_v22 = vld [vmem:[%s9218_s16 + $0x78] sm:$0xff]   ;;  %v422_v28 = vld [vmem:[#allocation2 + $0x20] sm:$0x1]  ;;  %v419_v31 = vld [vmem:[#allocation2 + $0x14] sm:$0x1]  ;;  %7852 = vmatprep.subr.bf16.mxu0 %v8794_v32  ;;  %s7446_s14 = sshll.u32 %s9152_s13, 11 }
  0x42   : > { %7999 = vmatpush3.bf16.msra.mxu1 %v8791_v23  ;;  %v423_v30 = vsel %vm9267_vm6, 0, %v422_v28  ;;  %v420_v33 = vsel %vm9267_vm6, 0, %v419_v31  ;;  %v372_v34 = vld [vmem:[#allocation2 + $0x30] sm:$0x1]  ;;  %v369_v36 = vld [vmem:[#allocation2 + $0x24] sm:$0x1]  ;;  %vm9362_vm12 = vmand %vm1255_vm10, %vm414_vm5  ;;  %s10879_s22 = scalar_lea.hbm %s10937_s9, %s7446_s14 }
  0x43   : > { %424 = vst [vmem:[#allocation2 + $0x20] sm:$0x1] %v423_v30  ;;  %8000 = vmatprep.subr.bf16.mxu1 %v8793_v29  ;;  %421 = vst [vmem:[#allocation2 + $0x14] sm:$0x1] %v420_v33  ;;  %v373_v35 = vsel %vm9237_vm4, 0, %v372_v34  ;;  %v370_v37 = vsel %vm9237_vm4, 0, %v369_v36 }
  0x44   : > { %7853 = vmatpush3.bf16.msra.mxu0 %v8794_v32  ;;  %374 = vst [vmem:[#allocation2 + $0x30] sm:$0x1] %v373_v35  ;;  %371 = vst [vmem:[#allocation2 + $0x24] sm:$0x1] %v370_v37  ;;  %v428_v38 = vld [vmem:[#allocation2 + $0x38] sm:$0x1] }
  0x45   : > { %v429_v39 = vsel %vm9267_vm6, 0, %v428_v38  ;;  %v8795_v40 = vld [vmem:[#allocation3 + $0xe0] sm:$0xff]   ;;  %v8796_v41 = vld [vmem:[#allocation3 + $0x50] sm:$0xff]   ;;  %355 = vst [vmem:[#allocation2 + $0xd0] sm:$0xf] %v9077_v42  ;;  %v8797_v43 = vld [vmem:[#allocation3 + $0xe8] sm:$0xff]  }
  0x46   : > { %7823 = vmatmul.mubr.msk.bf16.gmra.mrb[4].mxu0 %vm590_vm1, %v8776_v5  ;;  %8001 = vmatpush3.bf16.msra.mxu1 %v8793_v29  ;;  %430 = vst [vmem:[#allocation2 + $0x38] sm:$0x1] %v429_v39  ;;  %356 = vst [vmem:[#allocation2 + $0xd4] sm:$0x1] %v9077_v42  ;;  %v425_v44 = vld [vmem:[#allocation2 + $0x2c] sm:$0x1] }
  0x47   : > { %7826 = vmatprep.mubr.msk.bf16.mxu0 %vm590_vm1, %v8777_v6  ;;  %8002 = vmatprep.subr.bf16.mxu1 %v8795_v40  ;;  %v8798_v45 = vld [vmem:[#allocation3 + $0x58] sm:$0xff]   ;;  %v426_v46 = vsel %vm9267_vm6, 0, %v425_v44  ;;  %v8799_v47 = vld [vmem:[#allocation3 + $0xf0] sm:$0xff]   ;;  %v8800_v49 = vld [vmem:[#allocation3 + $0x60] sm:$0xff]   ;;  %vm1433_vm7 = vsmask.f32 3328 }
  0x48   : > { %7854 = vmatprep.subr.bf16.mxu0 %v8796_v41  ;;  %427 = vst [vmem:[#allocation2 + $0x2c] sm:$0x1] %v426_v46  ;;  %v378_v48 = vld [vmem:[#allocation2 + $0x48] sm:$0x1]  ;;  %v360_v50 = vld [vmem:[#allocation2] sm:$0x1]  ;;  %vm9907_vm2 = vmor %vm2463_vm14, %vm2464_vm15 }
  0x49   : > { %7855 = vmatpush3.bf16.msra.mxu0 %v8796_v41  ;;  %v379_v51 = vsel %vm9237_vm4, 0, %v378_v48  ;;  %v375_v52 = vld [vmem:[#allocation2 + $0x3c] sm:$0x1]  ;;  %v361_v53 = vsel %vm9237_vm4, 0, %v360_v50  ;;  %v434_v55 = vld [vmem:[#allocation2 + $0x50] sm:$0x1] }
  0x4a   : > { %8003 = vmatpush3.bf16.msra.mxu1 %v8795_v40  ;;  %7856 = vmatprep.subr.bf16.mxu0 %v8798_v45  ;;  %380 = vst [vmem:[#allocation2 + $0x48] sm:$0x1] %v379_v51  ;;  %v376_v54 = vsel %vm9237_vm4, 0, %v375_v52  ;;  %362 = vst [vmem:[#allocation2] sm:$0x1] %v361_v53  ;;  %v435_v56 = vsel %vm9267_vm6, 0, %v434_v55 }
  0x4b   : > { %8004 = vmatprep.subr.bf16.mxu1 %v8797_v43  ;;  %377 = vst [vmem:[#allocation2 + $0x3c] sm:$0x1] %v376_v54  ;;  %v8801_v57 = vld [vmem:[#allocation3 + $0xf8] sm:$0xff]   ;;  %436 = vst [vmem:[#allocation2 + $0x50] sm:$0x1] %v435_v56  ;;  %v8802_v59 = vld [vmem:[#allocation3 + $0x68] sm:$0xff]  }
  0x4c   : > { %v431_v58 = vld [vmem:[#allocation2 + $0x44] sm:$0x1]  ;;  %v416_v61 = vld [vmem:[#allocation2 + $0x8] sm:$0x1]  ;;  %v384_v0 = vld [vmem:[#allocation2 + $0x60] sm:$0x1] }
  0x4d   : > { %7857 = vmatpush3.bf16.msra.mxu0 %v8798_v45  ;;  %v432_v60 = vsel %vm9267_vm6, 0, %v431_v58  ;;  %v417_v62 = vsel %vm9267_vm6, 0, %v416_v61  ;;  %v8805_v63 = vld [vmem:[#allocation3 + $0x70] sm:$0xff]   ;;  %v385_v2 = vsel %vm9237_vm4, 0, %v384_v0  ;;  %v381_v3 = vld [vmem:[#allocation2 + $0x54] sm:$0x1] }
  0x4e   : > { %7827 = vmatmul.mubr.msk.bf16.gmra.mrb[8].mxu0 %vm590_vm1, %v8778_v8  ;;  %8005 = vmatpush3.bf16.msra.mxu1 %v8797_v43  ;;  %433 = vst [vmem:[#allocation2 + $0x44] sm:$0x1] %v432_v60  ;;  %418 = vst [vmem:[#allocation2 + $0x8] sm:$0x1] %v417_v62  ;;  %v382_v5 = vsel %vm9237_vm4, 0, %v381_v3  ;;  %v8807_v12 = vld [vmem:[#allocation3 + $0x78] sm:$0xff]  }
  0x4f   : > { %7830 = vmatprep.mubr.msk.bf16.mxu0 %vm590_vm1, %v8779_v9  ;;  %8006 = vmatprep.subr.bf16.mxu1 %v8799_v47  ;;  %386 = vst [vmem:[#allocation2 + $0x60] sm:$0x1] %v385_v2  ;;  %v440_v6 = vld [vmem:[#allocation2 + $0x68] sm:$0x1]  ;;  %v1370_v8 = vld [vmem:[#allocation2 + $0x4] sm:$0xf] }
  0x50   : > { %7858 = vmatprep.subr.bf16.mxu0 %v8800_v49  ;;  %383 = vst [vmem:[#allocation2 + $0x54] sm:$0x1] %v382_v5  ;;  %v441_v10 = vsel %vm9267_vm6, 0, %v440_v6  ;;  %v437_v11 = vld [vmem:[#allocation2 + $0x5c] sm:$0x1]  ;;  %s10887_s13 = scalar_lea.sflag [#allocation5], %s339_s29 }
  0x51   : > { %7859 = vmatpush3.bf16.msra.mxu0 %v8800_v49  ;;  %v1369_v1 = vld [vmem:[#allocation2] sm:$0xf]  ;;  %442 = vst [vmem:[#allocation2 + $0x68] sm:$0x1] %v441_v10  ;;  %v438_v13 = vsel %vm9267_vm6, 0, %v437_v11  ;;  %v9317_v36 = vld [vmem:[#allocation3 + $0x100] sm:$0xff]  }
  0x52   : > { %8007 = vmatpush3.bf16.msra.mxu1 %v8799_v47  ;;  %7860 = vmatprep.subr.bf16.mxu0 %v8802_v59  ;;  %v1437_v4 = vshrl.u32 %v1369_v1, 16  ;;  %v1440_v9 = vshll.u32 %v1369_v1, 16  ;;  %439 = vst [vmem:[#allocation2 + $0x5c] sm:$0x1] %v438_v13  ;;  %vm1434_vm8 = vsmask.f32 7440 }
  0x53   : > { %8008 = vmatprep.subr.bf16.mxu1 %v8801_v57  ;;  %v387_v27 = vld [vmem:[#allocation2 + $0x6c] sm:$0x1]  ;;  %v446_v29 = vld [vmem:[#allocation2 + $0x80] sm:$0x1]  ;;  %vm9311_vm9 = vmor %vm1433_vm7, %vm1434_vm8  ;;  %vm932_vm11 = vsmask.f32 4368 }
  0x54   : > { %v388_v28 = vsel %vm9237_vm4, 0, %v387_v27  ;;  %v447_v32 = vsel %vm9267_vm6, 0, %v446_v29  ;;  %v443_v38 = vld [vmem:[#allocation2 + $0x74] sm:$0x1]  ;;  %v396_v41 = vld [vmem:[#allocation2 + $0x90] sm:$0x1]  ;;  %vm9369_vm13 = vmor %vm358_vm3, %vm932_vm11 }
  0x55   : > { %7861 = vmatpush3.bf16.msra.mxu0 %v8802_v59  ;;  %389 = vst [vmem:[#allocation2 + $0x6c] sm:$0x1] %v388_v28  ;;  %448 = vst [vmem:[#allocation2 + $0x80] sm:$0x1] %v447_v32  ;;  %v444_v40 = vsel %vm9267_vm6, 0, %v443_v38  ;;  %v397_v42 = vsel %vm9237_vm4, 0, %v396_v41 }
  0x56   : > { %7831 = vmatmul.mubr.msk.bf16.gmra.mrb[12].mxu0 %vm590_vm1, %v8780_v14  ;;  %8009 = vmatpush3.bf16.msra.mxu1 %v8801_v57  ;;  %v1439_v14 = vrot.slane %v1437_v4, 4  ;;  %445 = vst [vmem:[#allocation2 + $0x74] sm:$0x1] %v444_v40  ;;  %398 = vst [vmem:[#allocation2 + $0x90] sm:$0x1] %v397_v42  ;;  %v9353_v2 = vld [vmem:[#allocation3] sm:$0xff]  }
  0x57   : > { %7834 = vmatprep.mubr.msk.bf16.mxu0 %vm590_vm1, %v8781_v15  ;;  %7862 = vmatprep.subr.bf16.mxu0 %v8805_v63  ;;  %v1442_v15 = vrot.slane %v1440_v9, 5  ;;  %v393_v43 = vld [vmem:[#allocation2 + $0x84] sm:$0x1]  ;;  %v452_v44 = vld [vmem:[#allocation2 + $0x98] sm:$0x1]  ;;  %p11051_p9 = scmp.ne.s32.totalorder %s10963_s19, 0 }
  0x58   : > { %8042 = vmatprep.subr.bf16.mxu1 %v9317_v36  ;;  %v394_v45 = vsel %vm9237_vm4, 0, %v393_v43  ;;  %v453_v46 = vsel %vm9267_vm6, 0, %v452_v44  ;;  %v449_v47 = vld [vmem:[#allocation2 + $0x8c] sm:$0x1]  ;;  %v402_v49 = vld [vmem:[#allocation2 + $0xa8] sm:$0x1] }
  0x59   : > { %7863 = vmatpush3.bf16.msra.mxu0 %v8805_v63  ;;  %395 = vst [vmem:[#allocation2 + $0x84] sm:$0x1] %v394_v45  ;;  %454 = vst [vmem:[#allocation2 + $0x98] sm:$0x1] %v453_v46  ;;  %v450_v48 = vsel %vm9267_vm6, 0, %v449_v47  ;;  %v403_v50 = vsel %vm9237_vm4, 0, %v402_v49 }
  0x5a   : > { %7864 = vmatprep.subr.bf16.mxu0 %v8807_v12  ;;  %451 = vst [vmem:[#allocation2 + $0x8c] sm:$0x1] %v450_v48  ;;  %404 = vst [vmem:[#allocation2 + $0xa8] sm:$0x1] %v403_v50  ;;  %v399_v51 = vld [vmem:[#allocation2 + $0x9c] sm:$0x1] }
  0x5b   : > { %v458_v52 = vld [vmem:[#allocation2 + $0xb0] sm:$0x1]  ;;  %v400_v53 = vsel %vm9237_vm4, 0, %v399_v51  ;;  %v455_v55 = vld [vmem:[#allocation2 + $0xa4] sm:$0x1]  ;;  %s9078_s26 = smov [#allocation6]  }
  0x5c   : > { %v459_v54 = vsel %vm9267_vm6, 0, %v458_v52  ;;  %401 = vst [vmem:[#allocation2 + $0x9c] sm:$0x1] %v400_v53  ;;  %v456_v56 = vsel %vm9267_vm6, 0, %v455_v55  ;;  %v408_v57 = vld [vmem:[#allocation2 + $0xc0] sm:$0x1] }
  0x5d   : > { %7865 = vmatpush3.bf16.msra.mxu0 %v8807_v12  ;;  %460 = vst [vmem:[#allocation2 + $0xb0] sm:$0x1] %v459_v54  ;;  %457 = vst [vmem:[#allocation2 + $0xa4] sm:$0x1] %v456_v56  ;;  %v409_v58 = vsel %vm9237_vm4, 0, %v408_v57  ;;  %s9010_s28 = sshll.u32 %s9078_s26, 4  ;;  %s9011_s28 = int_to_ptr.vmem [resolvable:$false] %s9010_s28 }
  0x5e   : > { %7835 = vmatmul.mubr.msk.bf16.gmra.mrb[16].mxu0 %vm590_vm1, %v8782_v16  ;;  %v1446_v16 = vshll.u32 %v1370_v8, 16  ;;  %410 = vst [vmem:[#allocation2 + $0xc0] sm:$0x1] %v409_v58  ;;  %v405_v59 = vld [vmem:[#allocation2 + $0xb4] sm:$0x1]  ;;  %7898 = vmatprep.subr.bf16.mxu0 %v9353_v2  ;;  %s9012_s27 = scalar_lea.vmem %s9011_s28, 4096 }
  0x5f   : > { %7838 = vmatprep.mubr.msk.bf16.mxu0 %vm590_vm1, %v8783_v17  ;;  %v1417_v17 = vld [vmem:[#allocation2 + $0x8] sm:$0x1]  ;;  %v406_v60 = vsel %vm9237_vm4, 0, %v405_v59  ;;  %v461_v63 = vld [vmem:[#allocation2 + $0xbc] sm:$0x1] }
  0x60   : > { %v464_v61 = vld [vmem:[#allocation2 + $0xc8] sm:$0x1]  ;;  %407 = vst [vmem:[#allocation2 + $0xb4] sm:$0x1] %v406_v60  ;;  %v462_v0 = vsel %vm9267_vm6, 0, %v461_v63 }
  0x61   : > { %v465_v62 = vsel %vm9267_vm6, 0, %v464_v61  ;;  %463 = vst [vmem:[#allocation2 + $0xbc] sm:$0x1] %v462_v0  ;;  %v9351_v1 = vld [vmem:[%s10930_s2] ss:$0 sm:$0xff] }
  0x62   : > { %466 = vst [vmem:[#allocation2 + $0xc8] sm:$0x1] %v465_v62  ;;  %v1264_v32 = vld [vmem:[#allocation2 + $0x18] sm:$0xf]  ;;  %v1257_v42 = vld [vmem:[#allocation2 + $0xc] sm:$0xf] }
  0x63   : > { %v1268_v49 = vld [vmem:[#allocation2 + $0x20] sm:$0x1]  ;;  %v1261_v55 = vld [vmem:[#allocation2 + $0x14] sm:$0x1] }
  0x66   : > { %7839 = vmatmul.mubr.msk.bf16.gmra.mrb[20].mxu0 %vm590_vm1, %v8784_v18  ;;  %v1443_v18 = vor.u32 %v1442_v15, %v1439_v14 }
  0x67   : > { %7842 = vmatprep.mubr.msk.bf16.mxu0 %vm590_vm1, %v8785_v19  ;;  %v1448_v19 = vrot.slane %v1446_v16, 5 }
  0x68   : > { %v1444_v23 = vrot.slane %v1443_v18, 4 }
  0x6a   : > { %v1449_v34 = vsel %vm9311_vm9, %v1444_v23, %v1448_v19 }
  0x6e   : > { %7843 = vmatmul.mubr.msk.bf16.gmra.mrb[24].mxu0 %vm590_vm1, %v8786_v20  ;;  %v1450_v20 = vshrl.u32 %v1370_v8, 16 }
  0x6f   : > { %7846 = vmatprep.mubr.msk.bf16.mxu0 %vm590_vm1, %v8787_v21  ;;  %v1456_v21 = vshll.u32 %v1417_v17, 16 }
  0x70   : > { %v1452_v24 = vrot.slane %v1450_v20, 4 }
  0x71   : > { %v1458_v31 = vrot.slane %v1456_v21, 5 }
  0x72   : > { %v1453_v30 = vor.u32 %v1452_v24, %v1448_v19 }
  0x74   : > { %v1454_v35 = vrot.slane %v1453_v30, 4 }
  0x76   : > { %7847 = vmatmul.mubr.msk.bf16.gmra.mrb[28].mxu0 %vm590_vm1, %v8788_v22  ;;  %v390_v22 = vld [vmem:[#allocation2 + $0x78] sm:$0x1]  ;;  %v1459_v37 = vsel %vm9311_vm9, %v1454_v35, %v1458_v31 }
  0x77   : > { %v391_v26 = vsel %vm9237_vm4, 0, %v390_v22  ;;  %v7054_v39 = vcombine.low %v1449_v34, %v1459_v37 }
  0x78   : > { %392 = vst [vmem:[#allocation2 + $0x78] sm:$0x1] %v391_v26 }
  0x79   : > { %7866 = vmatprep.mubr.bf16.mxu0 %v7054_v39 }
 0x111   : > { %v7820_v3 = vpop.f32.mrb[0].mxu0 }
 0x112   : > { %v686_v4 = vadd.f32 %v7820_v3, %v9351_v1  ;;  %v677_v5 = vpop.f32.mrb[1].mxu0 }
 0x113   : > { %v678_v6 = vadd.f32 %v9351_v1, %v677_v5  ;;  %v7821_v8 = vpop.f32.mrb[2].mxu0 }
 0x114   : > { %v806_v9 = vmax.f32 %v686_v4, 0.0  ;;  %v689_v10 = vadd.f32 %v7821_v8, %v9351_v1  ;;  %v680_v11 = vpop.f32.mrb[3].mxu0 }
 0x115   : > { %v804_v12 = vmax.f32 %v678_v6, 0.0  ;;  %v681_v13 = vadd.f32 %v9351_v1, %v680_v11 }
 0x116   : > { %v7384_v14 = vpack.c.bf16 %v806_v9, %v806_v9  ;;  %v807_v15 = vmax.f32 %v689_v10, 0.0 }
 0x117   : > { %v7382_v16 = vpack.c.bf16 %v804_v12, %v804_v12  ;;  %v805_v17 = vmax.f32 %v681_v13, 0.0  ;;  %v1278_v13 = vld [vmem:[#allocation2 + $0x30] sm:$0xf] }
 0x118   : > { %v952_v18 = vshrl.u32 %v7384_v14, 16  ;;  %v7385_v19 = vpack.c.bf16 %v807_v15, %v807_v15  ;;  %v955_v20 = vshll.u32 %v7384_v14, 16 }
 0x119   : > { %v935_v21 = vshrl.u32 %v7382_v16, 16  ;;  %v938_v22 = vshll.u32 %v7382_v16, 16  ;;  %v7383_v23 = vpack.c.bf16 %v805_v17, %v805_v17  ;;  %v7824_v24 = vpop.f32.mrb[4].mxu0 }
 0x11a   : > { %v954_v26 = vrot.slane %v952_v18, 7  ;;  %v960_v27 = vshrl.u32 %v7385_v19, 16  ;;  %v963_v28 = vshll.u32 %v7385_v19, 16  ;;  %v702_v29 = vadd.f32 %v7824_v24, %v9351_v1  ;;  %v693_v30 = vpop.f32.mrb[5].mxu0 }
 0x11b   : > { %v937_v34 = vrot.slane %v935_v21, 7  ;;  %v943_v35 = vshrl.u32 %v7383_v23, 16  ;;  %v946_v37 = vshll.u32 %v7383_v23, 16  ;;  %v694_v38 = vadd.f32 %v9351_v1, %v693_v30  ;;  %v7825_v39 = vpop.f32.mrb[6].mxu0 }
 0x11c   : > { %v957_v40 = vor.u32 %v955_v20, %v954_v26  ;;  %v958_v41 = vrot.slane %v954_v26, 4  ;;  %v962_v43 = vrot.slane %v960_v27, 7  ;;  %v810_v44 = vmax.f32 %v702_v29, 0.0  ;;  %v696_v45 = vpop.f32.mrb[7].mxu0  ;;  %v1271_v20 = vld [vmem:[#allocation2 + $0x24] sm:$0xf] }
 0x11d   : > { %v940_v46 = vor.u32 %v938_v22, %v937_v34  ;;  %v941_v47 = vrot.slane %v937_v34, 4  ;;  %v945_v50 = vrot.slane %v943_v35, 7  ;;  %v808_v51 = vmax.f32 %v694_v38, 0.0 }
 0x11e   : > { %v1265_v52 = vsel %vm9362_vm12, %v957_v40, %v1264_v32  ;;  %v965_v53 = vor.u32 %v963_v28, %v962_v43  ;;  %v967_v54 = vrot.slane %v962_v43, 4  ;;  %v7388_v56 = vpack.c.bf16 %v810_v44, %v810_v44  ;;  %v8809_v44 = vld [vmem:[#allocation3 + $0x108] sm:$0xff]  }
 0x11f   : > { %1266 = vst [vmem:[#allocation2 + $0x18] sm:$0xf] %v1265_v52  ;;  %v1258_v57 = vsel %vm9362_vm12, %v940_v46, %v1257_v42  ;;  %v948_v58 = vor.u32 %v946_v37, %v945_v50  ;;  %v950_v59 = vrot.slane %v945_v50, 4  ;;  %v7386_v60 = vpack.c.bf16 %v808_v51, %v808_v51  ;;  %v1275_v46 = vld [vmem:[#allocation2 + $0x2c] sm:$0x1] }
 0x120   : > { %1259 = vst [vmem:[#allocation2 + $0xc] sm:$0xf] %v1258_v57  ;;  %v966_v61 = vsel %vm9369_vm13, %v958_v41, %v965_v53  ;;  %v1269_v62 = vsel %vm9237_vm4, %v967_v54, %v1268_v49  ;;  %v986_v63 = vshrl.u32 %v7388_v56, 16  ;;  %v989_v4 = vshll.u32 %v7388_v56, 16  ;;  %v1292_v56 = vld [vmem:[#allocation2 + $0x48] sm:$0xf] }
 0x121   : > { %1267 = vst [vmem:[#allocation2 + $0x1c] sm:$0xf] %v966_v61  ;;  %1270 = vst [vmem:[#allocation2 + $0x20] sm:$0x1] %v1269_v62  ;;  %v949_v0 = vsel %vm9369_vm13, %v941_v47, %v948_v58  ;;  %v1262_v3 = vsel %vm9237_vm4, %v950_v59, %v1261_v55  ;;  %v969_v5 = vshrl.u32 %v7386_v60, 16  ;;  %v7828_v6 = vpop.f32.mrb[8].mxu0  ;;  %v705_v9 = vadd.f32 %v7825_v39, %v9351_v1 }
 0x122   : > { %1260 = vst [vmem:[#allocation2 + $0x10] sm:$0xf] %v949_v0  ;;  %1263 = vst [vmem:[#allocation2 + $0x14] sm:$0x1] %v1262_v3  ;;  %v9385_v8 = vrot.slane %v986_v63, 7  ;;  %v697_v10 = vadd.f32 %v9351_v1, %v696_v45  ;;  %v718_v11 = vadd.f32 %v7828_v6, %v9351_v1  ;;  %v709_v12 = vpop.f32.mrb[9].mxu0 }
 0x123   : > { %v9390_v14 = vrot.slane %v969_v5, 7  ;;  %v972_v15 = vshll.u32 %v7386_v60, 16  ;;  %v710_v16 = vadd.f32 %v9351_v1, %v709_v12  ;;  %v7829_v17 = vpop.f32.mrb[10].mxu0  ;;  %v811_v21 = vmax.f32 %v705_v9, 0.0  ;;  %v1282_v45 = vld [vmem:[#allocation2 + $0x38] sm:$0x1] }
 0x124   : > { %v991_v18 = vor.u32 %v989_v4, %v9385_v8  ;;  %v992_v19 = vrot.slane %v9385_v8, 4  ;;  %v809_v22 = vmax.f32 %v697_v10, 0.0  ;;  %v712_v23 = vpop.f32.mrb[11].mxu0  ;;  %v814_v27 = vmax.f32 %v718_v11, 0.0  ;;  %v1285_v9 = vld [vmem:[#allocation2 + $0x3c] sm:$0xf] }
 0x125   : > { %v974_v24 = vor.u32 %v972_v15, %v9390_v14  ;;  %v975_v26 = vrot.slane %v9390_v14, 4  ;;  %v812_v28 = vmax.f32 %v710_v16, 0.0  ;;  %v7389_v30 = vpack.c.bf16 %v811_v21, %v811_v21 }
 0x126   : > { %v1279_v29 = vsel %vm9362_vm12, %v991_v18, %v1278_v13  ;;  %v7387_v32 = vpack.c.bf16 %v809_v22, %v809_v22  ;;  %v721_v34 = vadd.f32 %v7829_v17, %v9351_v1  ;;  %v7392_v37 = vpack.c.bf16 %v814_v27, %v814_v27 }
 0x127   : > { %1280 = vst [vmem:[#allocation2 + $0x30] sm:$0xf] %v1279_v29  ;;  %v1272_v35 = vsel %vm9362_vm12, %v974_v24, %v1271_v20  ;;  %v7390_v38 = vpack.c.bf16 %v812_v28, %v812_v28  ;;  %v713_v39 = vadd.f32 %v9351_v1, %v712_v23  ;;  %v994_v40 = vshrl.u32 %v7389_v30, 16  ;;  %v8812_v20 = vld [vmem:[#allocation3 + $0x110] sm:$0xff]  }
 0x128   : > { %1273 = vst [vmem:[#allocation2 + $0x24] sm:$0xf] %v1272_v35  ;;  %v997_v41 = vshll.u32 %v7389_v30, 16  ;;  %v977_v42 = vshrl.u32 %v7387_v32, 16  ;;  %v980_v43 = vshll.u32 %v7387_v32, 16  ;;  %v1020_v47 = vshrl.u32 %v7392_v37, 16 }
 0x129   : > { %v1023_v49 = vshll.u32 %v7392_v37, 16  ;;  %v1003_v50 = vshrl.u32 %v7390_v38, 16  ;;  %v1006_v51 = vshll.u32 %v7390_v38, 16  ;;  %v7832_v52 = vpop.f32.mrb[12].mxu0  ;;  %v8803_v53 = vld [vmem:[#allocation2 + $0xc] sm:$0xff]   ;;  %v996_v54 = vrot.slane %v994_v40, 7 }
 0x12a   : > { %v979_v55 = vrot.slane %v977_v42, 7  ;;  %v815_v57 = vmax.f32 %v721_v34, 0.0  ;;  %v813_v58 = vmax.f32 %v713_v39, 0.0  ;;  %v725_v59 = vpop.f32.mrb[13].mxu0  ;;  %v8806_v60 = vld [vmem:[#allocation2 + $0x18] sm:$0xff]   ;;  %v9403_v61 = vrot.slane %v1020_v47, 7  ;;  %8010 = vmatprep.mubr.bf16.mxu1 %v8803_v53 }
 0x12b   : > { %v9405_v62 = vrot.slane %v1003_v50, 7  ;;  %v734_v63 = vadd.f32 %v7832_v52, %v9351_v1  ;;  %v726_v0 = vadd.f32 %v9351_v1, %v725_v59  ;;  %v7833_v3 = vpop.f32.mrb[14].mxu0  ;;  %v999_v4 = vor.u32 %v997_v41, %v996_v54  ;;  %8011 = vmatmul.mubr.bf16.vlgmr.msra.gmra.mrb[0].mxu1 %v8806_v60  ;;  %v1296_v35 = vld [vmem:[#allocation2 + $0x50] sm:$0x1]  ;;  %v1306_v59 = vld [vmem:[#allocation2 + $0x60] sm:$0xf] }
 0x12c   : > { %v1001_v5 = vrot.slane %v996_v54, 4  ;;  %v982_v6 = vor.u32 %v980_v43, %v979_v55  ;;  %v984_v8 = vrot.slane %v979_v55, 4  ;;  %v728_v10 = vpop.f32.mrb[15].mxu0  ;;  %v1025_v11 = vor.u32 %v1023_v49, %v9403_v61  ;;  %8043 = vmatpush3.bf16.msra.mxu1 %v9317_v36  ;;  %v8815_v42 = vld [vmem:[#allocation3 + $0x118] sm:$0xff]  }
 0x12d   : > { %v1026_v12 = vrot.slane %v9403_v61, 4  ;;  %v1008_v13 = vor.u32 %v1006_v51, %v9405_v62  ;;  %v1009_v14 = vrot.slane %v9405_v62, 4  ;;  %v1000_v15 = vsel %vm9369_vm13, %v992_v19, %v999_v4  ;;  %8044 = vmatprep.subr.bf16.mxu1 %v8809_v44  ;;  %v1299_v60 = vld [vmem:[#allocation2 + $0x54] sm:$0xf] }
 0x12e   : > { %v1283_v16 = vsel %vm9237_vm4, %v1001_v5, %v1282_v45  ;;  %v983_v17 = vsel %vm9369_vm13, %v975_v26, %v982_v6  ;;  %v1276_v18 = vsel %vm9237_vm4, %v984_v8, %v1275_v46  ;;  %1281 = vst [vmem:[#allocation2 + $0x34] sm:$0xf] %v1000_v15  ;;  %v1293_v36 = vsel %vm9362_vm12, %v1025_v11, %v1292_v56  ;;  %v1289_v46 = vld [vmem:[#allocation2 + $0x44] sm:$0x1]  ;;  %v8818_v6 = vld [vmem:[#allocation3 + $0x120] sm:$0xff]  }
 0x12f   : > { %1284 = vst [vmem:[#allocation2 + $0x38] sm:$0x1] %v1283_v16  ;;  %1274 = vst [vmem:[#allocation2 + $0x28] sm:$0xf] %v983_v17  ;;  %v1286_v19 = vsel %vm9362_vm12, %v1008_v13, %v1285_v9  ;;  %v7393_v21 = vpack.c.bf16 %v815_v57, %v815_v57  ;;  %v7391_v22 = vpack.c.bf16 %v813_v58, %v813_v58  ;;  %v818_v23 = vmax.f32 %v734_v63, 0.0 }
 0x130   : > { %1277 = vst [vmem:[#allocation2 + $0x2c] sm:$0x1] %v1276_v18  ;;  %1294 = vst [vmem:[#allocation2 + $0x48] sm:$0xf] %v1293_v36  ;;  %v816_v24 = vmax.f32 %v726_v0, 0.0  ;;  %v737_v26 = vadd.f32 %v7833_v3, %v9351_v1  ;;  %v729_v27 = vadd.f32 %v9351_v1, %v728_v10  ;;  %8045 = vmatpush3.bf16.msra.mxu1 %v8809_v44 }
 0x131   : > { %1287 = vst [vmem:[#allocation2 + $0x3c] sm:$0xf] %v1286_v19  ;;  %v1028_v28 = vshrl.u32 %v7393_v21, 16  ;;  %v1031_v29 = vshll.u32 %v7393_v21, 16  ;;  %v1011_v30 = vshrl.u32 %v7391_v22, 16  ;;  %v1014_v32 = vshll.u32 %v7391_v22, 16  ;;  %8046 = vmatprep.subr.bf16.mxu1 %v8812_v20 }
 0x132   : > { %v7836_v34 = vpop.f32.mrb[16].mxu0  ;;  %v7396_v37 = vpack.c.bf16 %v818_v23, %v818_v23  ;;  %v7394_v38 = vpack.c.bf16 %v816_v24, %v816_v24  ;;  %v819_v39 = vmax.f32 %v737_v26, 0.0  ;;  %v817_v40 = vmax.f32 %v729_v27, 0.0  ;;  %v1371_v17 = vld [vmem:[#allocation2 + $0xc] sm:$0xf] }
 0x133   : > { %v741_v41 = vpop.f32.mrb[17].mxu0  ;;  %v1030_v43 = vrot.slane %v1028_v28, 7  ;;  %v1013_v45 = vrot.slane %v1011_v30, 7  ;;  %v750_v47 = vadd.f32 %v7836_v34, %v9351_v1  ;;  %v1310_v27 = vld [vmem:[#allocation2 + $0x68] sm:$0x1]  ;;  %v8821_v34 = vld [vmem:[#allocation3 + $0x128] sm:$0xff]  }
 0x134   : > { %v742_v49 = vadd.f32 %v9351_v1, %v741_v41  ;;  %v7837_v50 = vpop.f32.mrb[18].mxu0  ;;  %v1054_v51 = vshrl.u32 %v7396_v37, 16  ;;  %v1057_v52 = vshll.u32 %v7396_v37, 16  ;;  %v1037_v53 = vshrl.u32 %v7394_v38, 16  ;;  %8047 = vmatpush3.bf16.msra.mxu1 %v8812_v20 }
 0x135   : > { %v1040_v44 = vshll.u32 %v7394_v38, 16  ;;  %v744_v54 = vpop.f32.mrb[19].mxu0  ;;  %v1033_v55 = vor.u32 %v1031_v29, %v1030_v43  ;;  %v1035_v56 = vrot.slane %v1030_v43, 4  ;;  %v1016_v57 = vor.u32 %v1014_v32, %v1013_v45  ;;  %8048 = vmatprep.subr.bf16.mxu1 %v8815_v42  ;;  %v8810_v13 = vld [vmem:[#allocation2 + $0x30] sm:$0xff]  }
 0x136   : > { %v1018_v58 = vrot.slane %v1013_v45, 4  ;;  %v1056_v63 = vrot.slane %v1054_v51, 7  ;;  %v9430_v0 = vrot.slane %v1037_v53, 7  ;;  %v7397_v3 = vpack.c.bf16 %v819_v39, %v819_v39  ;;  %v8808_v5 = vld [vmem:[#allocation2 + $0x24] sm:$0xff]  }
 0x137   : > { %v7395_v4 = vpack.c.bf16 %v817_v40, %v817_v40  ;;  %v1034_v8 = vsel %vm9369_vm13, %v1026_v12, %v1033_v55  ;;  %v1297_v9 = vsel %vm9237_vm4, %v1035_v56, %v1296_v35  ;;  %v1017_v10 = vsel %vm9369_vm13, %v1009_v14, %v1016_v57  ;;  %8014 = vmatprep.mubr.bf16.mxu1 %v8808_v5  ;;  %v1303_v35 = vld [vmem:[#allocation2 + $0x5c] sm:$0x1]  ;;  %v1320_v56 = vld [vmem:[#allocation2 + $0x78] sm:$0xf]  ;;  %v1313_v57 = vld [vmem:[#allocation2 + $0x6c] sm:$0xf] }
 0x138   : > { %v1290_v11 = vsel %vm9237_vm4, %v1018_v58, %v1289_v46  ;;  %1295 = vst [vmem:[#allocation2 + $0x4c] sm:$0xf] %v1034_v8  ;;  %1298 = vst [vmem:[#allocation2 + $0x50] sm:$0x1] %v1297_v9  ;;  %v1059_v61 = vor.u32 %v1057_v52, %v1056_v63  ;;  %v1060_v15 = vrot.slane %v1056_v63, 4  ;;  %v1042_v12 = vor.u32 %v1040_v44, %v9430_v0  ;;  %v8826_v5 = vld [vmem:[#allocation3 + $0x130] sm:$0xff]  }
 0x139   : > { %1288 = vst [vmem:[#allocation2 + $0x40] sm:$0xf] %v1017_v10  ;;  %1291 = vst [vmem:[#allocation2 + $0x44] sm:$0x1] %v1290_v11  ;;  %v1043_v16 = vrot.slane %v9430_v0, 4  ;;  %v1062_v62 = vshrl.u32 %v7397_v3, 16  ;;  %8015 = vmatmul.mubr.bf16.gmra.mrb[4].mxu1 %v8810_v13  ;;  %v753_v29 = vadd.f32 %v7837_v50, %v9351_v1  ;;  %v745_v30 = vadd.f32 %v9351_v1, %v744_v54 }
 0x13a   : > { %v1065_v18 = vshll.u32 %v7397_v3, 16  ;;  %v1045_v20 = vshrl.u32 %v7395_v4, 16  ;;  %v1048_v14 = vshll.u32 %v7395_v4, 16  ;;  %v9446_v36 = vpop.f32.mrb[20].mxu0  ;;  %v1307_v19 = vsel %vm9362_vm12, %v1059_v61, %v1306_v59  ;;  %8049 = vmatpush3.bf16.msra.mxu1 %v8815_v42  ;;  %v1372_v52 = vld [vmem:[#allocation2 + $0x10] sm:$0xf] }
 0x13b   : > { %v1300_v21 = vsel %vm9362_vm12, %v1042_v12, %v1299_v60  ;;  %v822_v22 = vmax.f32 %v750_v47, 0.0  ;;  %v820_v23 = vmax.f32 %v742_v49, 0.0  ;;  %v9452_v24 = vpop.f32.mrb[21].mxu0  ;;  %1308 = vst [vmem:[#allocation2 + $0x60] sm:$0xf] %v1307_v19  ;;  %v1064_v26 = vrot.slane %v1062_v62, 7  ;;  %8050 = vmatprep.subr.bf16.mxu1 %v8818_v6 }
 0x13c   : > { %1301 = vst [vmem:[#allocation2 + $0x54] sm:$0xf] %v1300_v21  ;;  %v1047_v28 = vrot.slane %v1045_v20, 7  ;;  %v9456_v32 = vpop.f32.mrb[22].mxu0  ;;  %v1461_v39 = vshrl.u32 %v1371_v17, 16  ;;  %v1464_v40 = vshll.u32 %v1371_v17, 16 }
 0x13d   : > { %v7400_v37 = vpack.c.bf16 %v822_v22, %v822_v22  ;;  %v7398_v38 = vpack.c.bf16 %v820_v23, %v820_v23  ;;  %v9458_v41 = vpop.f32.mrb[23].mxu0  ;;  %v1067_v42 = vor.u32 %v1065_v18, %v1064_v26  ;;  %v1069_v43 = vrot.slane %v1064_v26, 4  ;;  %v1418_v58 = vld [vmem:[#allocation2 + $0x14] sm:$0x1]  ;;  %v1374_v19 = vld [vmem:[#allocation2 + $0x1c] sm:$0xf] }
 0x13e   : > { %v1050_v45 = vor.u32 %v1048_v14, %v1047_v28  ;;  %v1052_v46 = vrot.slane %v1047_v28, 4  ;;  %8051 = vmatpush3.bf16.msra.mxu1 %v8818_v6  ;;  %v823_v0 = vmax.f32 %v753_v29, 0.0  ;;  %v821_v3 = vmax.f32 %v745_v30, 0.0  ;;  %v1373_v14 = vld [vmem:[#allocation2 + $0x18] sm:$0xf]  ;;  %v8831_v29 = vld [vmem:[#allocation3 + $0x138] sm:$0xff]  }
 0x13f   : > { %v1088_v47 = vshrl.u32 %v7400_v37, 16  ;;  %v1091_v49 = vshll.u32 %v7400_v37, 16  ;;  %v1071_v50 = vshrl.u32 %v7398_v38, 16  ;;  %v1074_v51 = vshll.u32 %v7398_v38, 16  ;;  %8052 = vmatprep.subr.bf16.mxu1 %v8821_v34  ;;  %v8813_v4 = vld [vmem:[#allocation2 + $0x48] sm:$0xff]  }
 0x140   : > { %v1068_v53 = vsel %vm9369_vm13, %v1060_v15, %v1067_v42  ;;  %v1311_v44 = vsel %vm9237_vm4, %v1069_v43, %v1310_v27  ;;  %v1051_v54 = vsel %vm9369_vm13, %v1043_v16, %v1050_v45  ;;  %v1304_v55 = vsel %vm9237_vm4, %v1052_v46, %v1303_v35  ;;  %v8811_v59 = vld [vmem:[#allocation2 + $0x3c] sm:$0xff]  }
 0x141   : > { %1309 = vst [vmem:[#allocation2 + $0x64] sm:$0xf] %v1068_v53  ;;  %1312 = vst [vmem:[#allocation2 + $0x68] sm:$0x1] %v1311_v44  ;;  %v9468_v60 = vrot.slane %v1088_v47, 7  ;;  %v9470_v63 = vrot.slane %v1071_v50, 7  ;;  %8018 = vmatprep.mubr.bf16.mxu1 %v8811_v59  ;;  %v7401_v17 = vpack.c.bf16 %v823_v0, %v823_v0  ;;  %v7399_v62 = vpack.c.bf16 %v821_v3, %v821_v3 }
 0x142   : > { %1302 = vst [vmem:[#allocation2 + $0x58] sm:$0xf] %v1051_v54  ;;  %1305 = vst [vmem:[#allocation2 + $0x5c] sm:$0x1] %v1304_v55  ;;  %v1463_v6 = vrot.slane %v1461_v39, 4  ;;  %v1466_v8 = vrot.slane %v1464_v40, 5  ;;  %8019 = vmatmul.mubr.bf16.gmra.mrb[8].mxu1 %v8813_v4 }
 0x143   : > { %v1470_v9 = vshll.u32 %v1372_v52, 16  ;;  %v1474_v10 = vshrl.u32 %v1372_v52, 16  ;;  %v9472_v11 = vpop.f32.mrb[24].mxu0  ;;  %v1093_v13 = vor.u32 %v1091_v49, %v9468_v60  ;;  %v1094_v61 = vrot.slane %v9468_v60, 4  ;;  %8053 = vmatpush3.bf16.msra.mxu1 %v8821_v34  ;;  %v1324_v39 = vld [vmem:[#allocation2 + $0x80] sm:$0x1] }
 0x144   : > { %v1076_v15 = vor.u32 %v1074_v51, %v9470_v63  ;;  %v1077_v12 = vrot.slane %v9470_v63, 4  ;;  %v9478_v16 = vpop.f32.mrb[25].mxu0  ;;  %v1467_v18 = vor.u32 %v1466_v8, %v1463_v6  ;;  %v1480_v27 = vshll.u32 %v1418_v58, 16  ;;  %8054 = vmatprep.subr.bf16.mxu1 %v8826_v5  ;;  %v1317_v34 = vld [vmem:[#allocation2 + $0x74] sm:$0x1]  ;;  %v8835_v51 = vld [vmem:[#allocation3 + $0x140] sm:$0xff]  }
 0x145   : > { %v1472_v20 = vrot.slane %v1470_v9, 5  ;;  %v9480_v21 = vpop.f32.mrb[26].mxu0  ;;  %v1321_v22 = vsel %vm9362_vm12, %v1093_v13, %v1320_v56  ;;  %v1476_v26 = vrot.slane %v1474_v10, 4  ;;  %v1096_v30 = vshrl.u32 %v7401_v17, 16  ;;  %v1419_v60 = vld [vmem:[#allocation2 + $0x20] sm:$0x1] }
 0x146   : > { %v1314_v23 = vsel %vm9362_vm12, %v1076_v15, %v1313_v57  ;;  %v9486_v28 = vpop.f32.mrb[27].mxu0  ;;  %1322 = vst [vmem:[#allocation2 + $0x78] sm:$0xf] %v1321_v22  ;;  %v1099_v35 = vshll.u32 %v7401_v17, 16  ;;  %v1079_v37 = vshrl.u32 %v7399_v62, 16  ;;  %v1082_v38 = vshll.u32 %v7399_v62, 16 }
 0x147   : > { %1315 = vst [vmem:[#allocation2 + $0x6c] sm:$0xf] %v1314_v23  ;;  %v1468_v40 = vrot.slane %v1467_v18, 4  ;;  %v1477_v42 = vor.u32 %v1476_v26, %v1472_v20  ;;  %v1482_v43 = vrot.slane %v1480_v27, 5  ;;  %v1485_v45 = vshrl.u32 %v1373_v14, 16  ;;  %8055 = vmatpush3.bf16.msra.mxu1 %v8826_v5  ;;  %v8824_v18 = vld [vmem:[#allocation3 + $0x8] sm:$0xff]  }
 0x148   : > { %v1098_v46 = vrot.slane %v1096_v30, 7  ;;  %v1081_v47 = vrot.slane %v1079_v37, 7  ;;  %v1488_v49 = vshll.u32 %v1373_v14, 16  ;;  %v1494_v50 = vshll.u32 %v1374_v19, 16  ;;  %8056 = vmatprep.subr.bf16.mxu1 %v8831_v29  ;;  %v8816_v63 = vld [vmem:[#allocation2 + $0x60] sm:$0xff]  }
 0x149   : > { %v1473_v52 = vsel %vm9311_vm9, %v1468_v40, %v1472_v20  ;;  %v1478_v53 = vrot.slane %v1477_v42, 4  ;;  %v1487_v44 = vrot.slane %v1485_v45, 4  ;;  %v1498_v54 = vshrl.u32 %v1374_v19, 16  ;;  %v8814_v55 = vld [vmem:[#allocation2 + $0x54] sm:$0xff]   ;;  %v9490_v0 = vpop.f32.mrb[28].mxu0 }
 0x14a   : > { %v1101_v56 = vor.u32 %v1099_v35, %v1098_v46  ;;  %v1103_v57 = vrot.slane %v1098_v46, 4  ;;  %v1084_v58 = vor.u32 %v1082_v38, %v1081_v47  ;;  %v1086_v59 = vrot.slane %v1081_v47, 4  ;;  %8022 = vmatprep.mubr.bf16.mxu1 %v8814_v55  ;;  %v9494_v8 = vpop.f32.mrb[29].mxu0  ;;  %v1375_v17 = vld [vmem:[#allocation2 + $0x24] sm:$0xf] }
 0x14b   : > { %v1483_v3 = vsel %vm9311_vm9, %v1478_v53, %v1482_v43  ;;  %v1490_v4 = vrot.slane %v1488_v49, 5  ;;  %v1496_v5 = vrot.slane %v1494_v50, 5  ;;  %v1500_v6 = vrot.slane %v1498_v54, 4  ;;  %8023 = vmatmul.mubr.bf16.gmra.mrb[12].mxu1 %v8816_v63  ;;  %v9504_v62 = vpop.f32.mrb[30].mxu0  ;;  %v8827_v43 = vld [vmem:[#allocation3 + $0x10] sm:$0xff]  }
 0x14c   : > { %v1102_v9 = vsel %vm9369_vm13, %v1094_v61, %v1101_v56  ;;  %v1325_v10 = vsel %vm9237_vm4, %v1103_v57, %v1324_v39  ;;  %v1085_v13 = vsel %vm9369_vm13, %v1077_v12, %v1084_v58  ;;  %v1318_v15 = vsel %vm9237_vm4, %v1086_v59, %v1317_v34  ;;  %v9506_v22 = vpop.f32.mrb[31].mxu0  ;;  %8057 = vmatpush3.bf16.msra.mxu1 %v8831_v29  ;;  %v1334_v57 = vld [vmem:[#allocation2 + $0x90] sm:$0xf]  ;;  %v3307_v7 = vld [vmem:[#allocation2 + $0x60] sm:$0xf] }
 0x14d   : > { %1323 = vst [vmem:[#allocation2 + $0x7c] sm:$0xf] %v1102_v9  ;;  %1326 = vst [vmem:[#allocation2 + $0x80] sm:$0x1] %v1325_v10  ;;  %v7055_v20 = vcombine.low %v1473_v52, %v1483_v3  ;;  %v1491_v61 = vor.u32 %v1490_v4, %v1487_v44  ;;  %v1501_v14 = vor.u32 %v1500_v6, %v1496_v5  ;;  %v1504_v19 = vshll.u32 %v1419_v60, 16  ;;  %v8829_v4 = vld [vmem:[#allocation3 + $0x18] sm:$0xff]  }
 0x14e   : > { %1316 = vst [vmem:[#allocation2 + $0x70] sm:$0xf] %v1085_v13  ;;  %1319 = vst [vmem:[#allocation2 + $0x74] sm:$0x1] %v1318_v15  ;;  %v766_v12 = vadd.f32 %v9446_v36, %v9351_v1  ;;  %v758_v23 = vadd.f32 %v9351_v1, %v9452_v24  ;;  %v769_v26 = vadd.f32 %v9456_v32, %v9351_v1  ;;  %8090 = vmatprep.subr.bf16.mxu1 %v8835_v51  ;;  %v1376_v36 = vld [vmem:[#allocation2 + $0x28] sm:$0xf] }
 0x14f   : > { %v761_v27 = vadd.f32 %v9351_v1, %v9458_v41  ;;  %7867 = vmatmul.mubr.bf16.vlgmr.msra.gmra.mrb[32].mxu0 %v7055_v20  ;;  %v1492_v30 = vrot.slane %v1491_v61, 4  ;;  %v1502_v35 = vrot.slane %v1501_v14, 4  ;;  %v1506_v37 = vrot.slane %v1504_v19, 5  ;;  %v1420_v51 = vld [vmem:[#allocation2 + $0x2c] sm:$0x1] }
 0x150   : > { %v1509_v38 = vshrl.u32 %v1375_v17, 16  ;;  %v826_v39 = vmax.f32 %v766_v12, 0.0  ;;  %v824_v29 = vmax.f32 %v758_v23, 0.0  ;;  %v827_v34 = vmax.f32 %v769_v26, 0.0  ;;  %7899 = vmatpush3.bf16.msra.mxu0 %v9353_v2  ;;  %v1327_v15 = vld [vmem:[#allocation2 + $0x84] sm:$0xf] }
 0x151   : > { %v825_v40 = vmax.f32 %v761_v27, 0.0  ;;  %v1497_v24 = vsel %vm9311_vm9, %v1492_v30, %v1496_v5  ;;  %v1507_v32 = vsel %vm9311_vm9, %v1502_v35, %v1506_v37  ;;  %v1512_v42 = vshll.u32 %v1375_v17, 16  ;;  %7900 = vmatprep.subr.bf16.mxu0 %v8824_v18  ;;  %v1338_v26 = vld [vmem:[#allocation2 + $0x98] sm:$0x1]  ;;  %v1331_v27 = vld [vmem:[#allocation2 + $0x8c] sm:$0x1] }
 0x152   : > { %v1511_v41 = vrot.slane %v1509_v38, 4  ;;  %v7056_v45 = vcombine.low %v1497_v24, %v1507_v32  ;;  %v7404_v46 = vpack.c.bf16 %v826_v39, %v826_v39  ;;  %v7402_v47 = vpack.c.bf16 %v824_v29, %v824_v29  ;;  %v1377_v39 = vld [vmem:[#allocation2 + $0x30] sm:$0xf]  ;;  %v8832_v29 = vld [vmem:[#allocation3 + $0x20] sm:$0xff]   ;;  %v1378_v32 = vld [vmem:[#allocation2 + $0x34] sm:$0xf] }
 0x153   : > { %v7405_v49 = vpack.c.bf16 %v827_v34, %v827_v34  ;;  %v7403_v50 = vpack.c.bf16 %v825_v40, %v825_v40  ;;  %v1514_v52 = vrot.slane %v1512_v42, 5  ;;  %v1518_v53 = vshll.u32 %v1376_v36, 16 }
 0x154   : > { %v1522_v44 = vshrl.u32 %v1376_v36, 16  ;;  %7870 = vmatprep.mubr.bf16.mxu0 %v7056_v45  ;;  %v1122_v2 = vshrl.u32 %v7404_v46, 16  ;;  %v1125_v54 = vshll.u32 %v7404_v46, 16  ;;  %v1105_v55 = vshrl.u32 %v7402_v47, 16  ;;  %7901 = vmatpush3.bf16.msra.mxu0 %v8824_v18  ;;  %v8819_v13 = vld [vmem:[#allocation2 + $0x78] sm:$0xff]  }
 0x155   : > { %v1108_v56 = vshll.u32 %v7402_v47, 16  ;;  %v1130_v58 = vshrl.u32 %v7405_v49, 16  ;;  %v1133_v59 = vshll.u32 %v7405_v49, 16  ;;  %v1113_v60 = vshrl.u32 %v7403_v50, 16  ;;  %v8817_v3 = vld [vmem:[#allocation2 + $0x6c] sm:$0xff]   ;;  %7902 = vmatprep.subr.bf16.mxu0 %v8827_v43 }
 0x156   : > { %v1116_v63 = vshll.u32 %v7403_v50, 16  ;;  %v1124_v5 = vrot.slane %v1122_v2, 7  ;;  %v1107_v6 = vrot.slane %v1105_v55, 7  ;;  %v1515_v9 = vor.u32 %v1514_v52, %v1511_v41  ;;  %8026 = vmatprep.mubr.bf16.mxu1 %v8817_v3  ;;  %v1421_v41 = vld [vmem:[#allocation2 + $0x38] sm:$0x1] }
 0x157   : > { %v1520_v10 = vrot.slane %v1518_v53, 5  ;;  %v1132_v17 = vrot.slane %v1130_v58, 7  ;;  %v1115_v20 = vrot.slane %v1113_v60, 7  ;;  %v1524_v61 = vrot.slane %v1522_v44, 4  ;;  %8027 = vmatmul.mubr.bf16.gmra.mrb[16].mxu1 %v8819_v13 }
 0x158   : > { %v1528_v14 = vshll.u32 %v1420_v51, 16  ;;  %v1127_v18 = vor.u32 %v1125_v54, %v1124_v5  ;;  %v1128_v19 = vrot.slane %v1124_v5, 4  ;;  %v1110_v12 = vor.u32 %v1108_v56, %v1107_v6  ;;  %7903 = vmatpush3.bf16.msra.mxu0 %v8827_v43  ;;  %v8834_v54 = vld [vmem:[#allocation3 + $0x28] sm:$0xff]  }
 0x159   : > { %v1111_v23 = vrot.slane %v1107_v6, 4  ;;  %v1135_v30 = vor.u32 %v1133_v59, %v1132_v17  ;;  %v1137_v35 = vrot.slane %v1132_v17, 4  ;;  %v1118_v37 = vor.u32 %v1116_v63, %v1115_v20  ;;  %7904 = vmatprep.subr.bf16.mxu0 %v8829_v4  ;;  %v1379_v59 = vld [vmem:[#allocation2 + $0x3c] sm:$0xf] }
 0x15a   : > { %v1120_v38 = vrot.slane %v1115_v20, 4  ;;  %v1335_v34 = vsel %vm9362_vm12, %v1127_v18, %v1334_v57  ;;  %v1328_v40 = vsel %vm9362_vm12, %v1110_v12, %v1327_v15  ;;  %v1516_v36 = vrot.slane %v1515_v9, 4 }
 0x15b   : > { %v1525_v24 = vor.u32 %v1524_v61, %v1520_v10  ;;  %1336 = vst [vmem:[#allocation2 + $0x90] sm:$0xf] %v1335_v34  ;;  %1329 = vst [vmem:[#allocation2 + $0x84] sm:$0xf] %v1328_v40  ;;  %v1136_v42 = vsel %vm9369_vm13, %v1128_v19, %v1135_v30  ;;  %v1339_v43 = vsel %vm9237_vm4, %v1137_v35, %v1338_v26  ;;  %v1530_v50 = vrot.slane %v1528_v14, 5 }
 0x15c   : > { %v1119_v45 = vsel %vm9369_vm13, %v1111_v23, %v1118_v37  ;;  %v1332_v46 = vsel %vm9237_vm4, %v1120_v38, %v1331_v27  ;;  %1337 = vst [vmem:[#allocation2 + $0x94] sm:$0xf] %v1136_v42  ;;  %1340 = vst [vmem:[#allocation2 + $0x98] sm:$0x1] %v1339_v43  ;;  %v1521_v47 = vsel %vm9311_vm9, %v1516_v36, %v1520_v10  ;;  %v1533_v51 = vshrl.u32 %v1377_v39, 16  ;;  %v8837_v36 = vld [vmem:[#allocation3 + $0x38] sm:$0xff]  }
 0x15d   : > { %1330 = vst [vmem:[#allocation2 + $0x88] sm:$0xf] %v1119_v45  ;;  %1333 = vst [vmem:[#allocation2 + $0x8c] sm:$0x1] %v1332_v46  ;;  %v1526_v49 = vrot.slane %v1525_v24, 4  ;;  %7905 = vmatpush3.bf16.msra.mxu0 %v8829_v4  ;;  %v1536_v52 = vshll.u32 %v1377_v39, 16  ;;  %v782_v57 = vadd.f32 %v9472_v11, %v9351_v1  ;;  %v774_v58 = vadd.f32 %v9351_v1, %v9478_v16 }
 0x15e   : > { %v1542_v53 = vshll.u32 %v1378_v32, 16  ;;  %v1546_v44 = vshrl.u32 %v1378_v32, 16  ;;  %v1552_v2 = vshll.u32 %v1421_v41, 16  ;;  %7906 = vmatprep.subr.bf16.mxu0 %v8832_v29  ;;  %v1535_v56 = vrot.slane %v1533_v51, 4  ;;  %v8836_v16 = vld [vmem:[#allocation3 + $0x30] sm:$0xff]  }
 0x15f   : > { %v1531_v55 = vsel %vm9311_vm9, %v1526_v49, %v1530_v50  ;;  %v1538_v63 = vrot.slane %v1536_v52, 5  ;;  %v830_v6 = vmax.f32 %v782_v57, 0.0  ;;  %v828_v9 = vmax.f32 %v774_v58, 0.0  ;;  %v1348_v38 = vld [vmem:[#allocation2 + $0xa8] sm:$0xf]  ;;  %v9549_v57 = vld [vmem:[#allocation3 + $0x80] sm:$0xff]  }
 0x160   : > { %v7057_v60 = vcombine.low %v1521_v47, %v1531_v55  ;;  %v1544_v3 = vrot.slane %v1542_v53, 5  ;;  %v1548_v4 = vrot.slane %v1546_v44, 4  ;;  %v1554_v5 = vrot.slane %v1552_v2, 5  ;;  %v1341_v39 = vld [vmem:[#allocation2 + $0x9c] sm:$0xf] }
 0x161   : > { %v785_v10 = vadd.f32 %v9480_v21, %v9351_v1  ;;  %7907 = vmatpush3.bf16.msra.mxu0 %v8832_v29  ;;  %v1539_v13 = vor.u32 %v1538_v63, %v1535_v56  ;;  %v777_v11 = vadd.f32 %v9351_v1, %v9486_v28  ;;  %v1557_v17 = vshrl.u32 %v1379_v59, 16  ;;  %v1380_v42 = vld [vmem:[#allocation2 + $0x40] sm:$0xf]  ;;  %v1422_v50 = vld [vmem:[#allocation2 + $0x44] sm:$0x1] }
 0x162   : > { %7871 = vmatmul.mubr.bf16.gmra.mrb[36].mxu0 %v7057_v60  ;;  %v1549_v15 = vor.u32 %v1548_v4, %v1544_v3  ;;  %7908 = vmatprep.subr.bf16.mxu0 %v8834_v54  ;;  %v7408_v20 = vpack.c.bf16 %v830_v6, %v830_v6  ;;  %v7406_v61 = vpack.c.bf16 %v828_v9, %v828_v9  ;;  %v1560_v18 = vshll.u32 %v1379_v59, 16  ;;  %v1352_v60 = vld [vmem:[#allocation2 + $0xb0] sm:$0x1]  ;;  %v1345_v63 = vld [vmem:[#allocation2 + $0xa4] sm:$0x1] }
 0x163   : > { %v831_v14 = vmax.f32 %v785_v10, 0.0  ;;  %v1540_v19 = vrot.slane %v1539_v13, 4  ;;  %v829_v23 = vmax.f32 %v777_v11, 0.0  ;;  %v1559_v26 = vrot.slane %v1557_v17, 4  ;;  %v8823_v40 = vld [vmem:[#allocation2 + $0x90] sm:$0xff]  }
 0x164   : > { %v1550_v12 = vrot.slane %v1549_v15, 4  ;;  %v1156_v27 = vshrl.u32 %v7408_v20, 16  ;;  %v1159_v21 = vshll.u32 %v7408_v20, 16  ;;  %v1139_v30 = vshrl.u32 %v7406_v61, 16  ;;  %v8820_v37 = vld [vmem:[#allocation2 + $0x84] sm:$0xff]  }
 0x165   : > { %v1142_v35 = vshll.u32 %v7406_v61, 16  ;;  %7909 = vmatpush3.bf16.msra.mxu0 %v8834_v54  ;;  %v1545_v1 = vsel %vm9311_vm9, %v1540_v19, %v1544_v3  ;;  %v7409_v29 = vpack.c.bf16 %v831_v14, %v831_v14  ;;  %v7407_v34 = vpack.c.bf16 %v829_v23, %v829_v23  ;;  %8030 = vmatprep.mubr.bf16.mxu1 %v8820_v37  ;;  %v1381_v13 = vld [vmem:[#allocation2 + $0x48] sm:$0xf]  ;;  %v1382_v15 = vld [vmem:[#allocation2 + $0x4c] sm:$0xf] }
 0x166   : > { %v1555_v28 = vsel %vm9311_vm9, %v1550_v12, %v1554_v5  ;;  %7910 = vmatprep.subr.bf16.mxu0 %v8836_v16  ;;  %v1158_v32 = vrot.slane %v1156_v27, 7  ;;  %v1141_v41 = vrot.slane %v1139_v30, 7  ;;  %v1562_v43 = vrot.slane %v1560_v18, 5  ;;  %8031 = vmatmul.mubr.bf16.gmra.mrb[20].mxu1 %v8823_v40  ;;  %v1423_v61 = vld [vmem:[#allocation2 + $0x50] sm:$0x1] }
 0x167   : > { %v7058_v24 = vcombine.low %v1545_v1, %v1555_v28  ;;  %v1164_v45 = vshrl.u32 %v7409_v29, 16  ;;  %v1167_v46 = vshll.u32 %v7409_v29, 16  ;;  %v1147_v47 = vshrl.u32 %v7407_v34, 16  ;;  %v8917_v1 = vld [vmem:[%s10930_s2] ss:$0 sm:$0xff] }
 0x168   : > { %v1150_v49 = vshll.u32 %v7407_v34, 16  ;;  %v1161_v51 = vor.u32 %v1159_v21, %v1158_v32  ;;  %v1162_v52 = vrot.slane %v1158_v32, 4  ;;  %v1144_v53 = vor.u32 %v1142_v35, %v1141_v41 }
 0x169   : > { %7874 = vmatprep.mubr.bf16.mxu0 %v7058_v24  ;;  %v1145_v44 = vrot.slane %v1141_v41, 4  ;;  %7911 = vmatpush3.bf16.msra.mxu0 %v8836_v16  ;;  %v1166_v2 = vrot.slane %v1164_v45, 7  ;;  %v1149_v54 = vrot.slane %v1147_v47, 7  ;;  %v1563_v55 = vor.u32 %v1562_v43, %v1559_v26  ;;  %v1383_v41 = vld [vmem:[#allocation2 + $0x54] sm:$0xf] }
 0x16a   : > { %v1566_v56 = vshll.u32 %v1380_v42, 16  ;;  %7912 = vmatprep.subr.bf16.mxu0 %v8837_v36  ;;  %v1349_v58 = vsel %vm9362_vm12, %v1161_v51, %v1348_v38  ;;  %v1342_v59 = vsel %vm9362_vm12, %v1144_v53, %v1341_v39  ;;  %v1570_v3 = vshrl.u32 %v1380_v42, 16 }
 0x16b   : > { %v1576_v4 = vshll.u32 %v1422_v50, 16  ;;  %1350 = vst [vmem:[#allocation2 + $0xa8] sm:$0xf] %v1349_v58  ;;  %1343 = vst [vmem:[#allocation2 + $0x9c] sm:$0xf] %v1342_v59  ;;  %v1169_v5 = vor.u32 %v1167_v46, %v1166_v2  ;;  %v1171_v6 = vrot.slane %v1166_v2, 4  ;;  %v1152_v9 = vor.u32 %v1150_v49, %v1149_v54 }
 0x16c   : > { %v1154_v10 = vrot.slane %v1149_v54, 4  ;;  %v1564_v11 = vrot.slane %v1563_v55, 4  ;;  %v1568_v17 = vrot.slane %v1566_v56, 5  ;;  %v1572_v16 = vrot.slane %v1570_v3, 4  ;;  %v1362_v3 = vld [vmem:[#allocation2 + $0xc0] sm:$0xf] }
 0x16d   : > { %v1578_v20 = vrot.slane %v1576_v4, 5  ;;  %7913 = vmatpush3.bf16.msra.mxu0 %v8837_v36  ;;  %v1170_v14 = vsel %vm9369_vm13, %v1162_v52, %v1169_v5  ;;  %v1353_v18 = vsel %vm9237_vm4, %v1171_v6, %v1352_v60  ;;  %v1153_v19 = vsel %vm9369_vm13, %v1145_v44, %v1152_v9 }
 0x16e   : > { %v1346_v12 = vsel %vm9237_vm4, %v1154_v10, %v1345_v63  ;;  %7946 = vmatprep.subr.bf16.mxu0 %v9549_v57  ;;  %1351 = vst [vmem:[#allocation2 + $0xac] sm:$0xf] %v1170_v14  ;;  %1354 = vst [vmem:[#allocation2 + $0xb0] sm:$0x1] %v1353_v18  ;;  %v1569_v23 = vsel %vm9311_vm9, %v1564_v11, %v1568_v17  ;;  %v1573_v26 = vor.u32 %v1572_v16, %v1568_v17  ;;  %v9579_v11 = vld [vmem:[#allocation2 + $0x58] sm:$0xf] }
 0x16f   : > { %1344 = vst [vmem:[#allocation2 + $0xa0] sm:$0xf] %v1153_v19  ;;  %1347 = vst [vmem:[#allocation2 + $0xa4] sm:$0x1] %v1346_v12  ;;  %v1581_v27 = vshrl.u32 %v1381_v13, 16  ;;  %v1584_v21 = vshll.u32 %v1381_v13, 16  ;;  %v798_v28 = vadd.f32 %v8917_v1, %v9490_v0  ;;  %v790_v34 = vadd.f32 %v8917_v1, %v9494_v8 }
 0x170   : > { %v1590_v30 = vshll.u32 %v1382_v15, 16  ;;  %v1594_v35 = vshrl.u32 %v1382_v15, 16  ;;  %v1600_v37 = vshll.u32 %v1423_v61, 16  ;;  %v1574_v38 = vrot.slane %v1573_v26, 4 }
 0x171   : > { %v1583_v39 = vrot.slane %v1581_v27, 4  ;;  %v1586_v29 = vrot.slane %v1584_v21, 5  ;;  %v834_v32 = vmax.f32 %v798_v28, 0.0  ;;  %v832_v45 = vmax.f32 %v790_v34, 0.0  ;;  %v9587_v34 = vld [vmem:[#allocation2 + $0x60] sm:$0xf] }
 0x172   : > { %v1592_v40 = vrot.slane %v1590_v30, 5  ;;  %v1596_v36 = vrot.slane %v1594_v35, 4  ;;  %v1602_v24 = vrot.slane %v1600_v37, 5  ;;  %v1579_v42 = vsel %vm9311_vm9, %v1574_v38, %v1578_v20  ;;  %v1355_v20 = vld [vmem:[#allocation2 + $0xb4] sm:$0xf] }
 0x173   : > { %v1587_v43 = vor.u32 %v1586_v29, %v1583_v39  ;;  %v801_v46 = vadd.f32 %v8917_v1, %v9504_v62  ;;  %v7059_v47 = vcombine.low %v1569_v23, %v1579_v42  ;;  %v7412_v0 = vpack.c.bf16 %v834_v32, %v834_v32  ;;  %v1366_v23 = vld [vmem:[#allocation2 + $0xc8] sm:$0x1]  ;;  %v1424_v30 = vld [vmem:[#allocation2 + $0x5c] sm:$0x1] }
 0x174   : > { %v1597_v49 = vor.u32 %v1596_v36, %v1592_v40  ;;  %v793_v50 = vadd.f32 %v8917_v1, %v9506_v22  ;;  %v7410_v52 = vpack.c.bf16 %v832_v45, %v832_v45  ;;  %v1605_v53 = vshrl.u32 %v1383_v41, 16  ;;  %v1359_v39 = vld [vmem:[#allocation2 + $0xbc] sm:$0x1] }
 0x175   : > { %v1588_v51 = vrot.slane %v1587_v43, 4  ;;  %v835_v8 = vmax.f32 %v801_v46, 0.0  ;;  %7875 = vmatmul.mubr.bf16.gmra.mrb[40].mxu0 %v7059_v47  ;;  %v1190_v2 = vshrl.u32 %v7412_v0, 16  ;;  %v1193_v54 = vshll.u32 %v7412_v0, 16  ;;  %v8828_v6 = vld [vmem:[#allocation2 + $0xa8] sm:$0xff]  }
 0x176   : > { %v1598_v44 = vrot.slane %v1597_v49, 4  ;;  %v833_v55 = vmax.f32 %v793_v50, 0.0  ;;  %v1173_v58 = vshrl.u32 %v7410_v52, 16  ;;  %v1176_v59 = vshll.u32 %v7410_v52, 16  ;;  %v8825_v60 = vld [vmem:[#allocation2 + $0x9c] sm:$0xff]  }
 0x177   : > { %v1593_v56 = vsel %vm9311_vm9, %v1588_v51, %v1592_v40  ;;  %v7413_v62 = vpack.c.bf16 %v835_v8, %v835_v8  ;;  %v1192_v22 = vrot.slane %v1190_v2, 7  ;;  %v1607_v5 = vrot.slane %v1605_v53, 4  ;;  %8034 = vmatprep.mubr.bf16.mxu1 %v8825_v60  ;;  %v1425_v46 = vld [vmem:[#allocation2 + $0x68] sm:$0x1]  ;;  %v9600_v51 = vld [vmem:[#allocation2 + $0x6c] sm:$0xf] }
 0x178   : > { %v1603_v63 = vsel %vm9311_vm9, %v1598_v44, %v1602_v24  ;;  %v7411_v4 = vpack.c.bf16 %v833_v55, %v833_v55  ;;  %v1175_v10 = vrot.slane %v1173_v58, 7  ;;  %8035 = vmatmul.mubr.bf16.gmra.mrb[24].mxu1 %v8828_v6  ;;  %v1608_v26 = vshll.u32 %v1383_v41, 16  ;;  %v9589_v41 = vld [vmem:[#allocation2 + $0x64] sm:$0xf]  ;;  %v9607_v58 = vld [vmem:[#allocation2 + $0x78] sm:$0xf] }
 0x179   : > { %v7060_v9 = vcombine.low %v1593_v56, %v1603_v63  ;;  %v1198_v13 = vshrl.u32 %v7413_v62, 16  ;;  %v1201_v15 = vshll.u32 %v7413_v62, 16  ;;  %v1195_v17 = vor.u32 %v1193_v54, %v1192_v22  ;;  %v9605_v56 = vld [vmem:[#allocation2 + $0x70] sm:$0xf]  ;;  %v1426_v63 = vld [vmem:[#allocation2 + $0x74] sm:$0x1] }
 0x17a   : > { %v1196_v16 = vrot.slane %v1192_v22, 4  ;;  %v1181_v61 = vshrl.u32 %v7411_v4, 16  ;;  %v1184_v14 = vshll.u32 %v7411_v4, 16  ;;  %v1178_v18 = vor.u32 %v1176_v59, %v1175_v10 }
 0x17b   : > { %7878 = vmatprep.mubr.bf16.mxu0 %v7060_v9  ;;  %v1179_v19 = vrot.slane %v1175_v10, 4  ;;  %v1200_v12 = vrot.slane %v1198_v13, 7  ;;  %v1363_v27 = vsel %vm9362_vm12, %v1195_v17, %v1362_v3  ;;  %v1614_v35 = vshll.u32 %v9579_v11, 16  ;;  %v9616_v17 = vld [vmem:[#allocation2 + $0x7c] sm:$0xf] }
 0x17c   : > { %v1183_v21 = vrot.slane %v1181_v61, 7  ;;  %v1618_v37 = vshrl.u32 %v9579_v11, 16  ;;  %1364 = vst [vmem:[#allocation2 + $0xc0] sm:$0xf] %v1363_v27  ;;  %v1356_v1 = vsel %vm9362_vm12, %v1178_v18, %v1355_v20  ;;  %v1610_v29 = vrot.slane %v1608_v26, 5 }
 0x17d   : > { %v1203_v28 = vor.u32 %v1201_v15, %v1200_v12  ;;  %v1205_v38 = vrot.slane %v1200_v12, 4  ;;  %1357 = vst [vmem:[#allocation2 + $0xb4] sm:$0xf] %v1356_v1  ;;  %v1616_v24 = vrot.slane %v1614_v35, 5  ;;  %v1624_v45 = vshll.u32 %v1424_v30, 16 }
 0x17e   : > { %v1186_v40 = vor.u32 %v1184_v14, %v1183_v21  ;;  %v1188_v36 = vrot.slane %v1183_v21, 4  ;;  %v1620_v32 = vrot.slane %v1618_v37, 4  ;;  %v1611_v43 = vor.u32 %v1610_v29, %v1607_v5  ;;  %v1427_v18 = vld [vmem:[#allocation2 + $0x80] sm:$0x1]  ;;  %v9624_v29 = vld [vmem:[#allocation2 + $0x84] sm:$0xf] }
 0x17f   : > { %v1204_v42 = vsel %vm9369_vm13, %v1196_v16, %v1203_v28  ;;  %v1367_v31 = vsel %vm9237_vm4, %v1205_v38, %v1366_v23  ;;  %v1629_v50 = vshrl.u32 %v9587_v34, 16  ;;  %v1626_v8 = vrot.slane %v1624_v45, 5 }
 0x180   : > { %1365 = vst [vmem:[#allocation2 + $0xc4] sm:$0xf] %v1204_v42  ;;  %1368 = vst [vmem:[#allocation2 + $0xc8] sm:$0x1] %v1367_v31  ;;  %v1187_v47 = vsel %vm9369_vm13, %v1179_v19, %v1186_v40  ;;  %v1360_v49 = vsel %vm9237_vm4, %v1188_v36, %v1359_v39  ;;  %v1621_v0 = vor.u32 %v1620_v32, %v1616_v24  ;;  %v1612_v52 = vrot.slane %v1611_v43, 4 }
 0x181   : > { %1358 = vst [vmem:[#allocation2 + $0xb8] sm:$0xf] %v1187_v47  ;;  %1361 = vst [vmem:[#allocation2 + $0xbc] sm:$0x1] %v1360_v49  ;;  %v1632_v53 = vshll.u32 %v9587_v34, 16  ;;  %v1638_v44 = vshll.u32 %v9589_v41, 16 }
 0x182   : > { %v1622_v2 = vrot.slane %v1621_v0, 4  ;;  %v1631_v54 = vrot.slane %v1629_v50, 4  ;;  %v1642_v48 = vshrl.u32 %v9589_v41, 16  ;;  %v1648_v55 = vshll.u32 %v1425_v46, 16  ;;  %v9629_v31 = vld [vmem:[#allocation2 + $0x88] sm:$0xf] }
 0x183   : > { %v1617_v59 = vsel %vm9311_vm9, %v1612_v52, %v1616_v24  ;;  %v1634_v62 = vrot.slane %v1632_v53, 5  ;;  %v1640_v60 = vrot.slane %v1638_v44, 5  ;;  %v1653_v22 = vshrl.u32 %v9600_v51, 16  ;;  %v1428_v52 = vld [vmem:[#allocation2 + $0x8c] sm:$0x1] }
 0x184   : > { %v1627_v3 = vsel %vm9311_vm9, %v1622_v2, %v1626_v8  ;;  %v1644_v4 = vrot.slane %v1642_v48, 4  ;;  %v1650_v5 = vrot.slane %v1648_v55, 5  ;;  %v1656_v6 = vshll.u32 %v9600_v51, 16  ;;  %v9636_v48 = vld [vmem:[#allocation2 + $0x90] sm:$0xf] }
 0x185   : > { %v7061_v9 = vcombine.low %v1617_v59, %v1627_v3  ;;  %v1635_v10 = vor.u32 %v1634_v62, %v1631_v54  ;;  %v1655_v13 = vrot.slane %v1653_v22, 4  ;;  %v1662_v15 = vshll.u32 %v9605_v56, 16 }
 0x186   : > { %v1645_v16 = vor.u32 %v1644_v4, %v1640_v60  ;;  %v1658_v20 = vrot.slane %v1656_v6, 5  ;;  %v1666_v61 = vshrl.u32 %v9605_v56, 16  ;;  %v1672_v14 = vshll.u32 %v1426_v63, 16  ;;  %v9641_v63 = vld [vmem:[#allocation2 + $0x94] sm:$0xf] }
 0x187   : > { %7879 = vmatmul.mubr.bf16.gmra.mrb[44].mxu0 %v7061_v9  ;;  %v1636_v19 = vrot.slane %v1635_v10, 4  ;;  %v1664_v12 = vrot.slane %v1662_v15, 5  ;;  %v1677_v23 = vshrl.u32 %v9607_v58, 16  ;;  %v1680_v26 = vshll.u32 %v9607_v58, 16  ;;  %v8833_v40 = vld [vmem:[#allocation2 + $0xc0] sm:$0xff]  }
 0x188   : > { %v1646_v27 = vrot.slane %v1645_v16, 4  ;;  %v1659_v21 = vor.u32 %v1658_v20, %v1655_v13  ;;  %v1668_v30 = vrot.slane %v1666_v61, 4  ;;  %v1674_v35 = vrot.slane %v1672_v14, 5  ;;  %v8830_v37 = vld [vmem:[#allocation2 + $0xb4] sm:$0xff]  }
 0x189   : > { %v1641_v1 = vsel %vm9311_vm9, %v1636_v19, %v1640_v60  ;;  %v1679_v28 = vrot.slane %v1677_v23, 4  ;;  %v1682_v38 = vrot.slane %v1680_v26, 5  ;;  %v1686_v39 = vshll.u32 %v9616_v17, 16  ;;  %8038 = vmatprep.mubr.bf16.mxu1 %v8830_v37  ;;  %v1429_v13 = vld [vmem:[#allocation2 + $0x98] sm:$0x1] }
 0x18a   : > { %v1651_v36 = vsel %vm9311_vm9, %v1646_v27, %v1650_v5  ;;  %v1660_v24 = vrot.slane %v1659_v21, 4  ;;  %v1669_v32 = vor.u32 %v1668_v30, %v1664_v12  ;;  %v1690_v42 = vshrl.u32 %v9616_v17, 16  ;;  %8039 = vmatmul.mubr.bf16.gmra.mrb[28].mxu1 %v8833_v40  ;;  %v9653_v27 = vld [vmem:[#allocation2 + $0xa0] sm:$0xf]  ;;  %v9656_v40 = vld [vmem:[#allocation2 + $0xa8] sm:$0xf] }
 0x18b   : > { %v7062_v43 = vcombine.low %v1641_v1, %v1651_v36  ;;  %v1683_v45 = vor.u32 %v1682_v38, %v1679_v28  ;;  %v1688_v46 = vrot.slane %v1686_v39, 5  ;;  %v1696_v47 = vshll.u32 %v1427_v18, 16  ;;  %v9649_v18 = vld [vmem:[#allocation2 + $0x9c] sm:$0xf] }
 0x18c   : > { %v1665_v49 = vsel %vm9311_vm9, %v1660_v24, %v1664_v12  ;;  %v1670_v0 = vrot.slane %v1669_v32, 4  ;;  %v1692_v50 = vrot.slane %v1690_v42, 4  ;;  %v1701_v8 = vshrl.u32 %v9624_v29, 16  ;;  %v1430_v32 = vld [vmem:[#allocation2 + $0xa4] sm:$0x1] }
 0x18d   : > { %7882 = vmatprep.mubr.bf16.mxu0 %v7062_v43  ;;  %v1684_v53 = vrot.slane %v1683_v45, 4  ;;  %v1698_v44 = vrot.slane %v1696_v47, 5  ;;  %v1704_v2 = vshll.u32 %v9624_v29, 16  ;;  %v1710_v54 = vshll.u32 %v9629_v31, 16  ;;  %v9662_v45 = vld [vmem:[#allocation2 + $0xac] sm:$0xf] }
 0x18e   : > { %v1675_v55 = vsel %vm9311_vm9, %v1670_v0, %v1674_v35  ;;  %v1693_v59 = vor.u32 %v1692_v50, %v1688_v46  ;;  %v1703_v62 = vrot.slane %v1701_v8, 4  ;;  %v1714_v60 = vshrl.u32 %v9629_v31, 16 }
 0x18f   : > { %v7063_v22 = vcombine.low %v1665_v49, %v1675_v55  ;;  %v1689_v3 = vsel %vm9311_vm9, %v1684_v53, %v1688_v46  ;;  %v1706_v4 = vrot.slane %v1704_v2, 5  ;;  %v1712_v5 = vrot.slane %v1710_v54, 5 }
 0x190   : > { %v1694_v6 = vrot.slane %v1693_v59, 4  ;;  %v1716_v9 = vrot.slane %v1714_v60, 4  ;;  %v1720_v10 = vshll.u32 %v1428_v52, 16  ;;  %v1725_v15 = vshrl.u32 %v9636_v48, 16 }
 0x191   : > { %7883 = vmatmul.mubr.bf16.gmra.mrb[48].mxu0 %v7063_v22  ;;  %v1707_v16 = vor.u32 %v1706_v4, %v1703_v62  ;;  %v1728_v20 = vshll.u32 %v9636_v48, 16  ;;  %v1734_v61 = vshll.u32 %v9641_v63, 16  ;;  %v1738_v14 = vshrl.u32 %v9641_v63, 16  ;;  %v1431_v22 = vld [vmem:[#allocation2 + $0xb0] sm:$0x1] }
 0x192   : > { %v1699_v19 = vsel %vm9311_vm9, %v1694_v6, %v1698_v44  ;;  %v1717_v12 = vor.u32 %v1716_v9, %v1712_v5  ;;  %v1722_v23 = vrot.slane %v1720_v10, 5  ;;  %v1727_v26 = vrot.slane %v1725_v15, 4  ;;  %v3286_v44 = vld [vmem:[#allocation2 + $0xc] sm:$0xf] }
 0x193   : > { %v7064_v21 = vcombine.low %v1689_v3, %v1699_v19  ;;  %v1708_v30 = vrot.slane %v1707_v16, 4  ;;  %v1730_v35 = vrot.slane %v1728_v20, 5  ;;  %v1736_v37 = vrot.slane %v1734_v61, 5 }
 0x194   : > { %v1718_v1 = vrot.slane %v1717_v12, 4  ;;  %v1740_v28 = vrot.slane %v1738_v14, 4  ;;  %v1744_v38 = vshll.u32 %v1429_v13, 16  ;;  %v1749_v39 = vshrl.u32 %v9649_v18, 16  ;;  %v9674_v13 = vld [vmem:[#allocation2 + $0x10] sm:$0xf] }
 0x195   : > { %7886 = vmatprep.mubr.bf16.mxu0 %v7064_v21  ;;  %v1713_v36 = vsel %vm9311_vm9, %v1708_v30, %v1712_v5  ;;  %v1731_v24 = vor.u32 %v1730_v35, %v1727_v26  ;;  %v1752_v42 = vshll.u32 %v9649_v18, 16  ;;  %v1758_v43 = vshll.u32 %v9653_v27, 16 }
 0x196   : > { %v1723_v46 = vsel %vm9311_vm9, %v1718_v1, %v1722_v23  ;;  %v1741_v47 = vor.u32 %v1740_v28, %v1736_v37  ;;  %v1746_v49 = vrot.slane %v1744_v38, 5  ;;  %v1751_v0 = vrot.slane %v1749_v39, 4  ;;  %v9677_v23 = vld [vmem:[#allocation2 + $0x14] sm:$0x1] }
 0x197   : > { %v7065_v50 = vcombine.low %v1713_v36, %v1723_v46  ;;  %v1732_v52 = vrot.slane %v1731_v24, 4  ;;  %v1754_v8 = vrot.slane %v1752_v42, 5  ;;  %v1760_v53 = vrot.slane %v1758_v43, 5  ;;  %v9682_v1 = vld [vmem:[#allocation2 + $0xb4] sm:$0xf] }
 0x198   : > { %v1742_v2 = vrot.slane %v1741_v47, 4  ;;  %v1762_v54 = vshrl.u32 %v9653_v27, 16  ;;  %v1768_v55 = vshll.u32 %v1430_v32, 16  ;;  %v1773_v59 = vshrl.u32 %v9656_v40, 16  ;;  %v9684_v24 = vld [vmem:[#allocation2 + $0xb8] sm:$0xf] }
 0x199   : > { %7887 = vmatmul.mubr.bf16.gmra.mrb[52].mxu0 %v7065_v50  ;;  %v1737_v62 = vsel %vm9311_vm9, %v1732_v52, %v1736_v37  ;;  %v1755_v60 = vor.u32 %v1754_v8, %v1751_v0  ;;  %v1776_v3 = vshll.u32 %v9656_v40, 16  ;;  %v1782_v4 = vshll.u32 %v9662_v45, 16  ;;  %v3289_v47 = vld [vmem:[#allocation2 + $0x18] sm:$0xf] }
 0x19a   : > { %v1747_v5 = vsel %vm9311_vm9, %v1742_v2, %v1746_v49  ;;  %v1764_v6 = vrot.slane %v1762_v54, 4  ;;  %v1770_v9 = vrot.slane %v1768_v55, 5  ;;  %v1775_v10 = vrot.slane %v1773_v59, 4  ;;  %v1432_v54 = vld [vmem:[#allocation2 + $0xbc] sm:$0x1] }
 0x19b   : > { %v7066_v15 = vcombine.low %v1737_v62, %v1747_v5  ;;  %v1756_v16 = vrot.slane %v1755_v60, 4  ;;  %v1778_v20 = vrot.slane %v1776_v3, 5  ;;  %v1784_v61 = vrot.slane %v1782_v4, 5 }
 0x19c   : > { %v1765_v14 = vor.u32 %v1764_v6, %v1760_v53  ;;  %v1786_v19 = vshrl.u32 %v9662_v45, 16  ;;  %v1792_v12 = vshll.u32 %v1431_v22, 16  ;;  %v3335_v26 = vshrl.u32 %v3286_v44, 16  ;;  %v9696_v6 = vld [vmem:[#allocation2 + $0x1c] sm:$0xf] }
 0x19d   : > { %7890 = vmatprep.mubr.bf16.mxu0 %v7066_v15  ;;  %v1761_v21 = vsel %vm9311_vm9, %v1756_v16, %v1760_v53  ;;  %v1779_v30 = vor.u32 %v1778_v20, %v1775_v10  ;;  %v3338_v35 = vshll.u32 %v3286_v44, 16  ;;  %v3344_v37 = vshll.u32 %v9674_v13, 16  ;;  %v9700_v16 = vld [vmem:[#allocation2 + $0x20] sm:$0x1] }
 0x19e   : > { %v1766_v28 = vrot.slane %v1765_v14, 4  ;;  %v1788_v38 = vrot.slane %v1786_v19, 4  ;;  %v1794_v39 = vrot.slane %v1792_v12, 5  ;;  %v3337_v36 = vrot.slane %v3335_v26, 4  ;;  %v3292_v26 = vld [vmem:[#allocation2 + $0x24] sm:$0xf] }
 0x19f   : > { %v1780_v32 = vrot.slane %v1779_v30, 4  ;;  %v3340_v42 = vrot.slane %v3338_v35, 5  ;;  %v3346_v43 = vrot.slane %v3344_v37, 5  ;;  %v3348_v46 = vshrl.u32 %v9674_v13, 16 }
 0x1a0   : > { %v1771_v49 = vsel %vm9311_vm9, %v1766_v28, %v1770_v9  ;;  %v1789_v0 = vor.u32 %v1788_v38, %v1784_v61  ;;  %v3354_v50 = vshll.u32 %v9677_v23, 16  ;;  %v1797_v52 = vshrl.u32 %v9682_v1, 16  ;;  %v9704_v28 = vld [vmem:[#allocation2 + $0x28] sm:$0xf] }
 0x1a1   : > { %v7067_v8 = vcombine.low %v1761_v21, %v1771_v49  ;;  %v1785_v53 = vsel %vm9311_vm9, %v1780_v32, %v1784_v61  ;;  %v3341_v44 = vor.u32 %v3340_v42, %v3337_v36  ;;  %v3350_v2 = vrot.slane %v3348_v46, 4 }
 0x1a2   : > { %v1790_v55 = vrot.slane %v1789_v0, 4  ;;  %v3356_v59 = vrot.slane %v3354_v50, 5  ;;  %v1799_v62 = vrot.slane %v1797_v52, 4  ;;  %v1800_v60 = vshll.u32 %v9682_v1, 16 }
 0x1a3   : > { %7891 = vmatmul.mubr.bf16.gmra.mrb[56].mxu0 %v7067_v8  ;;  %v3342_v22 = vrot.slane %v3341_v44, 4  ;;  %v3351_v3 = vor.u32 %v3350_v2, %v3346_v43  ;;  %v1806_v4 = vshll.u32 %v9684_v24, 16  ;;  %v1810_v5 = vshrl.u32 %v9684_v24, 16  ;;  %v9711_v8 = vld [vmem:[#allocation2 + $0x2c] sm:$0x1] }
 0x1a4   : > { %v1795_v9 = vsel %vm9311_vm9, %v1790_v55, %v1794_v39  ;;  %v1802_v10 = vrot.slane %v1800_v60, 5  ;;  %v1816_v15 = vshll.u32 %v1432_v54, 16  ;;  %v3359_v20 = vshrl.u32 %v3289_v47, 16  ;;  %v3295_v55 = vld [vmem:[#allocation2 + $0x30] sm:$0xf] }
 0x1a5   : > { %v7068_v61 = vcombine.low %v1785_v53, %v1795_v9  ;;  %v3347_v14 = vsel %vm9311_vm9, %v3342_v22, %v3346_v43  ;;  %v3352_v19 = vrot.slane %v3351_v3, 4  ;;  %v1808_v12 = vrot.slane %v1806_v4, 5 }
 0x1a6   : > { %v1803_v21 = vor.u32 %v1802_v10, %v1799_v62  ;;  %v1812_v30 = vrot.slane %v1810_v5, 4  ;;  %v1818_v35 = vrot.slane %v1816_v15, 5  ;;  %v3361_v37 = vrot.slane %v3359_v20, 4  ;;  %v9720_v10 = vld [vmem:[#allocation2 + $0x34] sm:$0xf] }
 0x1a7   : > { %7894 = vmatprep.mubr.bf16.mxu0 %v7068_v61  ;;  %v3357_v38 = vsel %vm9311_vm9, %v3352_v19, %v3356_v59  ;;  %v3362_v39 = vshll.u32 %v3289_v47, 16  ;;  %v3368_v36 = vshll.u32 %v9696_v6, 16  ;;  %v3372_v32 = vshrl.u32 %v9696_v6, 16  ;;  %v9722_v19 = vld [vmem:[#allocation2 + $0x38] sm:$0x1] }
 0x1a8   : > { %v7166_v42 = vcombine.low %v3347_v14, %v3357_v38  ;;  %v1804_v43 = vrot.slane %v1803_v21, 4  ;;  %v1813_v46 = vor.u32 %v1812_v30, %v1808_v12  ;;  %v3378_v49 = vshll.u32 %v9700_v16, 16  ;;  %v8918_v30 = vld [vmem:[#allocation2] sm:$0xf]  ;;  %v3298_v38 = vld [vmem:[#allocation2 + $0x3c] sm:$0xf] }
 0x1a9   : > { %v3364_v0 = vrot.slane %v3362_v39, 5  ;;  %v3370_v50 = vrot.slane %v3368_v36, 5  ;;  %v3374_v52 = vrot.slane %v3372_v32, 4  ;;  %v3383_v53 = vshrl.u32 %v3292_v26, 16  ;;  %v8839_v32 = vld [vmem:[#allocation3 + $0x148] sm:$0xff]  }
 0x1aa   : > { %8058 = vmatprep.mubr.bf16.mxu1 %v7166_v42  ;;  %v1809_v44 = vsel %vm9311_vm9, %v1804_v43, %v1808_v12  ;;  %v1814_v47 = vrot.slane %v1813_v46, 4  ;;  %v3380_v2 = vrot.slane %v3378_v49, 5  ;;  %v3386_v54 = vshll.u32 %v3292_v26, 16  ;;  %v8920_v42 = vld [vmem:[#allocation2 + $0xc] sm:$0xf] }
 0x1ab   : > { %v3365_v59 = vor.u32 %v3364_v0, %v3361_v37  ;;  %v3375_v62 = vor.u32 %v3374_v52, %v3370_v50  ;;  %v3385_v60 = vrot.slane %v3383_v53, 4  ;;  %v3392_v22 = vshll.u32 %v9704_v28, 16  ;;  %v9724_v37 = vld [vmem:[#allocation2 + $0x4] sm:$0xf]  ;;  %v9731_v43 = vld [vmem:[#allocation2 + $0x10] sm:$0xf] }
 0x1ac   : > { %v1819_v3 = vsel %vm9311_vm9, %v1814_v47, %v1818_v35  ;;  %v3388_v4 = vrot.slane %v3386_v54, 5  ;;  %v3396_v5 = vshrl.u32 %v9704_v28, 16  ;;  %v3402_v9 = vshll.u32 %v9711_v8, 16  ;;  %v9734_v0 = vld [vmem:[#allocation2 + $0x40] sm:$0xf] }
 0x1ad   : > { %v7069_v15 = vcombine.low %v1809_v44, %v1819_v3  ;;  %v3366_v20 = vrot.slane %v3365_v59, 4  ;;  %v3376_v61 = vrot.slane %v3375_v62, 4  ;;  %v3394_v14 = vrot.slane %v3392_v22, 5  ;;  %v8922_v3 = vld [vmem:[#allocation2 + $0x18] sm:$0xf] }
 0x1ae   : > { %v3389_v12 = vor.u32 %v3388_v4, %v3385_v60  ;;  %v3398_v26 = vrot.slane %v3396_v5, 4  ;;  %v3404_v21 = vrot.slane %v3402_v9, 5  ;;  %v7078_v35 = vcombine.low %v8918_v30, %v9724_v37  ;;  %v9741_v4 = vld [vmem:[#allocation2 + $0x1c] sm:$0xf]  ;;  %v9744_v9 = vld [vmem:[#allocation2 + $0x44] sm:$0x1] }
 0x1af   : > { %7895 = vmatmul.mubr.bf16.gmra.mrb[60].mxu0 %v7069_v15  ;;  %v3371_v39 = vsel %vm9311_vm9, %v3366_v20, %v3370_v50  ;;  %v3381_v36 = vsel %vm9311_vm9, %v3376_v61, %v3380_v2  ;;  %v7079_v46 = vcombine.low %v8920_v42, %v9731_v43  ;;  %v3407_v49 = vshrl.u32 %v3295_v55, 16 }
 0x1b0   : > { %v7167_v52 = vcombine.low %v3371_v39, %v3381_v36  ;;  %v3390_v53 = vrot.slane %v3389_v12, 4  ;;  %v3399_v44 = vor.u32 %v3398_v26, %v3394_v14  ;;  %7914 = vmatprep.mubr.bf16.mxu0 %v7078_v35  ;;  %v3410_v47 = vshll.u32 %v3295_v55, 16  ;;  %v8924_v55 = vld [vmem:[#allocation3 + $0x140] sm:$0xff]   ;;  %v3301_v39 = vld [vmem:[#allocation2 + $0x48] sm:$0xf] }
 0x1b1   : > { %v3409_v54 = vrot.slane %v3407_v49, 4  ;;  %v3416_v50 = vshll.u32 %v9720_v10, 16  ;;  %v3420_v59 = vshrl.u32 %v9720_v10, 16  ;;  %v3426_v2 = vshll.u32 %v9722_v19, 16 }
 0x1b2   : > { %8059 = vmatmul.mubr.bf16.vlgmr.msra.gmra.mrb[0].mxu1 %v7167_v52  ;;  %v3395_v62 = vsel %vm9311_vm9, %v3390_v53, %v3394_v14  ;;  %v3400_v60 = vrot.slane %v3399_v44, 4  ;;  %v3412_v22 = vrot.slane %v3410_v47, 5  ;;  %v7080_v5 = vcombine.low %v8922_v3, %v9741_v4  ;;  %v8842_v53 = vld [vmem:[#allocation3 + $0x150] sm:$0xff]  }
 0x1b3   : > { %8091 = vmatpush3.bf16.msra.mxu1 %v8924_v55  ;;  %v3418_v15 = vrot.slane %v3416_v50, 5  ;;  %v3422_v20 = vrot.slane %v3420_v59, 4  ;;  %v3428_v61 = vrot.slane %v3426_v2, 5  ;;  %v3431_v12 = vshrl.u32 %v3298_v38, 16  ;;  %v9750_v44 = vld [vmem:[#allocation2 + $0x4c] sm:$0xf] }
 0x1b4   : > { %v3405_v26 = vsel %vm9311_vm9, %v3400_v60, %v3404_v21  ;;  %8092 = vmatprep.subr.bf16.mxu1 %v8839_v32  ;;  %v3413_v14 = vor.u32 %v3412_v22, %v3409_v54  ;;  %v3434_v30 = vshll.u32 %v3298_v38, 16  ;;  %v3440_v35 = vshll.u32 %v9734_v0, 16  ;;  %v8855_v21 = vld [vmem:[#allocation3 + $0x88] sm:$0xff]   ;;  %v9753_v22 = vld [vmem:[#allocation2 + $0x28] sm:$0xf] }
 0x1b5   : > { %v7168_v36 = vcombine.low %v3395_v62, %v3405_v26  ;;  %v3423_v42 = vor.u32 %v3422_v20, %v3418_v15  ;;  %v3433_v49 = vrot.slane %v3431_v12, 4  ;;  %v3444_v52 = vshrl.u32 %v9734_v0, 16  ;;  %v8925_v60 = vld [vmem:[#allocation2 + $0x24] sm:$0xf]  ;;  %v9758_v26 = vld [vmem:[#allocation2 + $0x50] sm:$0x1] }
 0x1b6   : > { %v3414_v47 = vrot.slane %v3413_v14, 4  ;;  %v3436_v50 = vrot.slane %v3434_v30, 5  ;;  %v3442_v59 = vrot.slane %v3440_v35, 5  ;;  %v3450_v2 = vshll.u32 %v9744_v9, 16  ;;  %10982 = vst [vmem:[#allocation11_spill] sm:$0xff] %v9758_v26 }
 0x1b7   : > { %8062 = vmatprep.mubr.bf16.mxu1 %v7168_v36  ;;  %7915 = vmatmul.mubr.bf16.vlgmr.msra.gmra.mrb[32].mxu0 %v7079_v46  ;;  %v3424_v38 = vrot.slane %v3423_v42, 4  ;;  %v3446_v54 = vrot.slane %v3444_v52, 4  ;;  %v7081_v62 = vcombine.low %v8925_v60, %v9753_v22  ;;  %v3455_v3 = vshrl.u32 %v3301_v39, 16  ;;  %v3304_v42 = vld [vmem:[#allocation2 + $0x54] sm:$0xf] }
 0x1b8   : > { %v3419_v55 = vsel %vm9311_vm9, %v3414_v47, %v3418_v15  ;;  %8093 = vmatpush3.bf16.msra.mxu1 %v8839_v32  ;;  %7918 = vmatprep.mubr.bf16.mxu0 %v7080_v5  ;;  %v3437_v20 = vor.u32 %v3436_v50, %v3433_v49  ;;  %v3452_v12 = vrot.slane %v3450_v2, 5  ;;  %v3458_v14 = vshll.u32 %v3301_v39, 16  ;;  %v8845_v52 = vld [vmem:[#allocation3 + $0x158] sm:$0xff]   ;;  %v9765_v47 = vld [vmem:[#allocation2 + $0x58] sm:$0xf]  ;;  %v8858_v39 = vld [vmem:[#allocation3 + $0x90] sm:$0xff]  }
 0x1b9   : > { %v3429_v46 = vsel %vm9311_vm9, %v3424_v38, %v3428_v61  ;;  %v3447_v30 = vor.u32 %v3446_v54, %v3442_v59  ;;  %8094 = vmatprep.subr.bf16.mxu1 %v8842_v53  ;;  %v3457_v35 = vrot.slane %v3455_v3, 4  ;;  %v3464_v36 = vshll.u32 %v9750_v44, 16  ;;  %7947 = vmatpush3.bf16.msra.mxu0 %v9549_v57  ;;  %v8927_v38 = vld [vmem:[#allocation2 + $0x30] sm:$0xf]  ;;  %v9768_v54 = vld [vmem:[#allocation2 + $0x34] sm:$0xf] }
 0x1ba   : > { %v7169_v15 = vcombine.low %v3419_v55, %v3429_v46  ;;  %v3438_v32 = vrot.slane %v3437_v20, 4  ;;  %v3460_v5 = vrot.slane %v3458_v14, 5  ;;  %v3468_v49 = vshrl.u32 %v9750_v44, 16  ;;  %7948 = vmatprep.subr.bf16.mxu0 %v8855_v21  ;;  %10983 = vst [vmem:[#allocation12_spill] sm:$0xff] %v9768_v54  ;;  %v9773_v20 = vld [vmem:[#allocation2 + $0x5c] sm:$0x1] }
 0x1bb   : > { %v3448_v50 = vrot.slane %v3447_v30, 4  ;;  %v3466_v61 = vrot.slane %v3464_v36, 5  ;;  %v3474_v2 = vshll.u32 %v9758_v26, 16  ;;  %v7082_v60 = vcombine.low %v8927_v38, %v9768_v54  ;;  %10984 = vst [vmem:[#allocation13_spill] sm:$0xff] %v9773_v20 }
 0x1bc   : > { %8063 = vmatmul.mubr.bf16.gmra.mrb[4].mxu1 %v7169_v15  ;;  %v3443_v57 = vsel %vm9311_vm9, %v3438_v32, %v3442_v59  ;;  %v3461_v3 = vor.u32 %v3460_v5, %v3457_v35  ;;  %v3470_v55 = vrot.slane %v3468_v49, 4  ;;  %v3479_v14 = vshrl.u32 %v3304_v42, 16  ;;  %v8848_v59 = vld [vmem:[#allocation3 + $0x160] sm:$0xff]   ;;  %v8860_v35 = vld [vmem:[#allocation3 + $0x98] sm:$0xff]  }
 0x1bd   : > { %v3453_v46 = vsel %vm9311_vm9, %v3448_v50, %v3452_v12  ;;  %v3476_v30 = vrot.slane %v3474_v2, 5  ;;  %8095 = vmatpush3.bf16.msra.mxu1 %v8842_v53  ;;  %v3482_v36 = vshll.u32 %v3304_v42, 16  ;;  %v3488_v25 = vshll.u32 %v9765_v47, 16  ;;  %7949 = vmatpush3.bf16.msra.mxu0 %v8855_v21  ;;  %v9780_v42 = vld [vmem:[#allocation2 + $0x64] sm:$0xf] }
 0x1be   : > { %v7170_v38 = vcombine.low %v3443_v57, %v3453_v46  ;;  %v3462_v15 = vrot.slane %v3461_v3, 4  ;;  %v3471_v26 = vor.u32 %v3470_v55, %v3466_v61  ;;  %v3481_v54 = vrot.slane %v3479_v14, 4  ;;  %8096 = vmatprep.subr.bf16.mxu1 %v8845_v52  ;;  %7950 = vmatprep.subr.bf16.mxu0 %v8858_v39  ;;  %10985 = vst [vmem:[#allocation14_spill] sm:$0xff] %v9780_v42  ;;  %v8929_v50 = vld [vmem:[#allocation2 + $0x3c] sm:$0xf] }
 0x1bf   : > { %7919 = vmatmul.mubr.bf16.gmra.mrb[36].mxu0 %v7081_v62  ;;  %v3484_v32 = vrot.slane %v3482_v36, 5  ;;  %v3490_v5 = vrot.slane %v3488_v25, 5  ;;  %v3492_v12 = vshrl.u32 %v9765_v47, 16  ;;  %v3498_v53 = vshll.u32 %v9773_v20, 16  ;;  %v9784_v2 = vld [vmem:[#allocation2 + $0x40] sm:$0xf] }
 0x1c0   : > { %8066 = vmatprep.mubr.bf16.mxu1 %v7170_v38  ;;  %v3467_v21 = vsel %vm9311_vm9, %v3462_v15, %v3466_v61  ;;  %v3472_v49 = vrot.slane %v3471_v26, 4  ;;  %7922 = vmatprep.mubr.bf16.mxu0 %v7082_v60  ;;  %10986 = vst [vmem:[#allocation15_spill] sm:$0xff] %v9784_v2  ;;  %v7083_v57 = vcombine.low %v8929_v50, %v9784_v2  ;;  %v3503_v62 = vshrl.u32 %v3307_v7, 16  ;;  %v9787_v14 = vld [vmem:[#allocation2 + $0x68] sm:$0x1]  ;;  %v8863_v15 = vld [vmem:[#allocation3 + $0xa0] sm:$0xff]  }
 0x1c1   : > { %v3485_v3 = vor.u32 %v3484_v32, %v3481_v54  ;;  %v3494_v25 = vrot.slane %v3492_v12, 4  ;;  %v3500_v55 = vrot.slane %v3498_v53, 5  ;;  %10987 = vst [vmem:[#allocation16_spill] sm:$0xff] %v9787_v14  ;;  %v3506_v46 = vshll.u32 %v3307_v7, 16  ;;  %8097 = vmatpush3.bf16.msra.mxu1 %v8845_v52  ;;  %7951 = vmatpush3.bf16.msra.mxu0 %v8858_v39  ;;  %v3310_v38 = vld [vmem:[#allocation2 + $0x6c] sm:$0xf] }
 0x1c2   : > { %v3477_v36 = vsel %vm9311_vm9, %v3472_v49, %v3476_v30  ;;  %v3505_v61 = vrot.slane %v3503_v62, 4  ;;  %v3512_v26 = vshll.u32 %v9780_v42, 16  ;;  %v3516_v60 = vshrl.u32 %v9780_v42, 16  ;;  %8098 = vmatprep.subr.bf16.mxu1 %v8848_v59  ;;  %7952 = vmatprep.subr.bf16.mxu0 %v8860_v35  ;;  %v9793_v50 = vld [vmem:[#allocation2 + $0x70] sm:$0xf]  ;;  %v8851_v7 = vld [vmem:[#allocation3 + $0x168] sm:$0xff]  }
 0x1c3   : > { %v7171_v54 = vcombine.low %v3467_v21, %v3477_v36  ;;  %v3486_v32 = vrot.slane %v3485_v3, 4  ;;  %v3495_v12 = vor.u32 %v3494_v25, %v3490_v5  ;;  %v3508_v53 = vrot.slane %v3506_v46, 5  ;;  %v8931_v49 = vld [vmem:[#allocation2 + $0x48] sm:$0xf]  ;;  %v9796_v62 = vld [vmem:[#allocation2 + $0x4c] sm:$0xf] }
 0x1c4   : > { %v3514_v52 = vrot.slane %v3512_v26, 5  ;;  %v3518_v39 = vrot.slane %v3516_v60, 4  ;;  %v3522_v30 = vshll.u32 %v9787_v14, 16  ;;  %10988 = vst [vmem:[#allocation17_spill] sm:$0xff] %v9796_v62  ;;  %v7084_v42 = vcombine.low %v8931_v49, %v9796_v62  ;;  %v9801_v25 = vld [vmem:[#allocation2 + $0x74] sm:$0x1] }
 0x1c5   : > { %8067 = vmatmul.mubr.bf16.gmra.mrb[8].mxu1 %v7171_v54  ;;  %v3491_v20 = vsel %vm9311_vm9, %v3486_v32, %v3490_v5  ;;  %v3496_v21 = vrot.slane %v3495_v12, 4  ;;  %v3509_v3 = vor.u32 %v3508_v53, %v3505_v61  ;;  %v3527_v46 = vshrl.u32 %v3310_v38, 16  ;;  %7953 = vmatpush3.bf16.msra.mxu0 %v8860_v35  ;;  %v3313_v2 = vld [vmem:[#allocation2 + $0x78] sm:$0xf]  ;;  %v8856_v32 = vld [vmem:[#allocation3 + $0x170] sm:$0xff]   ;;  %v8865_v12 = vld [vmem:[#allocation3 + $0xa8] sm:$0xff]  }
 0x1c6   : > { %v3519_v36 = vor.u32 %v3518_v39, %v3514_v52  ;;  %v3524_v26 = vrot.slane %v3522_v30, 5  ;;  %v3530_v60 = vshll.u32 %v3310_v38, 16  ;;  %v3536_v14 = vshll.u32 %v9793_v50, 16  ;;  %8099 = vmatpush3.bf16.msra.mxu1 %v8848_v59  ;;  %7954 = vmatprep.subr.bf16.mxu0 %v8863_v15  ;;  %v9807_v30 = vld [vmem:[#allocation2 + $0x7c] sm:$0xf] }
 0x1c7   : > { %v3501_v54 = vsel %vm9311_vm9, %v3496_v21, %v3500_v55  ;;  %7923 = vmatmul.mubr.bf16.gmra.mrb[40].mxu0 %v7083_v57  ;;  %v3510_v49 = vrot.slane %v3509_v3, 4  ;;  %v3529_v5 = vrot.slane %v3527_v46, 4  ;;  %v3540_v61 = vshrl.u32 %v9793_v50, 16  ;;  %8100 = vmatprep.subr.bf16.mxu1 %v8851_v7  ;;  %v8933_v55 = vld [vmem:[#allocation2 + $0x54] sm:$0xf] }
 0x1c8   : > { %v7172_v35 = vcombine.low %v3491_v20, %v3501_v54  ;;  %v3520_v53 = vrot.slane %v3519_v36, 4  ;;  %7926 = vmatprep.mubr.bf16.mxu0 %v7084_v42  ;;  %v3532_v38 = vrot.slane %v3530_v60, 5  ;;  %v3538_v39 = vrot.slane %v3536_v14, 5  ;;  %v9815_v42 = vld [vmem:[#allocation2 + $0x80] sm:$0x1]  ;;  %v8868_v36 = vld [vmem:[#allocation3 + $0xb0] sm:$0xff]  }
 0x1c9   : > { %v3515_v59 = vsel %vm9311_vm9, %v3510_v49, %v3514_v52  ;;  %v3542_v62 = vrot.slane %v3540_v61, 4  ;;  %v3546_v57 = vshll.u32 %v9801_v25, 16  ;;  %v7085_v21 = vcombine.low %v8933_v55, %v9579_v11  ;;  %7955 = vmatpush3.bf16.msra.mxu0 %v8863_v15  ;;  %v3316_v61 = vld [vmem:[#allocation2 + $0x84] sm:$0xf]  ;;  %v8861_v11 = vld [vmem:[#allocation3 + $0x178] sm:$0xff]  }
 0x1ca   : > { %8070 = vmatprep.mubr.bf16.mxu1 %v7172_v35  ;;  %v3525_v20 = vsel %vm9311_vm9, %v3520_v53, %v3524_v26  ;;  %v3533_v3 = vor.u32 %v3532_v38, %v3529_v5  ;;  %v3551_v14 = vshrl.u32 %v3313_v2, 16  ;;  %v3554_v46 = vshll.u32 %v3313_v2, 16  ;;  %8101 = vmatpush3.bf16.msra.mxu1 %v8851_v7  ;;  %v9819_v5 = vld [vmem:[#allocation2 + $0x88] sm:$0xf] }
 0x1cb   : > { %v7173_v60 = vcombine.low %v3515_v59, %v3525_v20  ;;  %v3543_v52 = vor.u32 %v3542_v62, %v3538_v39  ;;  %v3548_v54 = vrot.slane %v3546_v57, 5  ;;  %v3560_v49 = vshll.u32 %v9807_v30, 16  ;;  %8102 = vmatprep.subr.bf16.mxu1 %v8856_v32  ;;  %7956 = vmatprep.subr.bf16.mxu0 %v8865_v12  ;;  %v9826_v20 = vld [vmem:[#allocation2 + $0x8c] sm:$0x1] }
 0x1cc   : > { %v3534_v15 = vrot.slane %v3533_v3, 4  ;;  %v3553_v35 = vrot.slane %v3551_v14, 4  ;;  %v3556_v55 = vrot.slane %v3554_v46, 5  ;;  %v3564_v26 = vshrl.u32 %v9807_v30, 16  ;;  %v3319_v14 = vld [vmem:[#allocation2 + $0x90] sm:$0xf] }
 0x1cd   : > { %8071 = vmatmul.mubr.bf16.gmra.mrb[12].mxu1 %v7173_v60  ;;  %v3544_v2 = vrot.slane %v3543_v52, 4  ;;  %v3562_v7 = vrot.slane %v3560_v49, 5  ;;  %v3570_v53 = vshll.u32 %v9815_v42, 16  ;;  %v7086_v62 = vcombine.low %v9587_v34, %v9589_v41  ;;  %7957 = vmatpush3.bf16.msra.mxu0 %v8865_v12  ;;  %v9831_v41 = vld [vmem:[#allocation3 + $0x180] sm:$0xff]   ;;  %v8869_v12 = vld [vmem:[#allocation3 + $0xb8] sm:$0xff]  }
 0x1ce   : > { %v3539_v38 = vsel %vm9311_vm9, %v3534_v15, %v3538_v39  ;;  %v3557_v59 = vor.u32 %v3556_v55, %v3553_v35  ;;  %v3566_v57 = vrot.slane %v3564_v26, 4  ;;  %v3575_v3 = vshrl.u32 %v3316_v61, 16  ;;  %8103 = vmatpush3.bf16.msra.mxu1 %v8856_v32  ;;  %7958 = vmatprep.subr.bf16.mxu0 %v8868_v36 }
 0x1cf   : > { %v3549_v46 = vsel %vm9311_vm9, %v3544_v2, %v3548_v54  ;;  %7927 = vmatmul.mubr.bf16.gmra.mrb[44].mxu0 %v7085_v21  ;;  %v3572_v60 = vrot.slane %v3570_v53, 5  ;;  %v3578_v52 = vshll.u32 %v3316_v61, 16  ;;  %v3584_v34 = vshll.u32 %v9819_v5, 16  ;;  %8104 = vmatprep.subr.bf16.mxu1 %v8861_v11  ;;  %v9835_v21 = vld [vmem:[#allocation2 + $0x94] sm:$0xf] }
 0x1d0   : > { %v7174_v39 = vcombine.low %v3539_v38, %v3549_v46  ;;  %v3558_v49 = vrot.slane %v3557_v59, 4  ;;  %v3567_v15 = vor.u32 %v3566_v57, %v3562_v7  ;;  %7930 = vmatprep.mubr.bf16.mxu0 %v7086_v62  ;;  %v3577_v35 = vrot.slane %v3575_v3, 4  ;;  %v9841_v3 = vld [vmem:[#allocation2 + $0x98] sm:$0x1] }
 0x1d1   : > { %v3580_v55 = vrot.slane %v3578_v52, 5  ;;  %v3586_v32 = vrot.slane %v3584_v34, 5  ;;  %v3588_v26 = vshrl.u32 %v9819_v5, 16  ;;  %v3594_v54 = vshll.u32 %v9826_v20, 16  ;;  %7959 = vmatpush3.bf16.msra.mxu0 %v8868_v36 }
 0x1d2   : > { %8074 = vmatprep.mubr.bf16.mxu1 %v7174_v39  ;;  %v3563_v61 = vsel %vm9311_vm9, %v3558_v49, %v3562_v7  ;;  %v3568_v2 = vrot.slane %v3567_v15, 4  ;;  %v7087_v53 = vcombine.low %v9600_v51, %v9605_v56  ;;  %v3599_v38 = vshrl.u32 %v3319_v14, 16  ;;  %8105 = vmatpush3.bf16.msra.mxu1 %v8861_v11  ;;  %v3322_v51 = vld [vmem:[#allocation2 + $0x9c] sm:$0xf]  ;;  %v9848_v15 = vld [vmem:[#allocation2 + $0xa0] sm:$0xf] }
 0x1d3   : > { %v3581_v62 = vor.u32 %v3580_v55, %v3577_v35  ;;  %v3590_v59 = vrot.slane %v3588_v26, 4  ;;  %v3596_v57 = vrot.slane %v3594_v54, 5  ;;  %v3602_v46 = vshll.u32 %v3319_v14, 16  ;;  %8138 = vmatprep.subr.bf16.mxu1 %v9831_v41  ;;  %7960 = vmatprep.subr.bf16.mxu0 %v8869_v12 }
 0x1d4   : > { %v3573_v36 = vsel %vm9311_vm9, %v3568_v2, %v3572_v60  ;;  %v3601_v52 = vrot.slane %v3599_v38, 4  ;;  %v3608_v7 = vshll.u32 %v9835_v21, 16  ;;  %v3612_v34 = vshrl.u32 %v9835_v21, 16 }
 0x1d5   : > { %v7175_v56 = vcombine.low %v3563_v61, %v3573_v36  ;;  %v3582_v11 = vrot.slane %v3581_v62, 4  ;;  %v3591_v39 = vor.u32 %v3590_v59, %v3586_v32  ;;  %v3604_v49 = vrot.slane %v3602_v46, 5  ;;  %7961 = vmatpush3.bf16.msra.mxu0 %v8869_v12  ;;  %v9855_v59 = vld [vmem:[#allocation2 + $0xa4] sm:$0x1] }
 0x1d6   : > { %v3610_v14 = vrot.slane %v3608_v7, 5  ;;  %v3614_v35 = vrot.slane %v3612_v34, 4  ;;  %v3618_v55 = vshll.u32 %v9841_v3, 16  ;;  %v7088_v60 = vcombine.low %v9607_v58, %v9616_v17 }
 0x1d7   : > { %8075 = vmatmul.mubr.bf16.gmra.mrb[16].mxu1 %v7175_v56  ;;  %v3587_v26 = vsel %vm9311_vm9, %v3582_v11, %v3586_v32  ;;  %v3592_v54 = vrot.slane %v3591_v39, 4  ;;  %7931 = vmatmul.mubr.bf16.gmra.mrb[48].mxu0 %v7087_v53  ;;  %v3605_v61 = vor.u32 %v3604_v49, %v3601_v52  ;;  %v3623_v2 = vshrl.u32 %v3322_v51, 16  ;;  %v3325_v32 = vld [vmem:[#allocation2 + $0xa8] sm:$0xf]  ;;  %v9861_v11 = vld [vmem:[#allocation2 + $0xac] sm:$0xf] }
 0x1d8   : > { %v3615_v38 = vor.u32 %v3614_v35, %v3610_v14  ;;  %v3620_v62 = vrot.slane %v3618_v55, 5  ;;  %7934 = vmatprep.mubr.bf16.mxu0 %v7088_v60  ;;  %v3626_v12 = vshll.u32 %v3322_v51, 16  ;;  %v3632_v46 = vshll.u32 %v9848_v15, 16  ;;  %v9870_v60 = vld [vmem:[#allocation2 + $0xb0] sm:$0x1] }
 0x1d9   : > { %v3597_v36 = vsel %vm9311_vm9, %v3592_v54, %v3596_v57  ;;  %v3606_v58 = vrot.slane %v3605_v61, 4  ;;  %v3625_v17 = vrot.slane %v3623_v2, 4  ;;  %v3636_v7 = vshrl.u32 %v9848_v15, 16 }
 0x1da   : > { %v7176_v34 = vcombine.low %v3587_v26, %v3597_v36  ;;  %v3616_v53 = vrot.slane %v3615_v38, 4  ;;  %v3628_v52 = vrot.slane %v3626_v12, 5  ;;  %v3634_v56 = vrot.slane %v3632_v46, 5  ;;  %v3328_v12 = vld [vmem:[#allocation2 + $0xb4] sm:$0xf] }
 0x1db   : > { %v3611_v39 = vsel %vm9311_vm9, %v3606_v58, %v3610_v14  ;;  %v3638_v51 = vrot.slane %v3636_v7, 4  ;;  %v3642_v49 = vshll.u32 %v9855_v59, 16  ;;  %v7089_v57 = vcombine.low %v9624_v29, %v9629_v31  ;;  %v9874_v31 = vld [vmem:[#allocation2 + $0xb8] sm:$0xf] }
 0x1dc   : > { %8078 = vmatprep.mubr.bf16.mxu1 %v7176_v34  ;;  %v3621_v35 = vsel %vm9311_vm9, %v3616_v53, %v3620_v62  ;;  %v3629_v55 = vor.u32 %v3628_v52, %v3625_v17  ;;  %v3647_v26 = vshrl.u32 %v3325_v32, 16  ;;  %v3650_v54 = vshll.u32 %v3325_v32, 16 }
 0x1dd   : > { %v7177_v61 = vcombine.low %v3611_v39, %v3621_v35  ;;  %v3639_v2 = vor.u32 %v3638_v51, %v3634_v56  ;;  %v3644_v38 = vrot.slane %v3642_v49, 5  ;;  %v3656_v14 = vshll.u32 %v9861_v11, 16  ;;  %v9883_v49 = vld [vmem:[#allocation2 + $0xbc] sm:$0x1] }
 0x1de   : > { %v3630_v46 = vrot.slane %v3629_v55, 4  ;;  %v3649_v36 = vrot.slane %v3647_v26, 4  ;;  %v3652_v58 = vrot.slane %v3650_v54, 5  ;;  %v3660_v29 = vshrl.u32 %v9861_v11, 16  ;;  %v3331_v55 = vld [vmem:[#allocation2 + $0xc0] sm:$0xf] }
 0x1df   : > { %8079 = vmatmul.mubr.bf16.gmra.mrb[20].mxu1 %v7177_v61  ;;  %v3640_v62 = vrot.slane %v3639_v2, 4  ;;  %7935 = vmatmul.mubr.bf16.gmra.mrb[52].mxu0 %v7089_v57  ;;  %v3658_v17 = vrot.slane %v3656_v14, 5  ;;  %v3666_v7 = vshll.u32 %v9870_v60, 16  ;;  %v7090_v32 = vcombine.low %v9636_v48, %v9641_v63 }
 0x1e0   : > { %v3653_v34 = vor.u32 %v3652_v58, %v3649_v36  ;;  %v3662_v53 = vrot.slane %v3660_v29, 4  ;;  %v3671_v52 = vshrl.u32 %v3328_v12, 16  ;;  %v3635_v39 = vsel %vm9311_vm9, %v3630_v46, %v3634_v56  ;;  %v9887_v56 = vld [vmem:[#allocation2 + $0xc4] sm:$0xf] }
 0x1e1   : > { %v3645_v51 = vsel %vm9311_vm9, %v3640_v62, %v3644_v38  ;;  %7938 = vmatprep.mubr.bf16.mxu0 %v7090_v32  ;;  %v3674_v35 = vshll.u32 %v3328_v12, 16  ;;  %v3680_v57 = vshll.u32 %v9874_v31, 16  ;;  %v3668_v63 = vrot.slane %v3666_v7, 5  ;;  %v9894_v7 = vld [vmem:[#allocation2 + $0xc8] sm:$0x1] }
 0x1e2   : > { %v7178_v26 = vcombine.low %v3635_v39, %v3645_v51  ;;  %v3654_v54 = vrot.slane %v3653_v34, 4  ;;  %v3663_v61 = vor.u32 %v3662_v53, %v3658_v17  ;;  %v3673_v48 = vrot.slane %v3671_v52, 4 }
 0x1e3   : > { %v3676_v2 = vrot.slane %v3674_v35, 5  ;;  %v3682_v14 = vrot.slane %v3680_v57, 5  ;;  %v3684_v36 = vshrl.u32 %v9874_v31, 16  ;;  %v3690_v12 = vshll.u32 %v9883_v49, 16 }
 0x1e4   : > { %8082 = vmatprep.mubr.bf16.mxu1 %v7178_v26  ;;  %v3659_v38 = vsel %vm9311_vm9, %v3654_v54, %v3658_v17  ;;  %v3664_v46 = vrot.slane %v3663_v61, 4  ;;  %v3695_v58 = vshrl.u32 %v3331_v55, 16  ;;  %v7091_v32 = vcombine.low %v9649_v18, %v9653_v27 }
 0x1e5   : > { %v3677_v29 = vor.u32 %v3676_v2, %v3673_v48  ;;  %v3686_v62 = vrot.slane %v3684_v36, 4  ;;  %v3698_v34 = vshll.u32 %v3331_v55, 16  ;;  %v3704_v39 = vshll.u32 %v9887_v56, 16  ;;  %v4040_v2 = vld [vmem:[#allocation2 + $0xc] sm:$0xe] }
 0x1e6   : > { %v3669_v53 = vsel %vm9311_vm9, %v3664_v46, %v3668_v63  ;;  %v3697_v52 = vrot.slane %v3695_v58, 4  ;;  %v3708_v17 = vshrl.u32 %v9887_v56, 16  ;;  %v3714_v18 = vshll.u32 %v9894_v7, 16 }
 0x1e7   : > { %v7179_v51 = vcombine.low %v3659_v38, %v3669_v53  ;;  %v3678_v35 = vrot.slane %v3677_v29, 4  ;;  %v3687_v57 = vor.u32 %v3686_v62, %v3682_v14  ;;  %7939 = vmatmul.mubr.bf16.gmra.mrb[56].mxu0 %v7091_v32  ;;  %v3700_v26 = vrot.slane %v3698_v34, 5  ;;  %v4041_v34 = vld [vmem:[#allocation2 + $0x18] sm:$0xe] }
 0x1e8   : > { %v3706_v54 = vrot.slane %v3704_v39, 5  ;;  %v3710_v61 = vrot.slane %v3708_v17, 4  ;;  %v7092_v27 = vcombine.low %v9656_v40, %v9662_v45  ;;  %v3692_v48 = vrot.slane %v3690_v12, 5  ;;  %v4042_v17 = vld [vmem:[#allocation2 + $0x24] sm:$0xe] }
 0x1e9   : > { %8083 = vmatmul.mubr.bf16.gmra.mrb[24].mxu1 %v7179_v51  ;;  %v3688_v55 = vrot.slane %v3687_v57, 4  ;;  %v3701_v63 = vor.u32 %v3700_v26, %v3697_v52  ;;  %v3683_v38 = vsel %vm9311_vm9, %v3678_v35, %v3682_v14  ;;  %v4106_v40 = vrot.slane %v9674_v13, 5  ;;  %v2415_v26 = vld [vmem:[#allocation2] sm:$0xe] }
 0x1ea   : > { %v3711_v36 = vor.u32 %v3710_v61, %v3706_v54  ;;  %7942 = vmatprep.mubr.bf16.mxu0 %v7092_v27  ;;  %v3716_v62 = vrot.slane %v3714_v18, 5  ;;  %v7190_v32 = vrot.slane %v4040_v2, 9  ;;  %v4109_v52 = vrot.slane %v9677_v23, 5  ;;  %v8934_v2 = vld [vmem:[#allocation2 + $0x8] sm:$0x1] }
 0x1eb   : > { %v3693_v46 = vsel %vm9311_vm9, %v3688_v55, %v3692_v48  ;;  %v3702_v58 = vrot.slane %v3701_v63, 4  ;;  %v4108_v53 = vrot.slane %v4106_v40, 4  ;;  %v7093_v14 = vcombine.low %v9682_v1, %v9684_v24  ;;  %v2416_v55 = vld [vmem:[#allocation2 + $0xc] sm:$0xe] }
 0x1ec   : > { %v7180_v45 = vcombine.low %v3683_v38, %v3693_v46  ;;  %v3712_v12 = vrot.slane %v3711_v36, 4  ;;  %v4113_v39 = vrot.slane %v9696_v6, 5  ;;  %v4107_v35 = vsel %vm9907_vm2, %v7190_v32, %v4106_v40  ;;  %v4043_v40 = vld [vmem:[#allocation2 + $0x30] sm:$0xe] }
 0x1ed   : > { %v3707_v51 = vsel %vm9311_vm9, %v3702_v58, %v3706_v54  ;;  %v4120_v57 = vrot.slane %v9704_v28, 5  ;;  %v4110_v1 = vsel %vm9907_vm2, %v4108_v53, %v4109_v52  ;;  %v4116_v6 = vrot.slane %v9700_v16, 5  ;;  %v8935_v53 = vld [vmem:[#allocation2 + $0x14] sm:$0x1] }
 0x1ee   : > { %8086 = vmatprep.mubr.bf16.mxu1 %v7180_v45  ;;  %v3717_v13 = vsel %vm9311_vm9, %v3712_v12, %v3716_v62  ;;  %v4115_v24 = vrot.slane %v4113_v39, 4  ;;  %v7206_v61 = vcombine.low %v4107_v35, %v4110_v1  ;;  %v7191_v18 = vrot.slane %v4041_v34, 9  ;;  %v8870_v1 = vld [vmem:[#allocation3 + $0x188] sm:$0xff]  }
 0x1ef   : > { %v7181_v23 = vcombine.low %v3707_v51, %v3717_v13  ;;  %7943 = vmatmul.mubr.bf16.gmra.mrb[60].mxu0 %v7093_v14  ;;  %v7192_v54 = vrot.slane %v4042_v17, 9  ;;  %v4122_v27 = vrot.slane %v4120_v57, 4  ;;  %v7102_v63 = vrot.slane %v2415_v26, 9 }
 0x1f0   : > { %v4117_v48 = vsel %vm9907_vm2, %v4115_v24, %v4116_v6  ;;  %v2468_v28 = vrot.slane %v9724_v37, 5  ;;  %v2471_v36 = vrot.slane %v8934_v2, 5  ;;  %v4114_v38 = vsel %vm9907_vm2, %v7191_v18, %v4113_v39  ;;  %v2417_v39 = vld [vmem:[#allocation2 + $0x18] sm:$0xe] }
 0x1f1   : > { %8087 = vmatmul.mubr.bf16.gmra.mrb[28].mxu1 %v7181_v23  ;;  %v4121_v16 = vsel %vm9907_vm2, %v7192_v54, %v4120_v57  ;;  %v4123_v46 = vrot.slane %v9711_v8, 5  ;;  %v2475_v58 = vrot.slane %v9731_v43, 5  ;;  %v7207_v45 = vcombine.low %v4114_v38, %v4117_v48  ;;  %v4044_v23 = vld [vmem:[#allocation2 + $0x3c] sm:$0xe]  ;;  %v2418_v54 = vld [vmem:[#allocation2 + $0x24] sm:$0xe] }
 0x1f2   : > { %8106 = vmatprep.mubr.bf16.mxu1 %v7206_v61  ;;  %v2469_v12 = vsel %vm9907_vm2, %v7102_v63, %v2468_v28  ;;  %v2470_v62 = vrot.slane %v2468_v28, 4  ;;  %v7103_v37 = vrot.slane %v2416_v55, 9  ;;  %v2478_v52 = vrot.slane %v8935_v53, 5  ;;  %v8936_v61 = vld [vmem:[#allocation2 + $0x20] sm:$0x1] }
 0x1f3   : > { %v4124_v32 = vsel %vm9907_vm2, %v4122_v27, %v4123_v46  ;;  %v2477_v34 = vrot.slane %v2475_v58, 4  ;;  %v4127_v14 = vrot.slane %v9720_v10, 5  ;;  %v7193_v17 = vrot.slane %v4043_v40, 9  ;;  %v8871_v40 = vld [vmem:[#allocation3 + $0x190] sm:$0xff]  }
 0x1f4   : > { %v2472_v8 = vsel %vm9907_vm2, %v2470_v62, %v2471_v36  ;;  %v2476_v43 = vsel %vm9907_vm2, %v7103_v37, %v2475_v58  ;;  %v2482_v51 = vrot.slane %v9741_v4, 5  ;;  %v4130_v26 = vrot.slane %v9722_v19, 5 }
 0x1f5   : > { %v7118_v13 = vcombine.low %v2469_v12, %v2472_v8  ;;  %v2479_v35 = vsel %vm9907_vm2, %v2477_v34, %v2478_v52  ;;  %v4129_v57 = vrot.slane %v4127_v14, 4  ;;  %v7104_v24 = vrot.slane %v2417_v39, 9  ;;  %v8937_v12 = vld [vmem:[#allocation2 + $0x2c] sm:$0x1]  ;;  %v10991_v34 = vld [vmem:[#allocation12_spill] sm:$0xff] }
 0x1f6   : > { %v7119_v10 = vcombine.low %v2476_v43, %v2479_v35  ;;  %v2484_v6 = vrot.slane %v2482_v51, 4  ;;  %v2485_v18 = vrot.slane %v8936_v61, 5  ;;  %v7208_v27 = vcombine.low %v4121_v16, %v4124_v32  ;;  %v2419_v32 = vld [vmem:[#allocation2 + $0x30] sm:$0xe]  ;;  %v10992_v8 = vld [vmem:[#allocation11_spill] sm:$0xff] }
 0x1f7   : > { %7962 = vmatprep.mubr.bf16.mxu0 %v7118_v13  ;;  %v4128_v4 = vsel %vm9907_vm2, %v7193_v17, %v4127_v14  ;;  %v4131_v55 = vsel %vm9907_vm2, %v4129_v57, %v4130_v26  ;;  %v4134_v48 = vrot.slane %v9734_v0, 5  ;;  %v2483_v19 = vsel %vm9907_vm2, %v7104_v24, %v2482_v51  ;;  %v4045_v0 = vld [vmem:[#allocation2 + $0x48] sm:$0xe]  ;;  %v4046_v43 = vld [vmem:[#allocation2 + $0x54] sm:$0xe] }
 0x1f8   : > { %7963 = vmatmul.mubr.bf16.vlgmr.msra.gmra.mrb[32].mxu0 %v7119_v10  ;;  %v2486_v63 = vsel %vm9907_vm2, %v2484_v6, %v2485_v18  ;;  %v7194_v28 = vrot.slane %v4044_v23, 9  ;;  %v2489_v2 = vrot.slane %v9753_v22, 5  ;;  %v4137_v16 = vrot.slane %v9744_v9, 5  ;;  %v8938_v35 = vld [vmem:[#allocation2 + $0x38] sm:$0x1]  ;;  %v8872_v61 = vld [vmem:[#allocation3 + $0x198] sm:$0xff]  }
 0x1f9   : > { %8107 = vmatmul.mubr.bf16.vlgmr.msra.gmra.mrb[0].mxu1 %v7207_v45  ;;  %v7120_v36 = vcombine.low %v2483_v19, %v2486_v63  ;;  %v4136_v38 = vrot.slane %v4134_v48, 4  ;;  %v7105_v46 = vrot.slane %v2418_v54, 9  ;;  %v7209_v58 = vcombine.low %v4128_v4, %v4131_v55  ;;  %v2420_v26 = vld [vmem:[#allocation2 + $0x3c] sm:$0xe] }
 0x1fa   : > { %8139 = vmatpush3.bf16.msra.mxu1 %v9831_v41  ;;  %8110 = vmatprep.mubr.bf16.mxu1 %v7208_v27  ;;  %v2491_v45 = vrot.slane %v2489_v2, 4  ;;  %v2492_v62 = vrot.slane %v8937_v12, 5  ;;  %v4141_v37 = vrot.slane %v9750_v44, 5  ;;  %v4135_v22 = vsel %vm9907_vm2, %v7194_v28, %v4134_v48  ;;  %v10993_v27 = vld [vmem:[#allocation15_spill] sm:$0xff]  ;;  %v10994_v19 = vld [vmem:[#allocation13_spill] sm:$0xff] }
 0x1fb   : > { %8140 = vmatprep.subr.bf16.mxu1 %v8870_v1  ;;  %7966 = vmatprep.mubr.bf16.mxu0 %v7120_v36  ;;  %v4138_v41 = vsel %vm9907_vm2, %v4136_v38, %v4137_v16  ;;  %v2490_v9 = vsel %vm9907_vm2, %v7105_v46, %v2489_v2  ;;  %v2496_v53 = vrot.slane %v10991_v34, 5  ;;  %v7195_v14 = vrot.slane %v4045_v0, 9  ;;  %v4047_v2 = vld [vmem:[#allocation2 + $0x60] sm:$0xe]  ;;  %v8939_v38 = vld [vmem:[#allocation2 + $0x44] sm:$0x1] }
 0x1fc   : > { %v2493_v52 = vsel %vm9907_vm2, %v2491_v45, %v2492_v62  ;;  %v4143_v39 = vrot.slane %v4141_v37, 4  ;;  %v4144_v44 = vrot.slane %v10992_v8, 5  ;;  %v7210_v17 = vcombine.low %v4135_v22, %v4138_v41  ;;  %v10995_v46 = vld [vmem:[#allocation14_spill] sm:$0xff]  ;;  %v2421_v45 = vld [vmem:[#allocation2 + $0x48] sm:$0xe]  ;;  %v10997_v34 = vld [vmem:[#allocation16_spill] sm:$0xff] }
 0x1fd   : > { %v7106_v51 = vrot.slane %v2419_v32, 9  ;;  %v2498_v13 = vrot.slane %v2496_v53, 4  ;;  %v2499_v57 = vrot.slane %v8938_v35, 5  ;;  %v7121_v23 = vcombine.low %v2490_v9, %v2493_v52  ;;  %v8940_v8 = vld [vmem:[#allocation2 + $0x50] sm:$0x1] }
 0x1fe   : > { %8141 = vmatpush3.bf16.msra.mxu1 %v8870_v1  ;;  %v4142_v10 = vsel %vm9907_vm2, %v7195_v14, %v4141_v37  ;;  %v4145_v24 = vsel %vm9907_vm2, %v4143_v39, %v4144_v44  ;;  %v4148_v6 = vrot.slane %v9765_v47, 5  ;;  %v7196_v54 = vrot.slane %v4046_v43, 9  ;;  %v10996_v37 = vld [vmem:[#allocation17_spill] sm:$0xff]  ;;  %v4048_v43 = vld [vmem:[#allocation2 + $0x6c] sm:$0xe] }
 0x1ff   : > { %8142 = vmatprep.subr.bf16.mxu1 %v8871_v40  ;;  %v2497_v1 = vsel %vm9907_vm2, %v7106_v51, %v2496_v53  ;;  %v2500_v18 = vsel %vm9907_vm2, %v2498_v13, %v2499_v57  ;;  %v2503_v4 = vrot.slane %v10993_v27, 5  ;;  %v4151_v63 = vrot.slane %v10994_v19, 5  ;;  %v2422_v57 = vld [vmem:[#allocation2 + $0x54] sm:$0xe] }
 0x200   : > { %7967 = vmatmul.mubr.bf16.gmra.mrb[36].mxu0 %v7121_v23  ;;  %v7122_v55 = vcombine.low %v2497_v1, %v2500_v18  ;;  %v4150_v48 = vrot.slane %v4148_v6, 4  ;;  %v7107_v28 = vrot.slane %v2420_v26, 9  ;;  %v7211_v47 = vcombine.low %v4142_v10, %v4145_v24  ;;  %v8941_v24 = vld [vmem:[#allocation2 + $0x58] sm:$0xf] }
 0x201   : > { %8111 = vmatmul.mubr.bf16.gmra.mrb[4].mxu1 %v7209_v58  ;;  %v2505_v36 = vrot.slane %v2503_v4, 4  ;;  %v2506_v16 = vrot.slane %v8939_v38, 5  ;;  %v4155_v0 = vrot.slane %v10995_v46, 5  ;;  %v4149_v58 = vsel %vm9907_vm2, %v7196_v54, %v4148_v6  ;;  %v4049_v1 = vld [vmem:[#allocation2 + $0x78] sm:$0xe] }
 0x202   : > { %8114 = vmatprep.mubr.bf16.mxu1 %v7210_v17  ;;  %8143 = vmatpush3.bf16.msra.mxu1 %v8871_v40  ;;  %v4152_v12 = vsel %vm9907_vm2, %v4150_v48, %v4151_v63  ;;  %v2504_v62 = vsel %vm9907_vm2, %v7107_v28, %v2503_v4  ;;  %v2510_v32 = vrot.slane %v10996_v37, 5  ;;  %v8873_v40 = vld [vmem:[#allocation3 + $0x1a0] sm:$0xff]   ;;  %v7197_v41 = vrot.slane %v4047_v2, 9  ;;  %v2423_v38 = vld [vmem:[#allocation2 + $0x60] sm:$0xe] }
 0x203   : > { %7970 = vmatprep.mubr.bf16.mxu0 %v7122_v55  ;;  %8144 = vmatprep.subr.bf16.mxu1 %v8872_v61  ;;  %v2507_v22 = vsel %vm9907_vm2, %v2505_v36, %v2506_v16  ;;  %v4157_v9 = vrot.slane %v4155_v0, 4  ;;  %v4158_v53 = vrot.slane %v10997_v34, 5  ;;  %v7212_v52 = vcombine.low %v4149_v58, %v4152_v12  ;;  %v8942_v48 = vld [vmem:[#allocation2 + $0x5c] sm:$0x1]  ;;  %v8944_v12 = vld [vmem:[#allocation2 + $0x68] sm:$0x1] }
 0x204   : > { %v7108_v14 = vrot.slane %v2421_v45, 9  ;;  %v2512_v39 = vrot.slane %v2510_v32, 4  ;;  %v2513_v44 = vrot.slane %v8940_v8, 5  ;;  %v7123_v17 = vcombine.low %v2504_v62, %v2507_v22  ;;  %v4050_v37 = vld [vmem:[#allocation2 + $0x84] sm:$0xe] }
 0x205   : > { %v9995_v51 = vsel %vm9907_vm2, %v7197_v41, %v4155_v0  ;;  %v9999_v13 = vsel %vm9907_vm2, %v4157_v9, %v4158_v53  ;;  %v4162_v35 = vrot.slane %v9793_v50, 5  ;;  %v2517_v6 = vrot.slane %v8941_v24, 5  ;;  %v8874_v50 = vld [vmem:[#allocation3 + $0x1a8] sm:$0xff]  }
 0x206   : > { %8145 = vmatpush3.bf16.msra.mxu1 %v8872_v61  ;;  %v7213_v26 = vcombine.low %v9995_v51, %v9999_v13  ;;  %v2511_v23 = vsel %vm9907_vm2, %v7108_v14, %v2510_v32  ;;  %v2514_v10 = vsel %vm9907_vm2, %v2512_v39, %v2513_v44  ;;  %v7198_v54 = vrot.slane %v4048_v43, 9  ;;  %v8875_v32 = vld [vmem:[#allocation3 + $0x1b0] sm:$0xff]   ;;  %v8945_v14 = vld [vmem:[#allocation2 + $0x70] sm:$0xf] }
 0x207   : > { %8146 = vmatprep.subr.bf16.mxu1 %v8873_v40  ;;  %v7124_v18 = vcombine.low %v2511_v23, %v2514_v10  ;;  %v4164_v27 = vrot.slane %v4162_v35, 4  ;;  %v4165_v61 = vrot.slane %v9801_v25, 5  ;;  %v7109_v4 = vrot.slane %v2422_v57, 9  ;;  %v8943_v25 = vld [vmem:[#allocation2 + $0x64] sm:$0xf]  ;;  %v8876_v23 = vld [vmem:[#allocation3 + $0x1b8] sm:$0xff]  }
 0x208   : > { %7971 = vmatmul.mubr.bf16.gmra.mrb[40].mxu0 %v7123_v17  ;;  %v2519_v55 = vrot.slane %v2517_v6, 4  ;;  %v2520_v19 = vrot.slane %v8942_v48, 5  ;;  %v4169_v63 = vrot.slane %v9807_v30, 5  ;;  %v4163_v28 = vsel %vm9907_vm2, %v7198_v54, %v4162_v35  ;;  %v4051_v51 = vld [vmem:[#allocation2 + $0x90] sm:$0xe] }
 0x209   : > { %8115 = vmatmul.mubr.bf16.gmra.mrb[8].mxu1 %v7211_v47  ;;  %7974 = vmatprep.mubr.bf16.mxu0 %v7124_v18  ;;  %v4166_v2 = vsel %vm9907_vm2, %v4164_v27, %v4165_v61  ;;  %v7199_v36 = vrot.slane %v4049_v1, 9  ;;  %v2524_v16 = vrot.slane %v8943_v25, 5  ;;  %v4172_v45 = vrot.slane %v9815_v42, 5  ;;  %v2425_v57 = vld [vmem:[#allocation2 + $0x78] sm:$0xe] }
 0x20a   : > { %8118 = vmatprep.mubr.bf16.mxu1 %v7212_v52  ;;  %v7214_v47 = vcombine.low %v4163_v28, %v4166_v2  ;;  %v2521_v46 = vsel %vm9907_vm2, %v2519_v55, %v2520_v19  ;;  %v4171_v0 = vrot.slane %v4169_v63, 4  ;;  %8147 = vmatpush3.bf16.msra.mxu1 %v8873_v40  ;;  %v2518_v30 = vsel %vm9907_vm2, %v7109_v4, %v2517_v6  ;;  %v2424_v52 = vld [vmem:[#allocation2 + $0x6c] sm:$0xe]  ;;  %v8946_v6 = vld [vmem:[#allocation2 + $0x74] sm:$0x1] }
 0x20b   : > { %v2526_v58 = vrot.slane %v2524_v16, 4  ;;  %v2527_v62 = vrot.slane %v8944_v12, 5  ;;  %8148 = vmatprep.subr.bf16.mxu1 %v8874_v50  ;;  %v10021_v22 = vsel %vm9907_vm2, %v7199_v36, %v4169_v63  ;;  %v7110_v9 = vrot.slane %v2423_v38, 9  ;;  %v8948_v55 = vld [vmem:[#allocation2 + $0x80] sm:$0x1] }
 0x20c   : > { %v10025_v41 = vsel %vm9907_vm2, %v4171_v0, %v4172_v45  ;;  %v4176_v42 = vrot.slane %v9819_v5, 5  ;;  %v7125_v40 = vcombine.low %v2518_v30, %v2521_v46  ;;  %v2531_v39 = vrot.slane %v8945_v14, 5  ;;  %v4052_v19 = vld [vmem:[#allocation2 + $0x9c] sm:$0xe] }
 0x20d   : > { %v7215_v34 = vcombine.low %v10021_v22, %v10025_v41  ;;  %v2528_v53 = vsel %vm9907_vm2, %v2526_v58, %v2527_v62  ;;  %v2525_v8 = vsel %vm9907_vm2, %v7110_v9, %v2524_v16  ;;  %v7200_v44 = vrot.slane %v4050_v37, 9  ;;  %v4053_v58 = vld [vmem:[#allocation2 + $0xa8] sm:$0xe] }
 0x20e   : > { %v4178_v43 = vrot.slane %v4176_v42, 4  ;;  %v4179_v17 = vrot.slane %v9826_v20, 5  ;;  %8149 = vmatpush3.bf16.msra.mxu1 %v8874_v50  ;;  %v7126_v5 = vcombine.low %v2525_v8, %v2528_v53  ;;  %v2533_v13 = vrot.slane %v2531_v39, 4  ;;  %v8947_v20 = vld [vmem:[#allocation2 + $0x7c] sm:$0xf] }
 0x20f   : > { %v4183_v35 = vrot.slane %v9835_v21, 5  ;;  %8150 = vmatprep.subr.bf16.mxu1 %v8875_v32  ;;  %v4177_v10 = vsel %vm9907_vm2, %v7200_v44, %v4176_v42  ;;  %v2534_v1 = vrot.slane %v8946_v6, 5  ;;  %v2538_v18 = vrot.slane %v8947_v20, 5  ;;  %v2426_v42 = vld [vmem:[#allocation2 + $0x84] sm:$0xe] }
 0x210   : > { %7975 = vmatmul.mubr.bf16.gmra.mrb[44].mxu0 %v7125_v40  ;;  %v4180_v24 = vsel %vm9907_vm2, %v4178_v43, %v4179_v17  ;;  %v7201_v27 = vrot.slane %v4051_v51, 9  ;;  %v4186_v61 = vrot.slane %v9841_v3, 5  ;;  %v7111_v50 = vrot.slane %v2424_v52, 9  ;;  %v10050_v3 = vld [vmem:[#allocation3 + $0x1c0] sm:$0xff]   ;;  %v2427_v53 = vld [vmem:[#allocation2 + $0x90] sm:$0xe] }
 0x211   : > { %8119 = vmatmul.mubr.bf16.gmra.mrb[12].mxu1 %v7213_v26  ;;  %7978 = vmatprep.mubr.bf16.mxu0 %v7126_v5  ;;  %v7216_v54 = vcombine.low %v4177_v10, %v4180_v24  ;;  %v4185_v21 = vrot.slane %v4183_v35, 4  ;;  %v7112_v26 = vrot.slane %v2425_v57, 9  ;;  %v2540_v4 = vrot.slane %v2538_v18, 4  ;;  %v8950_v52 = vld [vmem:[#allocation2 + $0x94] sm:$0xf] }
 0x212   : > { %8122 = vmatprep.mubr.bf16.mxu1 %v7214_v47  ;;  %v2541_v48 = vrot.slane %v8948_v55, 5  ;;  %8151 = vmatpush3.bf16.msra.mxu1 %v8875_v32  ;;  %v2535_v63 = vsel %vm9907_vm2, %v2533_v13, %v2534_v1  ;;  %v10045_v28 = vsel %vm9907_vm2, %v7201_v27, %v4183_v35  ;;  %v4190_v36 = vrot.slane %v9848_v15, 5  ;;  %v8949_v47 = vld [vmem:[#allocation2 + $0x88] sm:$0xf]  ;;  %v8951_v44 = vld [vmem:[#allocation2 + $0x8c] sm:$0x1] }
 0x213   : > { %v4187_v2 = vsel %vm9907_vm2, %v4185_v21, %v4186_v61  ;;  %8152 = vmatprep.subr.bf16.mxu1 %v8876_v23  ;;  %v2532_v38 = vsel %vm9907_vm2, %v7111_v50, %v2531_v39  ;;  %v2545_v46 = vrot.slane %v8949_v47, 5  ;;  %v2539_v0 = vsel %vm9907_vm2, %v7112_v26, %v2538_v18  ;;  %v8952_v51 = vld [vmem:[#allocation2 + $0x98] sm:$0x1]  ;;  %v4055_v6 = vld [vmem:[#allocation2 + $0xc0] sm:$0xe] }
 0x214   : > { %v7217_v25 = vcombine.low %v10045_v28, %v4187_v2  ;;  %v2542_v16 = vsel %vm9907_vm2, %v2540_v4, %v2541_v48  ;;  %v7202_v45 = vrot.slane %v4052_v19, 9  ;;  %v4192_v30 = vrot.slane %v4190_v36, 4  ;;  %v8954_v21 = vld [vmem:[#allocation2 + $0xac] sm:$0xf]  ;;  %v2428_v19 = vld [vmem:[#allocation2 + $0x9c] sm:$0xe] }
 0x215   : > { %v4193_v15 = vrot.slane %v9855_v59, 5  ;;  %v7127_v12 = vcombine.low %v2532_v38, %v2535_v63  ;;  %v7128_v62 = vcombine.low %v2539_v0, %v2542_v16  ;;  %v4197_v37 = vrot.slane %v9861_v11, 5  ;;  %v411_v48 = vld [vmem:[#allocation2 + $0xcc] sm:$0x1]  ;;  %v4054_v28 = vld [vmem:[#allocation2 + $0xb4] sm:$0xe] }
 0x216   : > { %8153 = vmatpush3.bf16.msra.mxu1 %v8876_v23  ;;  %v4191_v32 = vsel %vm9907_vm2, %v7202_v45, %v4190_v36  ;;  %v2547_v40 = vrot.slane %v2545_v46, 4  ;;  %v2552_v14 = vrot.slane %v8950_v52, 5  ;;  %v7203_v11 = vrot.slane %v4053_v58, 9  ;;  %v8953_v23 = vld [vmem:[#allocation2 + $0xa0] sm:$0xf] }
 0x217   : > { %v4194_v9 = vsel %vm9907_vm2, %v4192_v30, %v4193_v15  ;;  %8186 = vmatprep.subr.bf16.mxu1 %v10050_v3  ;;  %v4199_v39 = vrot.slane %v4197_v37, 4  ;;  %v4200_v8 = vrot.slane %v9870_v60, 5  ;;  %v2548_v43 = vrot.slane %v8951_v44, 5  ;;  %v8955_v2 = vld [vmem:[#allocation2 + $0xa4] sm:$0x1] }
 0x218   : > { %7979 = vmatmul.mubr.bf16.gmra.mrb[48].mxu0 %v7127_v12  ;;  %v7218_v59 = vcombine.low %v4191_v32, %v4194_v9  ;;  %v2554_v17 = vrot.slane %v2552_v14, 4  ;;  %v2555_v5 = vrot.slane %v8952_v51, 5  ;;  %v7113_v13 = vrot.slane %v2426_v42, 9  ;;  %v2429_v16 = vld [vmem:[#allocation2 + $0xa8] sm:$0xe] }
 0x219   : > { %8123 = vmatmul.mubr.bf16.gmra.mrb[16].mxu1 %v7215_v34  ;;  %7982 = vmatprep.mubr.bf16.mxu0 %v7128_v62  ;;  %v4198_v35 = vsel %vm9907_vm2, %v7203_v11, %v4197_v37  ;;  %v4201_v22 = vsel %vm9907_vm2, %v4199_v39, %v4200_v8  ;;  %v7114_v41 = vrot.slane %v2427_v53, 9  ;;  %v2549_v34 = vsel %vm9907_vm2, %v2547_v40, %v2548_v43  ;;  %v8957_v58 = vld [vmem:[#allocation2 + $0xb8] sm:$0xf]  ;;  %v2430_v11 = vld [vmem:[#allocation2 + $0xb4] sm:$0xe] }
 0x21a   : > { %8126 = vmatprep.mubr.bf16.mxu1 %v7216_v54  ;;  %v7219_v57 = vcombine.low %v4198_v35, %v4201_v22  ;;  %v2556_v60 = vsel %vm9907_vm2, %v2554_v17, %v2555_v5  ;;  %v2559_v10 = vrot.slane %v8953_v23, 5  ;;  %v4204_v24 = vrot.slane %v9874_v31, 5  ;;  %v8958_v39 = vld [vmem:[#allocation2 + $0xbc] sm:$0x1]  ;;  %v8881_v35 = vld [vmem:[#allocation3 + $0x1c8] sm:$0xff]   ;;  %v8880_v22 = vld [vmem:[#allocation2 + $0x30] sm:$0xff]  }
 0x21b   : > { %v2546_v1 = vsel %vm9907_vm2, %v7113_v13, %v2545_v46  ;;  %v2553_v20 = vsel %vm9907_vm2, %v7114_v41, %v2552_v14  ;;  %v4211_v18 = vrot.slane %v9887_v56, 5  ;;  %v2566_v61 = vrot.slane %v8954_v21, 5  ;;  %v8877_v5 = vld [vmem:[#allocation2 + $0x18] sm:$0xff]   ;;  %v8879_v13 = vld [vmem:[#allocation2 + $0x24] sm:$0xff]  }
 0x21c   : > { %v7129_v54 = vcombine.low %v2546_v1, %v2549_v34  ;;  %v7130_v27 = vcombine.low %v2553_v20, %v2556_v60  ;;  %v2561_v50 = vrot.slane %v2559_v10, 4  ;;  %v7205_v26 = vrot.slane %v4055_v6, 9  ;;  %v8884_v41 = vld [vmem:[#allocation3 + $0x1d0] sm:$0xff]   ;;  %v4926_v34 = vld [vmem:[#allocation2 + $0x1c] sm:$0xf]  ;;  %v8887_v60 = vld [vmem:[#allocation3 + $0x1d8] sm:$0xff]  }
 0x21d   : > { %v4213_v4 = vrot.slane %v4211_v18, 4  ;;  %v4214_v55 = vrot.slane %v9894_v7, 5  ;;  %v4206_v31 = vrot.slane %v4204_v24, 4  ;;  %v2568_v63 = vrot.slane %v2566_v61, 4  ;;  %v4925_v23 = vld [vmem:[#allocation2 + $0x18] sm:$0xf] }
 0x21e   : > { %v2562_v56 = vrot.slane %v8955_v2, 5  ;;  %v4212_v36 = vsel %vm9907_vm2, %v7205_v26, %v4211_v18  ;;  %v4207_v7 = vrot.slane %v9883_v49, 5  ;;  %v412_v45 = vsel %vm9237_vm4, 0, %v411_v48  ;;  %v4928_v1 = vld [vmem:[#allocation2 + $0x24] sm:$0xf] }
 0x21f   : > { %v4215_v38 = vsel %vm9907_vm2, %v4213_v4, %v4214_v55  ;;  %v7115_v30 = vrot.slane %v2428_v19, 9  ;;  %v2573_v12 = vrot.slane %v8957_v58, 5  ;;  %413 = vst [vmem:[#allocation2 + $0xcc] sm:$0x1] %v412_v45  ;;  %v7204_v62 = vrot.slane %v4054_v28, 9  ;;  %v8893_v28 = vld [vmem:[#allocation3 + $0x1e8] sm:$0xff]  }
 0x220   : > { %7983 = vmatmul.mubr.bf16.gmra.mrb[52].mxu0 %v7129_v54  ;;  %v7221_v47 = vcombine.low %v4212_v36, %v4215_v38  ;;  %v2563_v15 = vsel %vm9907_vm2, %v2561_v50, %v2562_v56  ;;  %v4208_v37 = vsel %vm9907_vm2, %v4206_v31, %v4207_v7  ;;  %v7116_v32 = vrot.slane %v2429_v16, 9  ;;  %v4929_v54 = vld [vmem:[#allocation2 + $0x28] sm:$0xf]  ;;  %v4927_v26 = vld [vmem:[#allocation2 + $0x20] sm:$0x1] }
 0x221   : > { %8127 = vmatmul.mubr.bf16.gmra.mrb[20].mxu1 %v7217_v25  ;;  %7986 = vmatprep.mubr.bf16.mxu0 %v7130_v27  ;;  %v8956_v25 = vld [vmem:[#allocation2 + $0xb0] sm:$0x1]  ;;  %v2560_v9 = vsel %vm9907_vm2, %v7115_v30, %v2559_v10  ;;  %v4205_v42 = vsel %vm9907_vm2, %v7204_v62, %v4204_v24  ;;  %v2576_v8 = vrot.slane %v8958_v39, 5  ;;  %v7117_v44 = vrot.slane %v2430_v11, 9  ;;  %v8883_v10 = vld [vmem:[#allocation2 + $0x48] sm:$0xff]   ;;  %v8886_v56 = vld [vmem:[#allocation2 + $0x60] sm:$0xff]  }
 0x222   : > { %8130 = vmatprep.mubr.bf16.mxu1 %v7218_v59  ;;  %v2569_v46 = vrot.slane %v8956_v25, 5  ;;  %v7131_v40 = vcombine.low %v2560_v9, %v2563_v15  ;;  %v2567_v53 = vsel %vm9907_vm2, %v7116_v32, %v2566_v61  ;;  %v7220_v52 = vcombine.low %v4205_v42, %v4208_v37  ;;  %v4931_v19 = vld [vmem:[#allocation2 + $0x30] sm:$0xf]  ;;  %v10111_v2 = vld [vmem:[#allocation2 + $0x34] sm:$0xf]  ;;  %v8896_v58 = vld [vmem:[#allocation3 + $0x1f0] sm:$0xff]  }
 0x223   : > { %v2575_v59 = vrot.slane %v2573_v12, 4  ;;  %v2574_v17 = vsel %vm9907_vm2, %v7117_v44, %v2573_v12  ;;  %v4983_v24 = vshll.u32 %v4926_v34, 16  ;;  %v4987_v6 = vshrl.u32 %v4926_v34, 16  ;;  %v10118_v12 = vld [vmem:[#allocation2 + $0x2c] sm:$0x1]  ;;  %v8899_v44 = vld [vmem:[#allocation3 + $0x1f8] sm:$0xff]  }
 0x224   : > { %v2570_v49 = vsel %vm9907_vm2, %v2568_v63, %v2569_v46  ;;  %v4974_v20 = vshrl.u32 %v4925_v23, 16  ;;  %v4977_v18 = vshll.u32 %v4925_v23, 16  ;;  %v4998_v61 = vshrl.u32 %v4928_v1, 16  ;;  %v8885_v63 = vld [vmem:[#allocation2 + $0x54] sm:$0xff]   ;;  %v4934_v32 = vld [vmem:[#allocation2 + $0x3c] sm:$0xf] }
 0x225   : > { %v7132_v14 = vcombine.low %v2567_v53, %v2570_v49  ;;  %v2577_v43 = vsel %vm9907_vm2, %v2575_v59, %v2576_v8  ;;  %v10109_v27 = vrot.slane %v4983_v24, 5  ;;  %v4989_v21 = vrot.slane %v4987_v6, 4  ;;  %v10121_v42 = vld [vmem:[#allocation2 + $0x38] sm:$0x1]  ;;  %v10126_v39 = vld [vmem:[#allocation2 + $0x40] sm:$0xf] }
 0x226   : > { %v7133_v51 = vcombine.low %v2574_v17, %v2577_v43  ;;  %v5001_v50 = vshll.u32 %v4928_v1, 16  ;;  %v5007_v4 = vshll.u32 %v4929_v54, 16  ;;  %v5011_v55 = vshrl.u32 %v4929_v54, 16  ;;  %v8888_v8 = vld [vmem:[#allocation2 + $0x6c] sm:$0xff]   ;;  %v10139_v1 = vld [vmem:[#allocation2 + $0x58] sm:$0xf] }
 0x227   : > { %v4976_v48 = vrot.slane %v4974_v20, 4  ;;  %v4979_v31 = vrot.slane %v4977_v18, 5  ;;  %v4990_v36 = vor.u32 %v4989_v21, %v10109_v27  ;;  %v4993_v38 = vshll.u32 %v4927_v26, 16  ;;  %v10141_v20 = vld [vmem:[#allocation3 + $0x200] sm:$0xff]  }
 0x228   : > { %7987 = vmatmul.mubr.bf16.gmra.mrb[56].mxu0 %v7131_v40  ;;  %v5000_v16 = vrot.slane %v4998_v61, 4  ;;  %v5003_v7 = vrot.slane %v5001_v50, 5  ;;  %v5013_v25 = vrot.slane %v5011_v55, 4  ;;  %v5022_v46 = vshrl.u32 %v4931_v19, 16  ;;  %v10148_v50 = vld [vmem:[#allocation2 + $0x44] sm:$0x1] }
 0x229   : > { %8131 = vmatmul.mubr.bf16.gmra.mrb[24].mxu1 %v7219_v57  ;;  %7990 = vmatprep.mubr.bf16.mxu0 %v7132_v14  ;;  %v8882_v57 = vld [vmem:[#allocation2 + $0x3c] sm:$0xff]   ;;  %v5025_v0 = vshll.u32 %v4931_v19, 16  ;;  %v4980_v45 = vor.u32 %v4979_v31, %v4976_v48  ;;  %v5031_v30 = vshll.u32 %v10111_v2, 16  ;;  %v5035_v15 = vshrl.u32 %v10111_v2, 16 }
 0x22a   : > { %8134 = vmatprep.mubr.bf16.mxu1 %v7220_v52  ;;  %v4991_v62 = vrot.slane %v4990_v36, 4  ;;  %v5004_v37 = vor.u32 %v5003_v7, %v5000_v16  ;;  %v4995_v49 = vrot.slane %v4993_v38, 5  ;;  %v5024_v40 = vrot.slane %v5022_v46, 4  ;;  %v4943_v16 = vld [vmem:[#allocation2 + $0x60] sm:$0xf]  ;;  %v8891_v7 = vld [vmem:[#allocation2 + $0x84] sm:$0xff]  }
 0x22b   : > { %v5027_v53 = vrot.slane %v5025_v0, 5  ;;  %v4981_v52 = vrot.slane %v4980_v45, 4  ;;  %v5017_v14 = vshll.u32 %v10118_v12, 16  ;;  %v10124_v59 = vrot.slane %v5031_v30, 5  ;;  %v10160_v45 = vld [vmem:[#allocation2 + $0x64] sm:$0xf] }
 0x22c   : > { %v5037_v11 = vrot.slane %v5035_v15, 4  ;;  %v5046_v43 = vshrl.u32 %v4934_v32, 16  ;;  %v5049_v17 = vshll.u32 %v4934_v32, 16  ;;  %v5041_v34 = vshll.u32 %v10121_v42, 16  ;;  %v8892_v30 = vld [vmem:[#allocation2 + $0x90] sm:$0xff]  }
 0x22d   : > { %v4986_v23 = vsel %vm9311_vm9, %v4981_v52, %v10109_v27  ;;  %v5059_v6 = vshrl.u32 %v10126_v39, 16  ;;  %v5103_v36 = vshll.u32 %v10139_v1, 16  ;;  %v5107_v38 = vshrl.u32 %v10139_v1, 16 }
 0x22e   : > { %v5038_v24 = vor.u32 %v5037_v11, %v10124_v59  ;;  %v5048_v18 = vrot.slane %v5046_v43, 4  ;;  %v5051_v54 = vrot.slane %v5049_v17, 5  ;;  %v5043_v31 = vrot.slane %v5041_v34, 5  ;;  %v10185_v34 = vld [vmem:[#allocation2 + $0x5c] sm:$0x1] }
 0x22f   : > { %v5109_v52 = vrot.slane %v5107_v38, 4  ;;  %v5131_v11 = vshrl.u32 %v10160_v45, 16  ;;  %v5113_v38 = vshll.u32 %v10185_v34, 16  ;;  %v5755_v33 = vrot.slane %v10118_v12, 5 }
 0x230   : > { %7991 = vmatmul.mubr.bf16.gmra.mrb[60].mxu0 %v7133_v51  ;;  %v8889_v51 = vld [vmem:[#allocation2 + $0x78] sm:$0xff]  }
 0x231   : > { %8135 = vmatmul.mubr.bf16.gmra.mrb[28].mxu1 %v7221_v47  ;;  %v10114_v47 = vrot.slane %v5007_v4, 5 }
 0x232   : > { %8154 = vmatprep.mubr.bf16.mxu1 %v8877_v5  ;;  %v4996_v5 = vsel %vm9311_vm9, %v4991_v62, %v4995_v49 }
 0x233   : > { %v5014_v9 = vor.u32 %v5013_v25, %v10114_v47  ;;  %v10143_v61 = vcombine.low %v4986_v23, %v4996_v5  ;;  %v5065_v25 = vshll.u32 %v10148_v50, 16 }
 0x239   : > { %8155 = vmatmul.mubr.bf16.vlgmr.msra.gmra.mrb[0].mxu1 %v8879_v13  ;;  %v5005_v13 = vrot.slane %v5004_v37, 4 }
 0x23a   : > { %8187 = vmatpush3.bf16.msra.mxu1 %v10050_v3  ;;  %8158 = vmatprep.mubr.bf16.mxu1 %v8880_v22  ;;  %v8890_v3 = vld [vmem:[#allocation3 + $0x1e0] sm:$0xff]   ;;  %v5015_v22 = vrot.slane %v5014_v9, 4  ;;  %v5118_v9 = vshrl.u32 %v4943_v16, 16 }
 0x23b   : > { %8188 = vmatprep.subr.bf16.mxu1 %v8881_v35  ;;  %v5010_v27 = vsel %vm9311_vm9, %v5005_v13, %v10114_v47  ;;  %v5052_v47 = vor.u32 %v5051_v54, %v5048_v18 }
 0x23d   : > { %v10175_v43 = vrot.slane %v5052_v47, 4 }
 0x23e   : > { %8189 = vmatpush3.bf16.msra.mxu1 %v8881_v35  ;;  %v4937_v35 = vld [vmem:[#allocation2 + $0x48] sm:$0xf] }
 0x23f   : > { %8190 = vmatprep.subr.bf16.mxu1 %v8884_v41  ;;  %v5073_v21 = vshll.u32 %v4937_v35, 16 }
 0x241   : > { %8159 = vmatmul.mubr.bf16.gmra.mrb[4].mxu1 %v8882_v57  ;;  %v5055_v57 = vshll.u32 %v10126_v39, 16  ;;  %v5075_v0 = vrot.slane %v5073_v21, 5  ;;  %v5133_v21 = vrot.slane %v5131_v11, 4 }
 0x242   : > { %8162 = vmatprep.mubr.bf16.mxu1 %v8883_v10  ;;  %8191 = vmatpush3.bf16.msra.mxu1 %v8884_v41  ;;  %v5028_v41 = vor.u32 %v5027_v53, %v5024_v40  ;;  %v5019_v10 = vrot.slane %v5017_v14, 5  ;;  %v5121_v40 = vshll.u32 %v4943_v16, 16  ;;  %v10169_v53 = vrot.slane %v5103_v36, 5 }
 0x243   : > { %8192 = vmatprep.subr.bf16.mxu1 %v8887_v60  ;;  %v10154_v19 = vrot.slane %v5055_v57, 5  ;;  %v5127_v14 = vshll.u32 %v10160_v45, 16  ;;  %v5120_v57 = vrot.slane %v5118_v9, 4 }
 0x244   : > { %v5020_v55 = vsel %vm9311_vm9, %v5015_v22, %v5019_v10  ;;  %v5029_v48 = vrot.slane %v5028_v41, 4  ;;  %v10183_v41 = vld [vmem:[#allocation2 + $0x70] sm:$0xf]  ;;  %v5123_v23 = vrot.slane %v5121_v40, 5  ;;  %v5110_v54 = vor.u32 %v5109_v52, %v10169_v53 }
 0x245   : > { %v10164_v32 = vcombine.low %v5010_v27, %v5020_v55  ;;  %v4949_v27 = vld [vmem:[#allocation2 + $0x78] sm:$0xf]  ;;  %v5151_v55 = vshll.u32 %v10183_v41, 16 }
 0x246   : > { %8193 = vmatpush3.bf16.msra.mxu1 %v8887_v60  ;;  %v10132_v60 = vld [vmem:[#allocation2 + $0x4c] sm:$0xf]  ;;  %v5034_v49 = vsel %vm9311_vm9, %v5029_v48, %v10124_v59  ;;  %v10180_v59 = vld [vmem:[#allocation2 + $0x50] sm:$0x1]  ;;  %v5155_v48 = vshrl.u32 %v10183_v41, 16  ;;  %v5124_v47 = vor.u32 %v5123_v23, %v5120_v57  ;;  %v5169_v52 = vshll.u32 %v4949_v27, 16 }
 0x247   : > { %8194 = vmatprep.subr.bf16.mxu1 %v8890_v3  ;;  %v5079_v26 = vshll.u32 %v10132_v60, 16  ;;  %v5083_v4 = vshrl.u32 %v10132_v60, 16  ;;  %v10207_v9 = vrot.slane %v5151_v55, 5  ;;  %v10227_v23 = vld [vmem:[#allocation2 + $0x80] sm:$0x1] }
 0x248   : > { %v5157_v40 = vrot.slane %v5155_v48, 4 }
 0x249   : > { %8163 = vmatmul.mubr.bf16.gmra.mrb[8].mxu1 %v8885_v63  ;;  %v4940_v63 = vld [vmem:[#allocation2 + $0x54] sm:$0xf]  ;;  %v10162_v15 = vrot.slane %v5079_v26, 5 }
 0x24a   : > { %8166 = vmatprep.mubr.bf16.mxu1 %v8886_v56  ;;  %8195 = vmatpush3.bf16.msra.mxu1 %v8890_v3  ;;  %v5070_v3 = vshrl.u32 %v4937_v35, 16  ;;  %v5061_v56 = vrot.slane %v5059_v6, 4  ;;  %v5094_v62 = vshrl.u32 %v4940_v63, 16  ;;  %v5097_v37 = vshll.u32 %v4940_v63, 16  ;;  %v8894_v6 = vld [vmem:[#allocation2 + $0x9c] sm:$0xff]   ;;  %v8895_v63 = vld [vmem:[#allocation2 + $0xa8] sm:$0xff]  }
 0x24b   : > { %8196 = vmatprep.subr.bf16.mxu1 %v8893_v28 }
 0x24c   : > { %v5072_v46 = vrot.slane %v5070_v3, 4  ;;  %v5062_v17 = vor.u32 %v5061_v56, %v10154_v19  ;;  %v5096_v35 = vrot.slane %v5094_v62, 4  ;;  %v5099_v22 = vrot.slane %v5097_v37, 5  ;;  %v5685_v37 = vld [vmem:[#allocation2 + $0x60] sm:$0xe] }
 0x24d   : > { %v10190_v3 = vrot.slane %v5127_v14, 5  ;;  %v5166_v62 = vshrl.u32 %v4949_v27, 16 }
 0x24e   : > { %8197 = vmatpush3.bf16.msra.mxu1 %v8893_v28  ;;  %v5039_v28 = vrot.slane %v5038_v24, 4  ;;  %v5076_v5 = vor.u32 %v5075_v0, %v5072_v46  ;;  %v5063_v26 = vrot.slane %v5062_v17, 4  ;;  %v5100_v36 = vor.u32 %v5099_v22, %v5096_v35 }
 0x24f   : > { %8198 = vmatprep.subr.bf16.mxu1 %v8896_v58  ;;  %v5111_v0 = vrot.slane %v5110_v54, 4  ;;  %v10232_v54 = vrot.slane %v5169_v52, 5  ;;  %v5692_v52 = vld [vmem:[#allocation2 + $0xb4] sm:$0xe] }
 0x250   : > { %v5077_v56 = vrot.slane %v5076_v5, 4  ;;  %v5101_v11 = vrot.slane %v5100_v36, 4  ;;  %v10217_v5 = vrot.slane %v5124_v47, 4 }
 0x251   : > { %8167 = vmatmul.mubr.bf16.gmra.mrb[12].mxu1 %v8888_v8  ;;  %v4946_v8 = vld [vmem:[#allocation2 + $0x6c] sm:$0xf] }
 0x252   : > { %8170 = vmatprep.mubr.bf16.mxu1 %v8889_v51  ;;  %8199 = vmatpush3.bf16.msra.mxu1 %v8896_v58  ;;  %v5085_v58 = vrot.slane %v5083_v4, 4  ;;  %v10178_v51 = vrot.slane %v5065_v25, 5  ;;  %v5142_v10 = vshrl.u32 %v4946_v8, 16  ;;  %v5145_v24 = vshll.u32 %v4946_v8, 16 }
 0x253   : > { %8200 = vmatprep.subr.bf16.mxu1 %v8899_v44  ;;  %v5089_v4 = vshll.u32 %v10180_v59, 16  ;;  %v5115_v8 = vrot.slane %v5113_v38, 5  ;;  %v5082_v22 = vsel %vm9311_vm9, %v5077_v56, %v10162_v15  ;;  %v5106_v48 = vsel %vm9311_vm9, %v5101_v11, %v10169_v53  ;;  %v10257_v38 = vld [vmem:[#allocation2 + $0x90] sm:$0xf]  ;;  %v10353_v53 = vld [vmem:[#allocation2 + $0xac] sm:$0xf] }
 0x254   : > { %v5086_v13 = vor.u32 %v5085_v58, %v10162_v15  ;;  %v5144_v25 = vrot.slane %v5142_v10, 4  ;;  %v5147_v46 = vrot.slane %v5145_v24, 5  ;;  %v10203_v58 = vld [vmem:[#allocation2 + $0x74] sm:$0x1]  ;;  %v5068_v14 = vsel %vm9311_vm9, %v5063_v26, %v10178_v51  ;;  %v10236_v26 = vld [vmem:[#allocation2 + $0x84] sm:$0xf] }
 0x255   : > { %v5161_v35 = vshll.u32 %v10203_v58, 16  ;;  %v5116_v51 = vsel %vm9311_vm9, %v5111_v0, %v5115_v8  ;;  %v10229_v10 = vrot.slane %v5166_v62, 4  ;;  %v8897_v24 = vld [vmem:[#allocation2 + $0xb4] sm:$0xff]   ;;  %v8898_v15 = vld [vmem:[#allocation2 + $0xc0] sm:$0xff]   ;;  %v5762_v8 = vrot.slane %v10121_v42, 5 }
 0x256   : > { %8201 = vmatpush3.bf16.msra.mxu1 %v8899_v44  ;;  %v5044_v44 = vsel %vm9311_vm9, %v5039_v28, %v5043_v31  ;;  %v467_v31 = vld [vmem:[#allocation2 + $0xd4] sm:$0x1]  ;;  %v5058_v28 = vsel %vm9311_vm9, %v10175_v43, %v10154_v19  ;;  %v5087_v16 = vrot.slane %v5086_v13, 4  ;;  %v10213_v43 = vld [vmem:[#allocation2 + $0x7c] sm:$0xf]  ;;  %v5148_v13 = vor.u32 %v5147_v46, %v5144_v25 }
 0x257   : > { %8234 = vmatprep.subr.bf16.mxu1 %v10141_v20  ;;  %v10187_v18 = vcombine.low %v5034_v49, %v5044_v44  ;;  %v468_v19 = vsel %vm9267_vm6, 0, %v467_v31  ;;  %v5091_v49 = vrot.slane %v5089_v4, 5  ;;  %v5179_v27 = vshrl.u32 %v10213_v43, 16  ;;  %v10264_v25 = vld [vmem:[#allocation2 + $0x88] sm:$0xf] }
 0x258   : > { %469 = vst [vmem:[#allocation2 + $0xd4] sm:$0x1] %v468_v19  ;;  %v10238_v4 = vcombine.low %v5058_v28, %v5068_v14  ;;  %v10253_v36 = vrot.slane %v5148_v13, 4  ;;  %v10255_v28 = vrot.slane %v5161_v35, 5  ;;  %v10267_v0 = vld [vmem:[#allocation2 + $0x94] sm:$0xf] }
 0x259   : > { %8171 = vmatmul.mubr.bf16.gmra.mrb[16].mxu1 %v8891_v7  ;;  %v10200_v7 = vld [vmem:[#allocation2 + $0x68] sm:$0x1]  ;;  %v5092_v17 = vsel %vm9311_vm9, %v5087_v16, %v5091_v49  ;;  %v5681_v16 = vld [vmem:[#allocation2 + $0x30] sm:$0xe]  ;;  %v10276_v49 = vrot.slane %v5179_v27, 4  ;;  %v5773_v42 = vrot.slane %v10132_v60, 5 }
 0x25a   : > { %8174 = vmatprep.mubr.bf16.mxu1 %v8892_v30  ;;  %v5134_v30 = vor.u32 %v5133_v21, %v10190_v3  ;;  %v5137_v44 = vshll.u32 %v10200_v7, 16  ;;  %v5175_v21 = vshll.u32 %v10213_v43, 16  ;;  %v10240_v55 = vcombine.low %v5082_v22, %v5092_v17  ;;  %v8900_v17 = vld [vmem:[#allocation2 + $0xcc] sm:$0xff]   ;;  %v5691_v13 = vld [vmem:[#allocation2 + $0xa8] sm:$0xe] }
 0x25b   : > { %v7280_v14 = vrot.slane %v5681_v16, 9  ;;  %v5766_v22 = vrot.slane %v10126_v39, 5  ;;  %v5684_v39 = vld [vmem:[#allocation2 + $0x54] sm:$0xe]  ;;  %v5804_v27 = vrot.slane %v10227_v23, 5 }
 0x25c   : > { %v10225_v57 = vrot.slane %v5134_v30, 4  ;;  %v10245_v31 = vrot.slane %v5137_v44, 5  ;;  %v5759_v30 = vrot.slane %v10111_v2, 5  ;;  %v10274_v19 = vrot.slane %v5175_v21, 5  ;;  %v5682_v44 = vld [vmem:[#allocation2 + $0x3c] sm:$0xe] }
 0x25d   : > { %v5768_v47 = vrot.slane %v5766_v22, 4  ;;  %v5689_v56 = vld [vmem:[#allocation2 + $0x90] sm:$0xe]  ;;  %v8903_v21 = vld [vmem:[#allocation3 + $0x210] sm:$0xff]   ;;  %v10394_v2 = vld [vmem:[#allocation2 + $0xb8] sm:$0xf] }
 0x25e   : > { %v5761_v11 = vrot.slane %v5759_v30, 4 }
 0x261   : > { %8175 = vmatmul.mubr.bf16.gmra.mrb[20].mxu1 %v8894_v6  ;;  %v5158_v6 = vor.u32 %v5157_v40, %v10207_v9  ;;  %v5683_v40 = vld [vmem:[#allocation2 + $0x48] sm:$0xe] }
 0x262   : > { %8178 = vmatprep.mubr.bf16.mxu1 %v8895_v63  ;;  %v10247_v63 = vcombine.low %v5106_v48, %v5116_v51  ;;  %v7282_v48 = vrot.slane %v5683_v40, 9  ;;  %v5780_v40 = vrot.slane %v10139_v1, 5  ;;  %v10385_v51 = vld [vmem:[#allocation2 + $0xc4] sm:$0xf] }
 0x263   : > { %v10270_v62 = vrot.slane %v5158_v6, 4  ;;  %v10291_v6 = vsel %vm9907_vm2, %v5761_v11, %v5762_v8  ;;  %v5776_v8 = vrot.slane %v10180_v59, 5 }
 0x264   : > { %v10305_v60 = vsel %vm9907_vm2, %v7282_v48, %v5773_v42  ;;  %v5782_v1 = vrot.slane %v5780_v40, 4  ;;  %v7284_v48 = vrot.slane %v5685_v37, 9 }
 0x269   : > { %8179 = vmatmul.mubr.bf16.gmra.mrb[24].mxu1 %v8897_v24  ;;  %v10287_v24 = vsel %vm9907_vm2, %v7280_v14, %v5759_v30  ;;  %v5769_v30 = vrot.slane %v10148_v50, 5  ;;  %v5775_v14 = vrot.slane %v5773_v42, 4  ;;  %v10338_v42 = vld [vmem:[#allocation2 + $0x8c] sm:$0x1] }
 0x26a   : > { %8182 = vmatprep.mubr.bf16.mxu1 %v8898_v15  ;;  %v7281_v15 = vrot.slane %v5682_v44, 9  ;;  %v7283_v44 = vrot.slane %v5684_v39, 9  ;;  %v5687_v39 = vld [vmem:[#allocation2 + $0x78] sm:$0xe]  ;;  %v5811_v16 = vrot.slane %v10338_v42, 5 }
 0x26b   : > { %v10312_v50 = vsel %vm9907_vm2, %v5768_v47, %v5769_v30  ;;  %v10320_v59 = vsel %vm9907_vm2, %v5775_v14, %v5776_v8  ;;  %v5794_v8 = vrot.slane %v10183_v41, 5 }
 0x26c   : > { %v10301_v11 = vsel %vm9907_vm2, %v7281_v15, %v5766_v22  ;;  %v5787_v22 = vrot.slane %v10160_v45, 5  ;;  %v5686_v15 = vld [vmem:[#allocation2 + $0x6c] sm:$0xe]  ;;  %v10326_v47 = vsel %vm9907_vm2, %v7283_v44, %v5780_v40  ;;  %v5790_v45 = vrot.slane %v10200_v7, 5  ;;  %v10340_v40 = vld [vmem:[#allocation2 + $0x98] sm:$0x1] }
 0x26d   : > { %v7285_v37 = vrot.slane %v5686_v15, 9  ;;  %v5796_v15 = vrot.slane %v5794_v8, 4  ;;  %v11027_v12 = vcombine.low %v10305_v60, %v10320_v59 }
 0x26e   : > { %v10335_v14 = vsel %vm9907_vm2, %v7284_v48, %v5787_v22  ;;  %v7286_v48 = vrot.slane %v5687_v39, 9 }
 0x26f   : > { %v10357_v7 = vsel %vm9907_vm2, %v7285_v37, %v5794_v8  ;;  %v5815_v37 = vrot.slane %v10267_v0, 5  ;;  %v5690_v8 = vld [vmem:[#allocation2 + $0x9c] sm:$0xe] }
 0x270   : > { %11001 = vst [vmem:[#allocation11_spill] sm:$0xff] %v10357_v7  ;;  %v8904_v7 = vld [vmem:[#allocation3 + $0x218] sm:$0xff]  }
 0x271   : > { %8183 = vmatmul.mubr.bf16.gmra.mrb[28].mxu1 %v8900_v17  ;;  %v5783_v17 = vrot.slane %v10185_v34, 5  ;;  %v5789_v34 = vrot.slane %v5787_v22, 4  ;;  %v5801_v22 = vrot.slane %v10213_v43, 5  ;;  %v10361_v43 = vld [vmem:[#allocation2 + $0xa0] sm:$0xf]  ;;  %v5817_v35 = vrot.slane %v5815_v37, 4 }
 0x272   : > { %8202 = vmatprep.mubr.bf16.mxu1 %v10143_v61  ;;  %v5688_v61 = vld [vmem:[#allocation2 + $0x84] sm:$0xe] }
 0x273   : > { %v10331_v30 = vsel %vm9907_vm2, %v5782_v1, %v5783_v17  ;;  %v10346_v44 = vsel %vm9907_vm2, %v5789_v34, %v5790_v45  ;;  %v5797_v17 = vrot.slane %v10203_v58, 5  ;;  %v8902_v1 = vld [vmem:[#allocation3 + $0x208] sm:$0xff]   ;;  %v5803_v34 = vrot.slane %v5801_v22, 4 }
 0x274   : > { %11000 = vst [vmem:[#allocation12_spill] sm:$0xff] %v10346_v44  ;;  %v7287_v45 = vrot.slane %v5688_v61, 9  ;;  %v5808_v58 = vrot.slane %v10264_v25, 5  ;;  %v10369_v41 = vsel %vm9907_vm2, %v7286_v48, %v5801_v22  ;;  %v10377_v61 = vld [vmem:[#allocation2 + $0xb0] sm:$0x1]  ;;  %v7288_v48 = vrot.slane %v5689_v56, 9 }
 0x275   : > { %v10365_v39 = vsel %vm9907_vm2, %v5796_v15, %v5797_v17  ;;  %11003 = vst [vmem:[#allocation13_spill] sm:$0xff] %v10369_v41  ;;  %v10383_v22 = vsel %vm9907_vm2, %v5803_v34, %v5804_v27  ;;  %v5818_v17 = vrot.slane %v10340_v40, 5  ;;  %v7289_v34 = vrot.slane %v5690_v8, 9 }
 0x276   : > { %11002 = vst [vmem:[#allocation15_spill] sm:$0xff] %v10365_v39  ;;  %11004 = vst [vmem:[#allocation14_spill] sm:$0xff] %v10383_v22  ;;  %v5810_v15 = vrot.slane %v5808_v58, 4  ;;  %v10402_v27 = vsel %vm9907_vm2, %v7288_v48, %v5815_v37  ;;  %v5829_v37 = vrot.slane %v10353_v53, 5  ;;  %v7290_v48 = vrot.slane %v5691_v13, 9 }
 0x277   : > { %11007 = vst [vmem:[#allocation9_spill] sm:$0xff] %v10402_v27  ;;  %v10413_v22 = vsel %vm9907_vm2, %v5817_v35, %v5818_v17  ;;  %v5832_v41 = vrot.slane %v10377_v61, 5  ;;  %v5693_v39 = vld [vmem:[#allocation2 + $0xc0] sm:$0xe]  ;;  %v7291_v17 = vrot.slane %v5692_v52, 9  ;;  %v8905_v52 = vld [vmem:[#allocation3 + $0x220] sm:$0xff]  }
 0x278   : > { %v10398_v56 = vsel %vm9907_vm2, %v5810_v15, %v5811_v16  ;;  %11008 = vst [vmem:[#allocation10_spill] sm:$0xff] %v10413_v22  ;;  %v5831_v35 = vrot.slane %v5829_v37, 4  ;;  %v10431_v13 = vsel %vm9907_vm2, %v7290_v48, %v5829_v37  ;;  %v5843_v22 = vrot.slane %v10385_v51, 5  ;;  %v10445_v37 = vld [vmem:[#allocation2 + $0xd4] sm:$0x1] }
 0x279   : > { %8203 = vmatmul.mubr.bf16.vlgmr.msra.gmra.mrb[0].mxu1 %v10164_v32  ;;  %v10375_v32 = vld [vmem:[#allocation2 + $0xa4] sm:$0x1]  ;;  %11006 = vst [vmem:[#allocation16_spill] sm:$0xff] %v10398_v56  ;;  %v5836_v56 = vrot.slane %v10394_v2, 5 }
 0x27a   : > { %8235 = vmatpush3.bf16.msra.mxu1 %v10141_v20  ;;  %8206 = vmatprep.mubr.bf16.mxu1 %v10187_v18  ;;  %v10391_v18 = vsel %vm9907_vm2, %v7287_v45, %v5808_v58  ;;  %v5822_v20 = vrot.slane %v10361_v43, 5  ;;  %v10405_v45 = vld [vmem:[#allocation2 + $0xbc] sm:$0x1]  ;;  %v10407_v58 = vld [vmem:[#allocation2 + $0xc8] sm:$0x1]  ;;  %v5825_v16 = vrot.slane %v10375_v32, 5 }
 0x27b   : > { %8236 = vmatprep.subr.bf16.mxu1 %v8902_v1  ;;  %11005 = vst [vmem:[#allocation17_spill] sm:$0xff] %v10391_v18  ;;  %v5694_v18 = vld [vmem:[#allocation2 + $0xcc] sm:$0xe]  ;;  %v5839_v8 = vrot.slane %v10405_v45, 5  ;;  %v5846_v27 = vrot.slane %v10407_v58, 5  ;;  %v11029_v29 = vld [vmem:[#allocation12_spill] sm:$0xff] }
 0x27c   : > { %v5824_v15 = vrot.slane %v5822_v20, 4  ;;  %v10422_v46 = vsel %vm9907_vm2, %v7289_v34, %v5822_v20  ;;  %v10436_v20 = vld [vmem:[#allocation2 + $0xd0] sm:$0xf]  ;;  %v10442_v34 = vsel %vm9907_vm2, %v5831_v35, %v5832_v41  ;;  %v7293_v44 = vrot.slane %v5694_v18, 9 }
 0x27d   : > { %11009 = vst [vmem:[#allocation18_spill] sm:$0xff] %v10442_v34  ;;  %v10452_v41 = vsel %vm9907_vm2, %v7291_v17, %v5836_v56  ;;  %v11012_v35 = vshrl.u32 %v10236_v26, 16  ;;  %v11014_v18 = vshll.u32 %v10236_v26, 16  ;;  %v4958_v17 = vld [vmem:[#allocation2 + $0x9c] sm:$0xf]  ;;  %v11020_v26 = vshrl.u32 %v10267_v0, 16 }
 0x27e   : > { %8237 = vmatpush3.bf16.msra.mxu1 %v8902_v1  ;;  %v10427_v1 = vsel %vm9907_vm2, %v5824_v15, %v5825_v16  ;;  %v5838_v16 = vrot.slane %v5836_v56, 4  ;;  %v7292_v15 = vrot.slane %v5693_v39, 9  ;;  %11010 = vst [vmem:[#allocation19_spill] sm:$0xff] %v10452_v41 }
 0x27f   : > { %8238 = vmatprep.subr.bf16.mxu1 %v8903_v21  ;;  %v5192_v48 = vrot.slane %v11012_v35, 4 }
 0x280   : > { %v10456_v39 = vsel %vm9907_vm2, %v5838_v16, %v5839_v8  ;;  %v10466_v34 = vsel %vm9907_vm2, %v7292_v15, %v5843_v22  ;;  %v5182_v8 = vor.u32 %v10276_v49, %v10274_v19  ;;  %v11015_v15 = vshll.u32 %v10264_v25, 16 }
 0x281   : > { %8207 = vmatmul.mubr.bf16.gmra.mrb[4].mxu1 %v10238_v4  ;;  %v5845_v4 = vrot.slane %v5843_v22, 4  ;;  %11011 = vst [vmem:[#allocation20_spill] sm:$0xff] %v10456_v39  ;;  %v5195_v22 = vrot.slane %v11014_v18, 5  ;;  %v11017_v49 = vshrl.u32 %v10257_v38, 16  ;;  %v5229_v18 = vrot.slane %v11020_v26, 4 }
 0x282   : > { %8210 = vmatprep.mubr.bf16.mxu1 %v10240_v55  ;;  %8239 = vmatpush3.bf16.msra.mxu1 %v8903_v21  ;;  %v5850_v55 = vrot.slane %v10436_v20, 5  ;;  %v5853_v21 = vrot.slane %v10445_v37, 5  ;;  %v10484_v39 = vrot.slane %v11015_v15, 5  ;;  %v8906_v15 = vld [vmem:[#allocation3 + $0x228] sm:$0xff]   ;;  %v11024_v26 = vshll.u32 %v10227_v23, 16  ;;  %v8911_v23 = vld [vmem:[%s10933_s5 + $0x10] sm:$0xff]  }
 0x283   : > { %8240 = vmatprep.subr.bf16.mxu1 %v8904_v7  ;;  %v10470_v56 = vsel %vm9907_vm2, %v5845_v4, %v5846_v27  ;;  %v11016_v27 = vshrl.u32 %v10264_v25, 16  ;;  %v5216_v41 = vrot.slane %v11017_v49, 4 }
 0x284   : > { %11013 = vst [vmem:[#allocation21_spill] sm:$0xff] %v10470_v56  ;;  %v10478_v16 = vsel %vm9907_vm2, %v7293_v44, %v5850_v55  ;;  %v5852_v35 = vrot.slane %v5850_v55, 4  ;;  %v11018_v44 = vshll.u32 %v10257_v38, 16  ;;  %v11021_v38 = vsel %vm9311_vm9, %v10225_v57, %v10245_v31  ;;  %v8910_v57 = vld [vmem:[%s10933_s5 + $0x8] sm:$0xff]  }
 0x285   : > { %v5205_v4 = vrot.slane %v11016_v27, 4  ;;  %v8909_v27 = vld [vmem:[%s10933_s5] sm:$0xff]   ;;  %v5196_v31 = vor.u32 %v5195_v22, %v5192_v48  ;;  %v5251_v48 = vshrl.u32 %v10361_v43, 16 }
 0x286   : > { %8241 = vmatpush3.bf16.msra.mxu1 %v8904_v7  ;;  %v5219_v56 = vrot.slane %v11018_v44, 5  ;;  %v11019_v7 = vshll.u32 %v10267_v0, 16  ;;  %v10500_v25 = vsel %vm9907_vm2, %v5852_v35, %v5853_v21  ;;  %v11022_v0 = vsel %vm9311_vm9, %v10217_v5, %v10190_v3  ;;  %8282 = vmatprep.subr.bf16.mxu0 %v8909_v27 }
 0x287   : > { %8242 = vmatprep.subr.bf16.mxu1 %v8905_v52  ;;  %v7260_v49 = vcombine.low %v11022_v0, %v11021_v38  ;;  %v5164_v21 = vsel %vm9311_vm9, %v10270_v62, %v10255_v28  ;;  %v11023_v35 = vor.u32 %v10232_v54, %v10229_v10  ;;  %v5154_v3 = vsel %vm9311_vm9, %v10253_v36, %v10207_v9 }
 0x288   : > { %v10494_v55 = vrot.slane %v11019_v7, 5  ;;  %v7309_v7 = vcombine.low %v10478_v16, %v10500_v25  ;;  %v5183_v5 = vrot.slane %v5182_v8, 4  ;;  %v5206_v10 = vor.u32 %v5205_v4, %v10484_v39  ;;  %8283 = vmatpush3.bf16.msra.mxu0 %v8909_v27  ;;  %v4961_v8 = vld [vmem:[#allocation2 + $0xa8] sm:$0xf] }
 0x289   : > { %v5173_v44 = vrot.slane %v11023_v35, 4  ;;  %8211 = vmatmul.mubr.bf16.gmra.mrb[8].mxu1 %v10247_v63  ;;  %v5238_v54 = vshrl.u32 %v4958_v17, 16  ;;  %v5241_v28 = vshll.u32 %v4958_v17, 16  ;;  %v7261_v62 = vcombine.low %v5154_v3, %v5164_v21  ;;  %v8907_v35 = vld [vmem:[#allocation3 + $0x230] sm:$0xff]   ;;  %8284 = vmatprep.subr.bf16.mxu0 %v8910_v57 }
 0x28a   : > { %8214 = vmatprep.mubr.bf16.mxu1 %v7260_v49  ;;  %8243 = vmatpush3.bf16.msra.mxu1 %v8905_v52  ;;  %v5187_v38 = vrot.slane %v11024_v26, 5  ;;  %v5220_v0 = vor.u32 %v5219_v56, %v5216_v41  ;;  %v5230_v63 = vor.u32 %v5229_v18, %v10494_v55  ;;  %v5209_v36 = vshll.u32 %v10338_v42, 16 }
 0x28b   : > { %8244 = vmatprep.subr.bf16.mxu1 %v8906_v15  ;;  %v5178_v9 = vsel %vm9311_vm9, %v5173_v44, %v10274_v19  ;;  %v5247_v52 = vshll.u32 %v10361_v43, 16  ;;  %v5233_v56 = vshll.u32 %v10340_v40, 16  ;;  %v5271_v17 = vshll.u32 %v10353_v53, 16  ;;  %v8908_v44 = vld [vmem:[#allocation3 + $0x238] sm:$0xff]  }
 0x28c   : > { %v5188_v41 = vsel %vm9311_vm9, %v5183_v5, %v5187_v38  ;;  %v5275_v19 = vshrl.u32 %v10353_v53, 16  ;;  %v5197_v42 = vrot.slane %v5196_v31, 4  ;;  %v5207_v22 = vrot.slane %v5206_v10, 4  ;;  %8285 = vmatpush3.bf16.msra.mxu0 %v8910_v57  ;;  %v8912_v53 = vld [vmem:[%s10933_s5 + $0x18] sm:$0xff]  }
 0x28d   : > { %v5240_v4 = vrot.slane %v5238_v54, 4  ;;  %v5243_v18 = vrot.slane %v5241_v28, 5  ;;  %v5221_v43 = vrot.slane %v5220_v0, 4  ;;  %v5231_v27 = vrot.slane %v5230_v63, 4  ;;  %8286 = vmatprep.subr.bf16.mxu0 %v8911_v23  ;;  %v4964_v54 = vld [vmem:[#allocation2 + $0xb4] sm:$0xf] }
 0x28e   : > { %8245 = vmatpush3.bf16.msra.mxu1 %v8906_v15  ;;  %v5262_v49 = vshrl.u32 %v4961_v8, 16  ;;  %v5265_v21 = vshll.u32 %v4961_v8, 16  ;;  %v7262_v3 = vcombine.low %v5178_v9, %v5188_v41  ;;  %v5211_v5 = vrot.slane %v5209_v36, 5 }
 0x28f   : > { %8246 = vmatprep.subr.bf16.mxu1 %v8907_v35  ;;  %v10550_v26 = vrot.slane %v5247_v52, 5  ;;  %v5253_v40 = vrot.slane %v5251_v48, 4  ;;  %v5235_v31 = vrot.slane %v5233_v56, 5  ;;  %v10555_v15 = vrot.slane %v5271_v17, 5 }
 0x290   : > { %v5277_v10 = vrot.slane %v5275_v19, 4  ;;  %v5202_v57 = vsel %vm9311_vm9, %v5197_v42, %v10484_v39  ;;  %v5212_v28 = vsel %vm9311_vm9, %v5207_v22, %v5211_v5  ;;  %v5244_v38 = vor.u32 %v5243_v18, %v5240_v4  ;;  %8287 = vmatpush3.bf16.msra.mxu0 %v8911_v23 }
 0x291   : > { %8215 = vmatmul.mubr.bf16.gmra.mrb[12].mxu1 %v7261_v62  ;;  %v5257_v0 = vshll.u32 %v10375_v32, 16  ;;  %v5226_v62 = vsel %vm9311_vm9, %v5221_v43, %v10494_v55  ;;  %v5236_v63 = vsel %vm9311_vm9, %v5231_v27, %v5235_v31  ;;  %v5264_v9 = vrot.slane %v5262_v49, 4  ;;  %v4967_v32 = vld [vmem:[#allocation2 + $0xc0] sm:$0xf]  ;;  %8288 = vmatprep.subr.bf16.mxu0 %v8912_v53  ;;  %v4970_v27 = vld [vmem:[#allocation2 + $0xcc] sm:$0xf] }
 0x292   : > { %8218 = vmatprep.mubr.bf16.mxu1 %v7262_v3  ;;  %8247 = vmatpush3.bf16.msra.mxu1 %v8907_v35  ;;  %v5267_v36 = vrot.slane %v5265_v21, 5  ;;  %v5254_v39 = vor.u32 %v5253_v40, %v10550_v26  ;;  %v5286_v52 = vshrl.u32 %v4964_v54, 16  ;;  %v5295_v48 = vshll.u32 %v10394_v2, 16  ;;  %v8913_v55 = vld [vmem:[%s10933_s5 + $0x20] sm:$0xff]  }
 0x293   : > { %8248 = vmatprep.subr.bf16.mxu1 %v8908_v44  ;;  %v5299_v8 = vshrl.u32 %v10394_v2, 16  ;;  %v5278_v35 = vor.u32 %v5277_v10, %v10555_v15  ;;  %v5289_v41 = vshll.u32 %v4964_v54, 16  ;;  %v5319_v56 = vshll.u32 %v10385_v51, 16 }
 0x294   : > { %v5323_v23 = vshrl.u32 %v10385_v51, 16  ;;  %v7263_v17 = vcombine.low %v5202_v57, %v5212_v28  ;;  %v7264_v19 = vcombine.low %v5226_v62, %v5236_v63  ;;  %v5245_v42 = vrot.slane %v5244_v38, 4  ;;  %8289 = vmatpush3.bf16.msra.mxu0 %v8912_v53  ;;  %v8914_v51 = vld [vmem:[%s10933_s5 + $0x28] sm:$0xff]  }
 0x295   : > { %v5259_v22 = vrot.slane %v5257_v0, 5  ;;  %v5268_v4 = vor.u32 %v5267_v36, %v5264_v9  ;;  %v5281_v2 = vshll.u32 %v10377_v61, 16  ;;  %v5310_v18 = vshrl.u32 %v4967_v32, 16  ;;  %8290 = vmatprep.subr.bf16.mxu0 %v8913_v55 }
 0x296   : > { %8249 = vmatpush3.bf16.msra.mxu1 %v8908_v44  ;;  %v5313_v43 = vshll.u32 %v4967_v32, 16  ;;  %v5255_v49 = vrot.slane %v5254_v39, 4  ;;  %v5288_v21 = vrot.slane %v5286_v52, 4  ;;  %v5297_v3 = vrot.slane %v5295_v48, 5  ;;  %v8915_v39 = vld [vmem:[%s10933_s5 + $0x30] sm:$0xff]  }
 0x297   : > { %v5301_v5 = vrot.slane %v5299_v8, 4  ;;  %v5279_v40 = vrot.slane %v5278_v35, 4  ;;  %v5291_v31 = vrot.slane %v5289_v41, 5  ;;  %v5321_v44 = vrot.slane %v5319_v56, 5 }
 0x298   : > { %v5325_v10 = vrot.slane %v5323_v23, 4  ;;  %v5334_v61 = vshrl.u32 %v4970_v27, 16  ;;  %v5337_v54 = vshll.u32 %v4970_v27, 16  ;;  %v5343_v57 = vshll.u32 %v10436_v20, 16  ;;  %8291 = vmatpush3.bf16.msra.mxu0 %v8913_v55 }
 0x299   : > { %8219 = vmatmul.mubr.bf16.gmra.mrb[16].mxu1 %v7263_v17  ;;  %v5347_v53 = vshrl.u32 %v10436_v20, 16  ;;  %v5269_v28 = vrot.slane %v5268_v4, 4  ;;  %v5283_v38 = vrot.slane %v5281_v2, 5  ;;  %v5312_v0 = vrot.slane %v5310_v18, 4  ;;  %8292 = vmatprep.subr.bf16.mxu0 %v8914_v51 }
 0x29a   : > { %8222 = vmatprep.mubr.bf16.mxu1 %v7264_v19  ;;  %v5315_v62 = vrot.slane %v5313_v43, 5  ;;  %v5250_v63 = vsel %vm9311_vm9, %v5245_v42, %v10550_v26  ;;  %v5260_v9 = vsel %vm9311_vm9, %v5255_v49, %v5259_v22  ;;  %v5302_v36 = vor.u32 %v5301_v5, %v5297_v3 }
 0x29b   : > { %v5284_v20 = vsel %vm9311_vm9, %v5279_v40, %v5283_v38  ;;  %v5292_v52 = vor.u32 %v5291_v31, %v5288_v21  ;;  %v5305_v48 = vshll.u32 %v10405_v45, 16  ;;  %v5326_v8 = vor.u32 %v5325_v10, %v5321_v44  ;;  %v8959_v21 = vld [vmem:[#allocation2 + $0x1c] sm:$0xf]  ;;  %v5679_v38 = vld [vmem:[#allocation2 + $0x18] sm:$0xe] }
 0x29c   : > { %v5336_v32 = vrot.slane %v5334_v61, 4  ;;  %v5339_v55 = vrot.slane %v5337_v54, 5  ;;  %v5345_v35 = vrot.slane %v5343_v57, 5  ;;  %v5349_v26 = vrot.slane %v5347_v53, 4  ;;  %8293 = vmatpush3.bf16.msra.mxu0 %v8914_v51 }
 0x29d   : > { %v7265_v41 = vcombine.low %v5250_v63, %v5260_v9  ;;  %v5274_v56 = vsel %vm9311_vm9, %v5269_v28, %v10555_v15  ;;  %v5316_v23 = vor.u32 %v5315_v62, %v5312_v0  ;;  %v5329_v17 = vshll.u32 %v10407_v58, 16  ;;  %8294 = vmatprep.subr.bf16.mxu0 %v8915_v39  ;;  %v8960_v0 = vld [vmem:[#allocation2 + $0x20] sm:$0x1]  ;;  %v8961_v62 = vld [vmem:[#allocation2 + $0x28] sm:$0xf] }
 0x29e   : > { %v7266_v19 = vcombine.low %v5274_v56, %v5284_v20  ;;  %v5303_v42 = vrot.slane %v5302_v36, 4  ;;  %v5307_v22 = vrot.slane %v5305_v48, 5  ;;  %v5327_v45 = vrot.slane %v5326_v8, 4  ;;  %v5680_v48 = vld [vmem:[#allocation2 + $0x24] sm:$0xe] }
 0x29f   : > { %v5293_v4 = vrot.slane %v5292_v52, 4  ;;  %v5340_v2 = vor.u32 %v5339_v55, %v5336_v32  ;;  %v5350_v18 = vor.u32 %v5349_v26, %v5345_v35  ;;  %v5353_v43 = vshll.u32 %v10445_v37, 16 }
 0x2a0   : > { %v5317_v27 = vrot.slane %v5316_v23, 4  ;;  %v5331_v49 = vrot.slane %v5329_v17, 5  ;;  %8295 = vmatpush3.bf16.msra.mxu0 %v8915_v39  ;;  %v5308_v15 = vsel %vm9311_vm9, %v5303_v42, %v5307_v22  ;;  %v5745_v5 = vrot.slane %v8959_v21, 5  ;;  %v11031_v42 = vld [vmem:[#allocation11_spill] sm:$0xff] }
 0x2a1   : > { %8223 = vmatmul.mubr.bf16.gmra.mrb[20].mxu1 %v7265_v41  ;;  %v5298_v51 = vsel %vm9311_vm9, %v5293_v4, %v5297_v3  ;;  %v5341_v40 = vrot.slane %v5340_v2, 4  ;;  %v5351_v31 = vrot.slane %v5350_v18, 4  ;;  %v5355_v10 = vrot.slane %v5353_v43, 5  ;;  %v11032_v22 = vld [vmem:[#allocation15_spill] sm:$0xff]  ;;  %v11038_v2 = vld [vmem:[#allocation16_spill] sm:$0xff]  ;;  %v11040_v43 = vld [vmem:[#allocation9_spill] sm:$0xff] }
 0x2a2   : > { %8226 = vmatprep.mubr.bf16.mxu1 %v7266_v19  ;;  %v5332_v58 = vsel %vm9311_vm9, %v5327_v45, %v5331_v49  ;;  %v7267_v61 = vcombine.low %v5298_v51, %v5308_v15  ;;  %v5322_v37 = vsel %vm9311_vm9, %v5317_v27, %v5321_v44  ;;  %v5747_v57 = vrot.slane %v5745_v5, 4  ;;  %v11035_v45 = vld [vmem:[#allocation14_spill] sm:$0xff] }
 0x2a3   : > { %v7268_v54 = vcombine.low %v5322_v37, %v5332_v58  ;;  %v5346_v53 = vsel %vm9311_vm9, %v5341_v40, %v5345_v35  ;;  %v5356_v28 = vsel %vm9311_vm9, %v5351_v31, %v5355_v10  ;;  %v5748_v3 = vrot.slane %v8960_v0, 5  ;;  %v11041_v27 = vld [vmem:[#allocation10_spill] sm:$0xff] }
 0x2a4   : > { %v5752_v63 = vrot.slane %v8961_v62, 5  ;;  %v7269_v9 = vcombine.low %v5346_v53, %v5356_v28  ;;  %v7278_v36 = vrot.slane %v5679_v38, 9  ;;  %v7279_v8 = vrot.slane %v5680_v48, 9  ;;  %v11044_v40 = vld [vmem:[#allocation18_spill] sm:$0xff]  ;;  %v11047_v53 = vld [vmem:[#allocation20_spill] sm:$0xff]  ;;  %v11049_v38 = vld [vmem:[#allocation21_spill] sm:$0xff] }
 0x2a5   : > { %v5749_v44 = vsel %vm9907_vm2, %v5747_v57, %v5748_v3  ;;  %v11025_v26 = vcombine.low %v10287_v24, %v10291_v6  ;;  %v11026_v41 = vcombine.low %v10301_v11, %v10312_v50  ;;  %v11028_v56 = vcombine.low %v10326_v47, %v10331_v30  ;;  %v11034_v50 = vld [vmem:[#allocation13_spill] sm:$0xff]  ;;  %v11046_v57 = vld [vmem:[#allocation19_spill] sm:$0xff] }
 0x2a6   : > { %v5746_v39 = vsel %vm9907_vm2, %v7278_v36, %v5745_v5  ;;  %v5754_v52 = vrot.slane %v5752_v63, 4  ;;  %v5753_v55 = vsel %vm9907_vm2, %v7279_v8, %v5752_v63  ;;  %v11030_v23 = vcombine.low %v10335_v14, %v11029_v29  ;;  %v11037_v14 = vld [vmem:[#allocation17_spill] sm:$0xff] }
 0x2a7   : > { %v7294_v20 = vcombine.low %v5746_v39, %v5749_v44  ;;  %v11033_v11 = vcombine.low %v11031_v42, %v11032_v22  ;;  %v11036_v60 = vcombine.low %v11034_v50, %v11035_v45  ;;  %v11039_v18 = vcombine.low %v11037_v14, %v11038_v2  ;;  %v8916_v48 = vld [vmem:[%s10933_s5 + $0x38] sm:$0xff]  }
 0x2a8   : > { %v5756_v32 = vsel %vm9907_vm2, %v5754_v52, %v5755_v33  ;;  %v11042_v49 = vcombine.low %v11040_v43, %v11041_v27  ;;  %v11043_v51 = vcombine.low %v10422_v46, %v10427_v1  ;;  %v11045_v31 = vcombine.low %v10431_v13, %v11044_v40  ;;  %8296 = vmatprep.subr.bf16.mxu0 %v8916_v48  ;;  %v6496_v33 = vld [vmem:[%s10935_s7] sm:$0x3] }
 0x2a9   : > { %8227 = vmatmul.mubr.bf16.gmra.mrb[24].mxu1 %v7267_v61  ;;  %v7295_v35 = vcombine.low %v5753_v55, %v5756_v32  ;;  %v11048_v28 = vcombine.low %v11046_v57, %v11047_v53  ;;  %v11050_v46 = vcombine.low %v10466_v34, %v11049_v38  ;;  %8297 = vmatpush3.bf16.msra.mxu0 %v8916_v48  ;;  %v10724_v32 = vld [vmem:[%s10932_s4] ss:$0 sm:$0xff]  ;;  %v6505_v40 = vsel %vm639_vm0, %v6496_v33, 0 }
 0x2aa   : > { %8230 = vmatprep.mubr.bf16.mxu1 %v7268_v54  ;;  %8717 = vmatprep.subr.msk.bf16.mxu0 %vm639_vm0, %v6496_v33 }
 0x2b1   : > { %8231 = vmatmul.mubr.bf16.gmra.mrb[28].mxu1 %v7269_v9 }
 0x2b2   : > { %8250 = vmatprep.mubr.bf16.mxu1 %v7294_v20 }
 0x2b9   : > { %8251 = vmatmul.mubr.bf16.vlgmr.msra.gmra.mrb[0].mxu1 %v7295_v35 }
 0x2ba   : > { %8254 = vmatprep.mubr.bf16.mxu1 %v11025_v26 }
 0x2c1   : > { %8255 = vmatmul.mubr.bf16.gmra.mrb[4].mxu1 %v11026_v41 }
 0x2c2   : > { %8258 = vmatprep.mubr.bf16.mxu1 %v11027_v12 }
 0x2c9   : > { %8259 = vmatmul.mubr.bf16.gmra.mrb[8].mxu1 %v11028_v56 }
 0x2ca   : > { %8262 = vmatprep.mubr.bf16.mxu1 %v11030_v23 }
 0x2cb   : > { %v7964_v17 = vpop.f32.mrb[32].mxu0 }
 0x2cc   : > { %v2741_v19 = vpop.f32.mrb[33].mxu0 }
 0x2cd   : > { %v7965_v24 = vpop.f32.mrb[34].mxu0 }
 0x2ce   : > { %v2744_v6 = vpop.f32.mrb[35].mxu0 }
 0x2d1   : > { %8263 = vmatmul.mubr.bf16.gmra.mrb[12].mxu1 %v11033_v11 }
 0x2d2   : > { %8266 = vmatprep.mubr.bf16.mxu1 %v11036_v60 }
 0x2d3   : > { %v7968_v59 = vpop.f32.mrb[36].mxu0 }
 0x2d4   : > { %v2757_v4 = vpop.f32.mrb[37].mxu0 }
 0x2d5   : > { %v10641_v47 = vpop.f32.mrb[38].mxu0 }
 0x2d6   : > { %v10643_v30 = vpop.f32.mrb[39].mxu0 }
 0x2d9   : > { %8267 = vmatmul.mubr.bf16.gmra.mrb[16].mxu1 %v11039_v18 }
 0x2da   : > { %8270 = vmatprep.mubr.bf16.mxu1 %v11042_v49 }
 0x2db   : > { %v10651_v15 = vpop.f32.mrb[40].mxu0 }
 0x2dc   : > { %v10653_v58 = vpop.f32.mrb[41].mxu0 }
 0x2dd   : > { %v10655_v21 = vpop.f32.mrb[42].mxu0 }
 0x2de   : > { %v10657_v5 = vpop.f32.mrb[43].mxu0 }
 0x2e1   : > { %8271 = vmatmul.mubr.bf16.gmra.mrb[20].mxu1 %v11043_v51 }
 0x2e2   : > { %8274 = vmatprep.mubr.bf16.mxu1 %v11045_v31 }
 0x2e3   : > { %v10665_v10 = vpop.f32.mrb[44].mxu0 }
 0x2e4   : > { %v10667_v61 = vpop.f32.mrb[45].mxu0 }
 0x2e5   : > { %v10669_v37 = vpop.f32.mrb[46].mxu0 }
 0x2e6   : > { %v10671_v54 = vpop.f32.mrb[47].mxu0 }
 0x2e9   : > { %8275 = vmatmul.mubr.bf16.gmra.mrb[24].mxu1 %v11048_v28 }
 0x2ea   : > { %8278 = vmatprep.mubr.bf16.mxu1 %v11050_v46 }
 0x2eb   : > { %v10679_v1 = vpop.f32.mrb[48].mxu0 }
 0x2ec   : > { %v10681_v13 = vpop.f32.mrb[49].mxu0 }
 0x2ed   : > { %v10683_v0 = vpop.f32.mrb[50].mxu0 }
 0x2ee   : > { %v10685_v3 = vpop.f32.mrb[51].mxu0 }
 0x2f1   : > { %8279 = vmatmul.mubr.bf16.gmra.mrb[28].mxu1 %v7309_v7 }
 0x2f3   : > { %v10690_v62 = vpop.f32.mrb[52].mxu0 }
 0x2f4   : > { %v10692_v63 = vpop.f32.mrb[53].mxu0 }
 0x2f5   : > { %v10694_v9 = vpop.f32.mrb[54].mxu0 }
 0x2f6   : > { %v10696_v34 = vpop.f32.mrb[55].mxu0 }
 0x2fb   : > { %v10698_v36 = vpop.f32.mrb[56].mxu0 }
 0x2fc   : > { %v10700_v44 = vpop.f32.mrb[57].mxu0 }
 0x2fd   : > { %v10702_v39 = vpop.f32.mrb[58].mxu0 }
 0x2fe   : > { %v10704_v20 = vpop.f32.mrb[59].mxu0 }
 0x303   : > { %v10706_v52 = vpop.f32.mrb[60].mxu0 }
 0x304   : > { %v10708_v16 = vpop.f32.mrb[61].mxu0 }
 0x305   : > { %v10710_v25 = vpop.f32.mrb[62].mxu0 }
 0x306   : > { %v10712_v7 = vpop.f32.mrb[63].mxu0 }
 0x38c   : > { %v8252_v8 = vpop.f32.mrb[0].mxu1 }
 0x38d   : > { %v8364_v55 = vadd.f32 %v8252_v8, %v7964_v17  ;;  %v6018_v35 = vpop.f32.mrb[1].mxu1 }
 0x38e   : > { %v8365_v26 = vadd.f32 %v6018_v35, %v2741_v19  ;;  %v8253_v41 = vpop.f32.mrb[2].mxu1 }
 0x38f   : > { %v6186_v12 = vadd.f32 %v8364_v55, %v10724_v32  ;;  %v8366_v56 = vadd.f32 %v8253_v41, %v7965_v24  ;;  %v6021_v29 = vpop.f32.mrb[3].mxu1 }
 0x390   : > { %v6184_v23 = vadd.f32 %v8365_v26, %v10724_v32  ;;  %v8367_v42 = vadd.f32 %v6021_v29, %v2744_v6 }
 0x391   : > { %v6187_v22 = vadd.f32 %v8366_v56, %v10724_v32  ;;  %v6218_v50 = vmax.f32 %v6186_v12, 0.0 }
 0x392   : > { %v6185_v11 = vadd.f32 %v8367_v42, %v10724_v32  ;;  %v6216_v60 = vmax.f32 %v6184_v23, 0.0 }
 0x393   : > { %v6219_v45 = vmax.f32 %v6187_v22, 0.0 }
 0x394   : > { %v6217_v14 = vmax.f32 %v6185_v11, 0.0  ;;  %v8256_v2 = vpop.f32.mrb[4].mxu1 }
 0x395   : > { %v6249_v17 = vpack.c.bf16 %v6219_v45, %v6218_v50  ;;  %v8368_v18 = vadd.f32 %v8256_v2, %v7968_v59  ;;  %v6034_v19 = vpop.f32.mrb[5].mxu1 }
 0x396   : > { %v8369_v43 = vadd.f32 %v6034_v19, %v2757_v4  ;;  %v8257_v27 = vpop.f32.mrb[6].mxu1  ;;  %v6248_v49 = vpack.c.bf16 %v6217_v14, %v6216_v60 }
 0x397   : > { %v6190_v24 = vadd.f32 %v8368_v18, %v10724_v32  ;;  %v8370_v51 = vadd.f32 %v8257_v27, %v10641_v47  ;;  %v6037_v6 = vpop.f32.mrb[7].mxu1 }
 0x398   : > { %v6188_v31 = vadd.f32 %v8369_v43, %v10724_v32  ;;  %v8371_v57 = vadd.f32 %v6037_v6, %v10643_v30  ;;  %8298 = vmatprep.mubr.bf16.mxu0 %v6248_v49 }
 0x399   : > { %v6191_v53 = vadd.f32 %v8370_v51, %v10724_v32  ;;  %8299 = vmatmul.mubr.bf16.vlgmr.msra.gmra.mrb[64].mxu0 %v6249_v17  ;;  %v6222_v4 = vmax.f32 %v6190_v24, 0.0 }
 0x39a   : > { %v6189_v59 = vadd.f32 %v8371_v57, %v10724_v32  ;;  %8331 = vmatpush3.bf16.msra.mxu0 %v6505_v40  ;;  %v6220_v38 = vmax.f32 %v6188_v31, 0.0 }
 0x39b   : > { %v6223_v28 = vmax.f32 %v6191_v53, 0.0 }
 0x39c   : > { %v6221_v46 = vmax.f32 %v6189_v59, 0.0  ;;  %v8260_v48 = vpop.f32.mrb[8].mxu1 }
 0x39d   : > { %v8372_v47 = vadd.f32 %v8260_v48, %v10651_v15  ;;  %v6050_v8 = vpop.f32.mrb[9].mxu1  ;;  %v6251_v33 = vpack.c.bf16 %v6223_v28, %v6222_v4 }
 0x39e   : > { %v8373_v55 = vadd.f32 %v6050_v8, %v10653_v58  ;;  %v8261_v35 = vpop.f32.mrb[10].mxu1  ;;  %v6250_v30 = vpack.c.bf16 %v6221_v46, %v6220_v38 }
 0x39f   : > { %v6194_v26 = vadd.f32 %v8372_v47, %v10724_v32  ;;  %v8374_v41 = vadd.f32 %v8261_v35, %v10655_v21  ;;  %v6053_v12 = vpop.f32.mrb[11].mxu1 }
 0x3a0   : > { %v6192_v56 = vadd.f32 %v8373_v55, %v10724_v32  ;;  %v8375_v29 = vadd.f32 %v6053_v12, %v10657_v5  ;;  %8302 = vmatprep.mubr.bf16.mxu0 %v6250_v30 }
 0x3a1   : > { %v6195_v23 = vadd.f32 %v8374_v41, %v10724_v32  ;;  %8303 = vmatmul.mubr.bf16.gmra.mrb[68].mxu0 %v6251_v33  ;;  %v6226_v42 = vmax.f32 %v6194_v26, 0.0 }
 0x3a2   : > { %v6193_v15 = vadd.f32 %v8375_v29, %v10724_v32  ;;  %v6224_v58 = vmax.f32 %v6192_v56, 0.0 }
 0x3a3   : > { %v6227_v22 = vmax.f32 %v6195_v23, 0.0 }
 0x3a4   : > { %v6225_v11 = vmax.f32 %v6193_v15, 0.0  ;;  %v8264_v50 = vpop.f32.mrb[12].mxu1 }
 0x3a5   : > { %v8376_v45 = vadd.f32 %v8264_v50, %v10665_v10  ;;  %v6066_v60 = vpop.f32.mrb[13].mxu1  ;;  %v6253_v21 = vpack.c.bf16 %v6227_v22, %v6226_v42 }
 0x3a6   : > { %v8377_v14 = vadd.f32 %v6066_v60, %v10667_v61  ;;  %v8265_v2 = vpop.f32.mrb[14].mxu1  ;;  %v6252_v17 = vpack.c.bf16 %v6225_v11, %v6224_v58 }
 0x3a7   : > { %v6198_v5 = vadd.f32 %v8376_v45, %v10724_v32  ;;  %v8378_v18 = vadd.f32 %v8265_v2, %v10669_v37  ;;  %v6069_v19 = vpop.f32.mrb[15].mxu1 }
 0x3a8   : > { %v6196_v43 = vadd.f32 %v8377_v14, %v10724_v32  ;;  %v8379_v27 = vadd.f32 %v6069_v19, %v10671_v54  ;;  %8306 = vmatprep.mubr.bf16.mxu0 %v6252_v17 }
 0x3a9   : > { %v6199_v49 = vadd.f32 %v8378_v18, %v10724_v32  ;;  %8307 = vmatmul.mubr.bf16.gmra.mrb[72].mxu0 %v6253_v21  ;;  %v6230_v24 = vmax.f32 %v6198_v5, 0.0 }
 0x3aa   : > { %v6197_v10 = vadd.f32 %v8379_v27, %v10724_v32  ;;  %v6228_v61 = vmax.f32 %v6196_v43, 0.0 }
 0x3ab   : > { %v6231_v51 = vmax.f32 %v6199_v49, 0.0 }
 0x3ac   : > { %v6229_v6 = vmax.f32 %v6197_v10, 0.0  ;;  %v8268_v40 = vpop.f32.mrb[16].mxu1 }
 0x3ad   : > { %v8380_v31 = vadd.f32 %v8268_v40, %v10679_v1  ;;  %v6082_v57 = vpop.f32.mrb[17].mxu1  ;;  %v6255_v37 = vpack.c.bf16 %v6231_v51, %v6230_v24 }
 0x3ae   : > { %v8381_v53 = vadd.f32 %v6082_v57, %v10681_v13  ;;  %v8269_v59 = vpop.f32.mrb[18].mxu1  ;;  %v6254_v4 = vpack.c.bf16 %v6229_v6, %v6228_v61 }
 0x3af   : > { %v6202_v54 = vadd.f32 %v8380_v31, %v10724_v32  ;;  %v8382_v28 = vadd.f32 %v8269_v59, %v10683_v0  ;;  %v6085_v38 = vpop.f32.mrb[19].mxu1 }
 0x3b0   : > { %v6200_v46 = vadd.f32 %v8381_v53, %v10724_v32  ;;  %v8383_v48 = vadd.f32 %v6085_v38, %v10685_v3  ;;  %8310 = vmatprep.mubr.bf16.mxu0 %v6254_v4 }
 0x3b1   : > { %v6203_v47 = vadd.f32 %v8382_v28, %v10724_v32  ;;  %8311 = vmatmul.mubr.bf16.gmra.mrb[76].mxu0 %v6255_v37  ;;  %v6234_v8 = vmax.f32 %v6202_v54, 0.0 }
 0x3b2   : > { %v6201_v1 = vadd.f32 %v8383_v48, %v10724_v32  ;;  %v6232_v13 = vmax.f32 %v6200_v46, 0.0 }
 0x3b3   : > { %v6235_v33 = vmax.f32 %v6203_v47, 0.0  ;;  %v8963_v47 = vld [vmem:[%s9218_s16 + $0x8] sm:$0xff]  }
 0x3b4   : > { %v6233_v55 = vmax.f32 %v6201_v1, 0.0  ;;  %v8272_v35 = vpop.f32.mrb[20].mxu1  ;;  %v8965_v1 = vld [vmem:[%s9218_s16 + $0x18] sm:$0xff]  }
 0x3b5   : > { %v8384_v30 = vadd.f32 %v8272_v35, %v10690_v62  ;;  %v6098_v26 = vpop.f32.mrb[21].mxu1  ;;  %v6257_v0 = vpack.c.bf16 %v6235_v33, %v6234_v8  ;;  %v8966_v8 = vld [vmem:[%s9218_s16 + $0x20] sm:$0xff]   ;;  %v8967_v33 = vld [vmem:[%s9218_s16 + $0x28] sm:$0xff]  }
 0x3b6   : > { %v8385_v41 = vadd.f32 %v6098_v26, %v10692_v63  ;;  %v8273_v12 = vpop.f32.mrb[22].mxu1  ;;  %v6256_v56 = vpack.c.bf16 %v6233_v55, %v6232_v13  ;;  %v8968_v13 = vld [vmem:[%s9218_s16 + $0x30] sm:$0xff]   ;;  %v8969_v55 = vld [vmem:[%s9218_s16 + $0x38] sm:$0xff]   ;;  %v8970_v35 = vld [vmem:[%s9218_s16 + $0x40] sm:$0xff]  }
 0x3b7   : > { %v6206_v3 = vadd.f32 %v8384_v30, %v10724_v32  ;;  %v8386_v29 = vadd.f32 %v8273_v12, %v10694_v9  ;;  %v6101_v23 = vpop.f32.mrb[23].mxu1  ;;  %v8971_v30 = vld [vmem:[%s9218_s16 + $0x48] sm:$0xff]   ;;  %v8972_v26 = vld [vmem:[%s9218_s16 + $0x50] sm:$0xff]  }
 0x3b8   : > { %v6204_v15 = vadd.f32 %v8385_v41, %v10724_v32  ;;  %v8387_v42 = vadd.f32 %v6101_v23, %v10696_v34  ;;  %8314 = vmatprep.mubr.bf16.mxu0 %v6256_v56  ;;  %v8974_v41 = vld [vmem:[%s9218_s16 + $0x60] sm:$0xff]   ;;  %v8975_v12 = vld [vmem:[%s9218_s16 + $0x68] sm:$0xff]   ;;  %v8976_v56 = vld [vmem:[%s9218_s16 + $0x70] sm:$0xff]  }
 0x3b9   : > { %v6207_v22 = vadd.f32 %v8386_v29, %v10724_v32  ;;  %8315 = vmatmul.mubr.bf16.gmra.mrb[80].mxu0 %v6257_v0  ;;  %v6238_v58 = vmax.f32 %v6206_v3, 0.0  ;;  %v8973_v0 = vld [vmem:[%s9218_s16 + $0x58] sm:$0xff]   ;;  %v7319_v29 = vld [vmem:[%s10934_s6] ss:$0 sm:$0xff] }
 0x3ba   : > { %v6205_v62 = vadd.f32 %v8387_v42, %v10724_v32  ;;  %v6236_v63 = vmax.f32 %v6204_v15, 0.0  ;;  %v8977_v3 = vld [vmem:[%s9218_s16 + $0x78] sm:$0xff]   ;;  %v7328_v23 = vld [vmem:[%s10936_s8] ss:$0 sm:$0xff] }
 0x3bb   : > { %v6239_v11 = vmax.f32 %v6207_v22, 0.0  ;;  %v10823_v15 = vadd.f32 %v7328_v23, %v7319_v29 }
 0x3bc   : > { %v6237_v50 = vmax.f32 %v6205_v62, 0.0  ;;  %v8276_v45 = vpop.f32.mrb[24].mxu1 }
 0x3bd   : > { %v8388_v60 = vadd.f32 %v8276_v45, %v10698_v36  ;;  %v6114_v21 = vpop.f32.mrb[25].mxu1  ;;  %v6259_v9 = vpack.c.bf16 %v6239_v11, %v6238_v58 }
 0x3be   : > { %v8389_v14 = vadd.f32 %v6114_v21, %v10700_v44  ;;  %v8277_v2 = vpop.f32.mrb[26].mxu1  ;;  %v6258_v17 = vpack.c.bf16 %v6237_v50, %v6236_v63 }
 0x3bf   : > { %v6210_v34 = vadd.f32 %v8388_v60, %v10724_v32  ;;  %v8390_v5 = vadd.f32 %v8277_v2, %v10702_v39  ;;  %v6117_v18 = vpop.f32.mrb[27].mxu1 }
 0x3c0   : > { %v6208_v19 = vadd.f32 %v8389_v14, %v10724_v32  ;;  %v8391_v43 = vadd.f32 %v6117_v18, %v10704_v20  ;;  %8318 = vmatprep.mubr.bf16.mxu0 %v6258_v17 }
 0x3c1   : > { %v6211_v27 = vadd.f32 %v8390_v5, %v10724_v32  ;;  %8319 = vmatmul.mubr.bf16.gmra.mrb[84].mxu0 %v6259_v9  ;;  %v6242_v49 = vmax.f32 %v6210_v34, 0.0 }
 0x3c2   : > { %v6209_v36 = vadd.f32 %v8391_v43, %v10724_v32  ;;  %v6240_v44 = vmax.f32 %v6208_v19, 0.0 }
 0x3c3   : > { %v6243_v10 = vmax.f32 %v6211_v27, 0.0 }
 0x3c4   : > { %v6241_v24 = vmax.f32 %v6209_v36, 0.0  ;;  %v8280_v51 = vpop.f32.mrb[28].mxu1 }
 0x3c5   : > { %v8392_v61 = vadd.f32 %v8280_v51, %v10706_v52  ;;  %v6130_v6 = vpop.f32.mrb[29].mxu1  ;;  %v6261_v39 = vpack.c.bf16 %v6243_v10, %v6242_v49 }
 0x3c6   : > { %v8393_v40 = vadd.f32 %v6130_v6, %v10708_v16  ;;  %v8281_v31 = vpop.f32.mrb[30].mxu1  ;;  %v6260_v57 = vpack.c.bf16 %v6241_v24, %v6240_v44 }
 0x3c7   : > { %v6214_v20 = vadd.f32 %v8392_v61, %v10724_v32  ;;  %v8394_v37 = vadd.f32 %v8281_v31, %v10710_v25  ;;  %v6133_v53 = vpop.f32.mrb[31].mxu1 }
 0x3c8   : > { %v6212_v59 = vadd.f32 %v8393_v40, %v10724_v32  ;;  %v8395_v4 = vadd.f32 %v6133_v53, %v10712_v7  ;;  %8322 = vmatprep.mubr.bf16.mxu0 %v6260_v57  ;;  %v8962_v7 = vld [vmem:[%s9218_s16] sm:$0xff]  }
 0x3c9   : > { %v6215_v52 = vadd.f32 %v8394_v37, %v10724_v32  ;;  %8323 = vmatmul.mubr.bf16.gmra.mrb[88].mxu0 %v6261_v39  ;;  %v6246_v54 = vmax.f32 %v6214_v20, 0.0 }
 0x3ca   : > { %v6213_v16 = vadd.f32 %v8395_v4, %v10724_v32  ;;  %v6244_v38 = vmax.f32 %v6212_v59, 0.0  ;;  %v8964_v32 = vld [vmem:[%s9218_s16 + $0x10] sm:$0xff]   ;;  %s6986_s16 = sshll.u32 %s339_s29, 7 }
 0x3cb   : > { %v6247_v28 = vmax.f32 %v6215_v52, 0.0  ;;  %s10830_s24 = scalar_lea.vmem [#allocation6], %s6986_s16 }
 0x3cc   : > { %v6245_v25 = vmax.f32 %v6213_v16, 0.0  ;;  %s6906_s21 = sshll.u32 %s10830_s24, 4  ;;  %s10881_s21 = int_to_ptr.vmem [resolvable:$true] %s6906_s21 }
 0x3cd   : > { %v6263_v46 = vpack.c.bf16 %v6247_v28, %v6246_v54  ;;  %s9006_s25 = scalar_lea.vmem %s10881_s21, 2048  ;;  %p9013_p2 = scmp.lt.s32.totalorder %s10881_s21, %s9011_s28 }
 0x3ce   : > { %v6262_v48 = vpack.c.bf16 %v6245_v25, %v6244_v38  ;;  %p9007_p6 = scmp.ne.s32.totalorder %s10881_s21, %s9006_s25  ;;  %p9014_p3 = scmp.lt.s32.totalorder %s9012_s27, %s9006_s25 }
 0x3d0   : > { %8326 = vmatprep.mubr.bf16.mxu0 %v6262_v48  ;;  %p9008_p10 = pnand %p9007_p6, %p11051_p9  ;;  %p9015_p4 = por %p9014_p3, %p9013_p2 }
 0x3d1   : > { %8327 = vmatmul.mubr.bf16.gmra.mrb[92].mxu0 %v6263_v46 }
 0x3d2   : > { %8332 = vmatprep.mubr.msk.bf16.mxu0 %vm590_vm1, %v8962_v7  ;;  %p9009_p12 = pneg %p9008_p10 }
 0x3d4   : > { %p9016_p7 = pnand %p9015_p4, %p9009_p12 }
 0x3d9   : > { %8333 = vmatmul.mubr.msk.bf16.vlgmr.msra.gmra.mrb[64].mxu0 %vm590_vm1, %v8963_v47 }
 0x3da   : > { %8336 = vmatprep.mubr.msk.bf16.mxu0 %vm590_vm1, %v8964_v32 }
 0x3e1   : > { %8337 = vmatmul.mubr.msk.bf16.gmra.mrb[68].mxu0 %vm590_vm1, %v8965_v1 }
 0x3e2   : > { %8340 = vmatprep.mubr.msk.bf16.mxu0 %vm590_vm1, %v8966_v8 }
 0x3e9   : > { %8341 = vmatmul.mubr.msk.bf16.gmra.mrb[72].mxu0 %vm590_vm1, %v8967_v33 }
 0x3ea   : > { %8344 = vmatprep.mubr.msk.bf16.mxu0 %vm590_vm1, %v8968_v13 }
 0x3f1   : > { %8345 = vmatmul.mubr.msk.bf16.gmra.mrb[76].mxu0 %vm590_vm1, %v8969_v55 }
 0x3f2   : > { %8348 = vmatprep.mubr.msk.bf16.mxu0 %vm590_vm1, %v8970_v35 }
 0x3f9   : > { %8349 = vmatmul.mubr.msk.bf16.gmra.mrb[80].mxu0 %vm590_vm1, %v8971_v30 }
 0x3fa   : > { %8352 = vmatprep.mubr.msk.bf16.mxu0 %vm590_vm1, %v8972_v26 }
 0x401   : > { %8353 = vmatmul.mubr.msk.bf16.gmra.mrb[84].mxu0 %vm590_vm1, %v8973_v0 }
 0x402   : > { %8356 = vmatprep.mubr.msk.bf16.mxu0 %vm590_vm1, %v8974_v41 }
 0x409   : > { %8357 = vmatmul.mubr.msk.bf16.gmra.mrb[88].mxu0 %vm590_vm1, %v8975_v12 }
 0x40a   : > { %8360 = vmatprep.mubr.msk.bf16.mxu0 %vm590_vm1, %v8976_v56 }
 0x411   : > { %8361 = vmatmul.mubr.msk.bf16.gmra.mrb[92].mxu0 %vm590_vm1, %v8977_v3 }
 0x4ac   : > { %v8334_v42 = vpop.f32.mrb[64].mxu0 }
 0x4ad   : > { %v8396_v22 = vadd.f32 %v8334_v42, %v7319_v29  ;;  %v6541_v62 = vpop.f32.mrb[65].mxu0 }
 0x4ae   : > { %v8398_v58 = vadd.f32 %v7319_v29, %v6541_v62  ;;  %v8335_v11 = vpop.f32.mrb[66].mxu0 }
 0x4af   : > { %v8397_v63 = vadd.f32 %v8396_v22, %v7328_v23  ;;  %v8401_v50 = vadd.f32 %v10823_v15, %v8335_v11  ;;  %v6544_v45 = vpop.f32.mrb[67].mxu0 }
 0x4b0   : > { %v8399_v60 = vadd.f32 %v8398_v58, %v7328_v23  ;;  %v8403_v21 = vadd.f32 %v10823_v15, %v6544_v45 }
 0x4b1   : > { %v6702_v9 = vmax.f32 %v8397_v63, 0.0  ;;  %v6703_v14 = vmax.f32 %v8401_v50, 0.0 }
 0x4b2   : > { %v6700_v2 = vmax.f32 %v8399_v60, 0.0  ;;  %v6701_v17 = vmax.f32 %v8403_v21, 0.0 }
 0x4b3   : > { %v7455_v34 = vpack.c.bf16 %v6703_v14, %v6702_v9 }
 0x4b4   : > { %v7450_v5 = vpack.c.bf16 %v6701_v17, %v6700_v2  ;;  %v8338_v18 = vpop.f32.mrb[68].mxu0 }
 0x4b5   : > { %7527 = vst [vmem:[%s10830_s24 + $0x8] sm:$0xff] %v7455_v34   ;;  %v8405_v19 = vadd.f32 %v10823_v15, %v8338_v18  ;;  %v6557_v43 = vpop.f32.mrb[69].mxu0 }
 0x4b6   : > { %7451 = vst [vmem:[%s10830_s24] sm:$0xff] %v7450_v5   ;;  %v8407_v27 = vadd.f32 %v10823_v15, %v6557_v43  ;;  %v8339_v36 = vpop.f32.mrb[70].mxu0 }
 0x4b7   : > { %v8409_v49 = vadd.f32 %v10823_v15, %v8339_v36  ;;  %v6560_v10 = vpop.f32.mrb[71].mxu0  ;;  %v6706_v24 = vmax.f32 %v8405_v19, 0.0 }
 0x4b8   : > { %v8411_v44 = vadd.f32 %v10823_v15, %v6560_v10  ;;  %v6704_v61 = vmax.f32 %v8407_v27, 0.0 }
 0x4b9   : > { %v6707_v51 = vmax.f32 %v8409_v49, 0.0 }
 0x4ba   : > { %v6705_v6 = vmax.f32 %v8411_v44, 0.0 }
 0x4bb   : > { %v7465_v39 = vpack.c.bf16 %v6707_v51, %v6706_v24 }
 0x4bc   : > { %v7460_v40 = vpack.c.bf16 %v6705_v6, %v6704_v61  ;;  %v8342_v31 = vpop.f32.mrb[72].mxu0 }
 0x4bd   : > { %7529 = vst [vmem:[%s10830_s24 + $0x18] sm:$0xff] %v7465_v39   ;;  %v8413_v57 = vadd.f32 %v10823_v15, %v8342_v31  ;;  %v6573_v20 = vpop.f32.mrb[73].mxu0 }
 0x4be   : > { %7528 = vst [vmem:[%s10830_s24 + $0x10] sm:$0xff] %v7460_v40   ;;  %v8415_v37 = vadd.f32 %v10823_v15, %v6573_v20  ;;  %v8343_v53 = vpop.f32.mrb[74].mxu0 }
 0x4bf   : > { %v8417_v59 = vadd.f32 %v10823_v15, %v8343_v53  ;;  %v6576_v4 = vpop.f32.mrb[75].mxu0  ;;  %v6710_v16 = vmax.f32 %v8413_v57, 0.0 }
 0x4c0   : > { %v8419_v52 = vadd.f32 %v10823_v15, %v6576_v4  ;;  %v6708_v28 = vmax.f32 %v8415_v37, 0.0 }
 0x4c1   : > { %v6711_v54 = vmax.f32 %v8417_v59, 0.0 }
 0x4c2   : > { %v6709_v38 = vmax.f32 %v8419_v52, 0.0 }
 0x4c3   : > { %v7475_v25 = vpack.c.bf16 %v6711_v54, %v6710_v16 }
 0x4c4   : > { %v7470_v46 = vpack.c.bf16 %v6709_v38, %v6708_v28  ;;  %v8346_v48 = vpop.f32.mrb[76].mxu0 }
 0x4c5   : > { %7531 = vst [vmem:[%s10830_s24 + $0x28] sm:$0xff] %v7475_v25   ;;  %v8421_v7 = vadd.f32 %v10823_v15, %v8346_v48  ;;  %v6589_v47 = vpop.f32.mrb[77].mxu0 }
 0x4c6   : > { %7530 = vst [vmem:[%s10830_s24 + $0x20] sm:$0xff] %v7470_v46   ;;  %v8423_v32 = vadd.f32 %v10823_v15, %v6589_v47  ;;  %v8347_v1 = vpop.f32.mrb[78].mxu0 }
 0x4c7   : > { %v8425_v8 = vadd.f32 %v10823_v15, %v8347_v1  ;;  %v6592_v33 = vpop.f32.mrb[79].mxu0  ;;  %v6714_v55 = vmax.f32 %v8421_v7, 0.0 }
 0x4c8   : > { %v8427_v13 = vadd.f32 %v10823_v15, %v6592_v33  ;;  %v6712_v30 = vmax.f32 %v8423_v32, 0.0 }
 0x4c9   : > { %v6715_v35 = vmax.f32 %v8425_v8, 0.0 }
 0x4ca   : > { %v6713_v26 = vmax.f32 %v8427_v13, 0.0 }
 0x4cb   : > { %v7485_v0 = vpack.c.bf16 %v6715_v35, %v6714_v55 }
 0x4cc   : > { %v7480_v41 = vpack.c.bf16 %v6713_v26, %v6712_v30  ;;  %v8350_v12 = vpop.f32.mrb[80].mxu0 }
 0x4cd   : > { %7533 = vst [vmem:[%s10830_s24 + $0x38] sm:$0xff] %v7485_v0   ;;  %v8429_v56 = vadd.f32 %v10823_v15, %v8350_v12  ;;  %v6605_v3 = vpop.f32.mrb[81].mxu0 }
 0x4ce   : > { %7532 = vst [vmem:[%s10830_s24 + $0x30] sm:$0xff] %v7480_v41   ;;  %v8431_v29 = vadd.f32 %v10823_v15, %v6605_v3  ;;  %v8351_v23 = vpop.f32.mrb[82].mxu0 }
 0x4cf   : > { %v8433_v42 = vadd.f32 %v10823_v15, %v8351_v23  ;;  %v6608_v22 = vpop.f32.mrb[83].mxu0  ;;  %v6718_v58 = vmax.f32 %v8429_v56, 0.0 }
 0x4d0   : > { %v8435_v62 = vadd.f32 %v10823_v15, %v6608_v22  ;;  %v6716_v63 = vmax.f32 %v8431_v29, 0.0 }
 0x4d1   : > { %v6719_v11 = vmax.f32 %v8433_v42, 0.0 }
 0x4d2   : > { %v6717_v50 = vmax.f32 %v8435_v62, 0.0 }
 0x4d3   : > { %v7495_v45 = vpack.c.bf16 %v6719_v11, %v6718_v58 }
 0x4d4   : > { %v7490_v60 = vpack.c.bf16 %v6717_v50, %v6716_v63  ;;  %v8354_v21 = vpop.f32.mrb[84].mxu0 }
 0x4d5   : > { %7535 = vst [vmem:[%s10830_s24 + $0x48] sm:$0xff] %v7495_v45   ;;  %v8437_v9 = vadd.f32 %v10823_v15, %v8354_v21  ;;  %v6621_v14 = vpop.f32.mrb[85].mxu0 }
 0x4d6   : > { %7534 = vst [vmem:[%s10830_s24 + $0x40] sm:$0xff] %v7490_v60   ;;  %v8439_v2 = vadd.f32 %v10823_v15, %v6621_v14  ;;  %v8355_v17 = vpop.f32.mrb[86].mxu0 }
 0x4d7   : > { %v8441_v34 = vadd.f32 %v10823_v15, %v8355_v17  ;;  %v6624_v5 = vpop.f32.mrb[87].mxu0  ;;  %v6722_v19 = vmax.f32 %v8437_v9, 0.0 }
 0x4d8   : > { %v8443_v18 = vadd.f32 %v10823_v15, %v6624_v5  ;;  %v6720_v27 = vmax.f32 %v8439_v2, 0.0 }
 0x4d9   : > { %v6723_v43 = vmax.f32 %v8441_v34, 0.0 }
 0x4da   : > { %v6721_v36 = vmax.f32 %v8443_v18, 0.0 }
 0x4db   : > { %v7505_v49 = vpack.c.bf16 %v6723_v43, %v6722_v19 }
 0x4dc   : > { %v7500_v10 = vpack.c.bf16 %v6721_v36, %v6720_v27  ;;  %v8358_v44 = vpop.f32.mrb[88].mxu0 }
 0x4dd   : > { %7537 = vst [vmem:[%s10830_s24 + $0x58] sm:$0xff] %v7505_v49   ;;  %v8445_v24 = vadd.f32 %v10823_v15, %v8358_v44  ;;  %v6637_v51 = vpop.f32.mrb[89].mxu0 }
 0x4de   : > { %7536 = vst [vmem:[%s10830_s24 + $0x50] sm:$0xff] %v7500_v10   ;;  %v8447_v61 = vadd.f32 %v10823_v15, %v6637_v51  ;;  %v8359_v6 = vpop.f32.mrb[90].mxu0 }
 0x4df   : > { %v8449_v39 = vadd.f32 %v10823_v15, %v8359_v6  ;;  %v6640_v40 = vpop.f32.mrb[91].mxu0  ;;  %v6726_v57 = vmax.f32 %v8445_v24, 0.0 }
 0x4e0   : > { %v8451_v31 = vadd.f32 %v10823_v15, %v6640_v40  ;;  %v6724_v37 = vmax.f32 %v8447_v61, 0.0 }
 0x4e1   : > { %v6727_v20 = vmax.f32 %v8449_v39, 0.0 }
 0x4e2   : > { %v6725_v53 = vmax.f32 %v8451_v31, 0.0 }
 0x4e3   : > { %v7515_v59 = vpack.c.bf16 %v6727_v20, %v6726_v57 }
 0x4e4   : > { %v7510_v4 = vpack.c.bf16 %v6725_v53, %v6724_v37  ;;  %v8362_v52 = vpop.f32.mrb[92].mxu0 }
 0x4e5   : > { %7539 = vst [vmem:[%s10830_s24 + $0x68] sm:$0xff] %v7515_v59   ;;  %v8453_v16 = vadd.f32 %v10823_v15, %v8362_v52  ;;  %v6653_v54 = vpop.f32.mrb[93].mxu0 }
 0x4e6   : > { %7538 = vst [vmem:[%s10830_s24 + $0x60] sm:$0xff] %v7510_v4   ;;  %v8455_v28 = vadd.f32 %v10823_v15, %v6653_v54  ;;  %v8363_v38 = vpop.f32.mrb[94].mxu0 }
 0x4e7   : > { %v8457_v25 = vadd.f32 %v10823_v15, %v8363_v38  ;;  %v6656_v46 = vpop.f32.mrb[95].mxu0  ;;  %v6730_v7 = vmax.f32 %v8453_v16, 0.0 }
 0x4e8   : > { %v8459_v48 = vadd.f32 %v10823_v15, %v6656_v46  ;;  %v6728_v32 = vmax.f32 %v8455_v28, 0.0 }
 0x4e9   : > { %v6731_v47 = vmax.f32 %v8457_v25, 0.0 }
 0x4ea   : > { %v6729_v1 = vmax.f32 %v8459_v48, 0.0 }
 0x4eb   : > { %v7525_v8 = vpack.c.bf16 %v6731_v47, %v6730_v7 }
 0x4ec   : > { %v7520_v33 = vpack.c.bf16 %v6729_v1, %v6728_v32 }
 0x4ed   : > { %7541 = vst [vmem:[%s10830_s24 + $0x78] sm:$0xff] %v7525_v8  }
 0x4ee   : > { %7540 = vst [vmem:[%s10830_s24 + $0x70] sm:$0xff] %v7520_v33  }
 0x4ef   : > { %9019 = shalt.err (!%p9016_p7)
}
 0x4f0   : > { %s9020_s29 = scalar_lea.hbm %s10879_s22, 2048  ;;  %s9024_s14 = scalar_lea.hbm %s10937_s9, 4096 }
 0x4f1   : > { %p9021_p8 = scmp.ne.s32.totalorder %s10879_s22, %s9020_s29  ;;  %p9025_p1 = scmp.lt.u32.totalorder %s10879_s22, %s10937_s9 }
 0x4f2   : > { %p9026_p0 = scmp.lt.u32.totalorder %s9024_s14, %s9020_s29  ;;  %p9028_p6 = scmp.lt.u32.totalorder %s9020_s29, %s10879_s22 }
 0x4f3   : > { %p9022_p11 = pnand %p9021_p8, %p11051_p9 }
 0x4f4   : > { %p9027_p5 = por %p9026_p0, %p9025_p1 }
 0x4f5   : > { %p9023_p13 = pneg %p9022_p11 }
 0x4f6   : > { %p9029_p10 = por %p9028_p6, %p9027_p5 }
 0x4f8   : > { %p9030_p12 = pnand %p9029_p10, %p9023_p13 }
 0x4fa   : > { %9033 = shalt.err (!%p9030_p12)
}
 0x4fb   : > { %s9079_s25 = smov 64   ;;  %s9080_s26 = smov 4  }
 0x4fc   : > { %8722 = dma.vmem_to_hbm [thread:$0]  (%p11051_p9), %s10881_s21, 2048, %s10879_s22, %s10887_s13, %s9079_s25, %s9079_s25, %s9080_s26  }
 0x4fd PF: > { %p8734_p2 = scmp.ge.s32.totalorder %s9072_s12, 2  ;;  %s6921_s28 = sand.u32 1, %s9060_s30  }
 0x4fe   : > { %p11052_p3 = scmp.ne.s32.totalorder %s10964_s20, 0  ;;  %s6922_s27 = scalar_lea.sflag [#allocation5], %s6921_s28 }
 0x500   : > { %p8729_p4 = pnand %p8734_p2, %p11052_p3 }
 0x502   : > { %9055 = dma.done.wait (!%p8729_p4), %s6922_s27, 2048  }
 0x503   : > { %9057 = vsyncadd (!%p8729_p4), %s6922_s27, 4294965248  ;;  %p20_p7 = scmp.ge.s32.totalorder %s9156_s15, 4   ;;  %s11053_s30 = smov %s9064_s10 }
 0x504   : > { %s11054_s10 = smov %s9068_s11  ;;  %s11055_s11 = smov %s9167_s18 }
 0x505   : > { %s11056_s12 = smov %s9156_s15  ;;  %22 = sbr.rel (!%p20_p7) target bundleno = 4 (0x4), region = 107 }
 0x50c   :  { %6927 = vsyncpa [#allocation4], 1 }
 0x50d   :  { %6929 = vsyncpa [#allocation4 + $0x1], 1 }
 0x50e   :  { %6930 = vsyncpa [#allocation5], 1 }
 0x50f   :  { %6932 = vsyncpa [#allocation5 + $0x1], 1 }

</bundles_post_ra>
